<compile_context>
chip_gen: v7x
topology: tpu7x:2x2x1
jax: 0.10.0
libtpu: 0.0.40
codegen_flags: <defaults>
</compile_context>

<pallas_src>
import math

import jax
import jax.numpy as jnp
from jax.experimental import pallas as pl
from jax.experimental.pallas import tpu as pltpu

EPS = 1e-5  # nn.LayerNorm default eps


def _layernorm(x, w, b):
    # x: (M, E); w, b: (1, E). Biased variance, matches nn.LayerNorm.
    mu = jnp.mean(x, axis=-1, keepdims=True)
    xc = x - mu
    var = jnp.mean(xc * xc, axis=-1, keepdims=True)
    return xc * jax.lax.rsqrt(var + EPS) * w + b


def _ffn_chunk(H):
    """Hidden-dim chunk for the FFN (bounds the (M, chunk) live temporary)."""
    for c in (1024, 512):
        if H > c and H % c == 0:
            return c
    return H


def bertlayer_kernel(x_ref,
                     ln1w_ref, ln1b_ref,
                     wqkv_ref, bqkv_ref,
                     wo_ref, bo_ref,
                     ln2w_ref, ln2b_ref,
                     w1_ref, b1_ref, w2_ref, b2_ref,
                     o_ref):
    x = x_ref[...]                                   # (L, B_TILE, E) f32, seq-first
    L, B, E = x.shape
    M = L * B
    x2d = x.reshape(M, E)                            # collapse leading dims (layout-free)

    # ----- attention pre-norm (f32) -----
    xn = _layernorm(x2d, ln1w_ref[...], ln1b_ref[...])

    # ----- fused QKV projection, one MXU op (1/sqrt(E) folded into Wq/bq) -----
    qkv = jnp.dot(xn.astype(jnp.bfloat16), wqkv_ref[...],
                  preferred_element_type=jnp.float32) + bqkv_ref[...]   # (M, 3E)
    q = qkv[:, 0 * E:1 * E].reshape(L, B, E)
    k = qkv[:, 1 * E:2 * E].reshape(L, B, E)
    v = qkv[:, 2 * E:3 * E].reshape(L, B, E)

    # (L,B,E) -> (B,L,E): E stays in lanes, sublane-only permute (XLU), hidden
    # under the surrounding MXU work.
    qb = jnp.transpose(q, (1, 0, 2)).astype(jnp.bfloat16)
    kb = jnp.transpose(k, (1, 0, 2)).astype(jnp.bfloat16)
    vb = jnp.transpose(v, (1, 0, 2)).astype(jnp.bfloat16)

    # ----- single-head attention per sequence in the batch tile -----
    scores = jnp.einsum('bqe,bke->bqk', qb, kb,
                        preferred_element_type=jnp.float32)             # (B, L, L)
    m = jnp.max(scores, axis=-1, keepdims=True)
    p = jnp.exp(scores - m)
    denom = jnp.sum(p, axis=-1, keepdims=True)
    attn = p * pl.reciprocal(denom, approx=True)

    ctx = jnp.einsum('bqk,bke->bqe', attn.astype(jnp.bfloat16), vb,
                     preferred_element_type=jnp.float32)                # (B, L, E)
    ctx2d = jnp.transpose(ctx, (1, 0, 2)).reshape(M, E)                 # back to (l, b) row order
    attn_out = jnp.dot(ctx2d.astype(jnp.bfloat16), wo_ref[...],
                       preferred_element_type=jnp.float32) + bo_ref[...]

    x1 = attn_out + x2d                              # attention residual (f32)

    # ----- FFN pre-norm + FFN (inner residual adds the normalized y) -----
    y = _layernorm(x1, ln2w_ref[...], ln2b_ref[...])
    yb = y.astype(jnp.bfloat16)

    H = w1_ref.shape[1]
    CH = _ffn_chunk(H)
    f = jnp.zeros((M, E), jnp.float32)
    for c in range(H // CH):                         # static, small trip count
        lo, hi = c * CH, (c + 1) * CH
        h = jnp.dot(yb, w1_ref[:, lo:hi],
                    preferred_element_type=jnp.float32) + b1_ref[:, lo:hi]
        h = jnp.maximum(h, 0.0)
        f = f + jnp.dot(h.astype(jnp.bfloat16), w2_ref[lo:hi, :],
                        preferred_element_type=jnp.float32)
    f = f + b2_ref[...]

    # out = x1 + ffn(ln2(x1)) = x1 + y + linear2(relu(linear1(y)))
    o_ref[...] = (x1 + y + f).reshape(L, B, E).astype(o_ref.dtype)


# ---------------------------------------------------------------------------
# Generation-aware tiling / VMEM budgeting
# ---------------------------------------------------------------------------

def _vmem_capacity_bytes():
    try:
        return int(pltpu.get_tpu_info().vmem_capacity_bytes)
    except Exception:
        return 64 * 1024 * 1024  # conservative (v7x-sized) fallback


def _vmem_estimate(bt, L, E, H):
    """Rough resident-VMEM estimate for one grid step (bytes)."""
    M = bt * L
    ch = _ffn_chunk(H)
    weights = 2 * (3 * E * E + E * E + 2 * E * H)        # bf16, single-buffered
    biases = 4 * (3 * E + E + H + 5 * E)                 # f32
    io_blocks = 2 * 2 * (M * E * 4)                      # x + out blocks, double-buffered
    temps = 4 * (M * 3 * E + 2 * bt * L * L + 6 * M * E + M * ch)
    return weights + biases + io_blocks + temps


def _pick_b_tile(n, seq_len, E, H, vmem_budget, prefer_even_steps,
                 target_rows=512):
    """Largest batch tile giving ~target_rows MXU rows that fits the VMEM budget.

    Second-minor block dim (the batch tile) is kept 8-aligned (or the full
    batch) for the (8,128) layout rule; on 64 MiB / 2-TC parts (v7x) an even
    number of grid steps is preferred so both TensorCores get equal work.
    """
    cands = [d for d in range(1, n + 1)
             if n % d == 0 and (d % 8 == 0 or d == n)]

    def score(bt):
        rows = bt * seq_len
        fits = _vmem_estimate(bt, seq_len, E, H) <= vmem_budget
        steps = n // bt
        even = (steps >= 2 and steps % 2 == 0) if prefer_even_steps else True
        return (fits, even, rows <= target_rows,
                rows if rows <= target_rows else -rows)

    return max(cands, key=score)


def prepare_params(params, compute_dtype=jnp.bfloat16):
    """One-time transform: fuse QKV, fold the 1/sqrt(E) attention scale into
    Wq/bq, cast matmul weights to the MXU compute dtype. Semantics preserved."""
    E = params["wq"].shape[0]
    scale = 1.0 / math.sqrt(E)  # head_dim == E for num_head == 1
    wqkv = jnp.concatenate(
        [params["wq"] * scale, params["wk"], params["wv"]], axis=1)     # (E, 3E)
    bqkv = jnp.concatenate(
        [params["bq"] * scale, params["bk"], params["bv"]], axis=1)     # (1, 3E)
    return {
        "ln1_w": params["ln1_w"].astype(jnp.float32),
        "ln1_b": params["ln1_b"].astype(jnp.float32),
        "wqkv": wqkv.astype(compute_dtype),
        "bqkv": bqkv.astype(jnp.float32),
        "wo": params["wo"].astype(compute_dtype),
        "bo": params["bo"].astype(jnp.float32),
        "ln2_w": params["ln2_w"].astype(jnp.float32),
        "ln2_b": params["ln2_b"].astype(jnp.float32),
        "w1": params["w1"].astype(compute_dtype),
        "b1": params["b1"].astype(jnp.float32),
        "w2": params["w2"].astype(compute_dtype),
        "b2": params["b2"].astype(jnp.float32),
    }


def bertlayer_forward(x_lne, prepared, out_dtype=jnp.float32):
    """x_lne: (L, N, E) f32 (PyTorch seq-first MultiheadAttention layout).

    No host-side transposes: the kernel consumes (L, N, E) directly in blocks
    of B_TILE full sequences. out_dtype=jnp.bfloat16 halves output HBM traffic
    if the consumer tolerates it.
    """
    L, N, E = x_lne.shape
    H = prepared["w1"].shape[1]

    cap = _vmem_capacity_bytes()
    budget = int(0.75 * cap)                       # never request full physical VMEM
    prefer_even_steps = cap <= 64 * 1024 * 1024    # v7x-like: 64 MiB/TC, 2 TCs/chip
    B_TILE = _pick_b_tile(N, L, E, H, budget, prefer_even_steps)
    grid = (N // B_TILE,)

    est = _vmem_estimate(B_TILE, L, E, H)
    # Always set explicitly (v5e default is only 16 MiB); with headroom, capped
    # at 0.75 * physical so v7x keeps slack for compiler scratch/spills.
    vmem_limit = int(min(max(int(1.5 * est), 32 * 1024 * 1024), budget))

    def build_call(single_buffer_weights):
        def const_spec(shape):
            kw = {}
            if single_buffer_weights:
                # Constant index_map -> never re-fetched; one VMEM buffer suffices.
                kw["pipeline_mode"] = pl.Buffered(1)
            return pl.BlockSpec(shape, lambda b: (0,) * len(shape), **kw)

        weight_specs = [
            const_spec((1, E)), const_spec((1, E)),            # ln1 w, b
            const_spec((E, 3 * E)), const_spec((1, 3 * E)),    # fused Wqkv, bqkv
            const_spec((E, E)), const_spec((1, E)),            # Wo, bo
            const_spec((1, E)), const_spec((1, E)),            # ln2 w, b
            const_spec((E, H)), const_spec((1, H)),            # W1, b1
            const_spec((H, E)), const_spec((1, E)),            # W2, b2
        ]
        return pl.pallas_call(
            bertlayer_kernel,
            out_shape=jax.ShapeDtypeStruct((L, N, E), out_dtype),
            grid_spec=pltpu.PrefetchScalarGridSpec(
                num_scalar_prefetch=0,
                grid=grid,
                in_specs=[pl.BlockSpec((L, B_TILE, E), lambda b: (0, b, 0))]
                         + weight_specs,
                out_specs=pl.BlockSpec((L, B_TILE, E), lambda b: (0, b, 0)),
            ),
            compiler_params=pltpu.CompilerParams(
                dimension_semantics=("parallel",),
                vmem_limit_bytes=vmem_limit),
        )

    args = (x_lne,
            prepared["ln1_w"], prepared["ln1_b"],
            prepared["wqkv"], prepared["bqkv"],
            prepared["wo"], prepared["bo"],
            prepared["ln2_w"], prepared["ln2_b"],
            prepared["w1"], prepared["b1"],
            prepared["w2"], prepared["b2"])

    try:
        return build_call(True)(*args)
    except Exception:
        # Older jax without pipeline_mode / Buffered(1): fall back to default
        # (double-buffered) weight specs; semantics identical.
        return build_call(False)(*args)


def reference_forward(x_lne, params):
    """Pure-JAX f32 reference mirroring the PyTorch module semantics."""
    def ln(x, w, b):
        mu = jnp.mean(x, axis=-1, keepdims=True)
        var = jnp.mean((x - mu) ** 2, axis=-1, keepdims=True)
        return (x - mu) / jnp.sqrt(var + EPS) * w[0] + b[0]

    x = jnp.transpose(x_lne, (1, 0, 2))  # (N, L, E)
    resid = x
    xn = ln(x, params["ln1_w"], params["ln1_b"])
    q = xn @ params["wq"] + params["bq"][0]
    k = xn @ params["wk"] + params["bk"][0]
    v = xn @ params["wv"] + params["bv"][0]
    E = q.shape[-1]
    scores = (q / math.sqrt(E)) @ jnp.swapaxes(k, -1, -2)
    attn = jax.nn.softmax(scores, axis=-1)
    attn_out = (attn @ v) @ params["wo"] + params["bo"][0]
    x1 = attn_out + resid
    y = ln(x1, params["ln2_w"], params["ln2_b"])
    h = jax.nn.relu(y @ params["w1"] + params["b1"][0])
    f = h @ params["w2"] + params["b2"][0]
    out = x1 + y + f
    return jnp.transpose(out, (1, 0, 2))


def init_params(key, E, H):
    ks = jax.random.split(key, 10)
    s = 0.05
    return {
        "ln1_w": jnp.ones((1, E), jnp.float32),
        "ln1_b": jnp.zeros((1, E), jnp.float32),
        # projection weights stored pre-transposed: y = x @ W + b
        "wq": s * jax.random.normal(ks[0], (E, E), jnp.float32),
        "wk": s * jax.random.normal(ks[1], (E, E), jnp.float32),
        "wv": s * jax.random.normal(ks[2], (E, E), jnp.float32),
        "bq": s * jax.random.normal(ks[3], (1, E), jnp.float32),
        "bk": s * jax.random.normal(ks[4], (1, E), jnp.float32),
        "bv": s * jax.random.normal(ks[5], (1, E), jnp.float32),
        "wo": s * jax.random.normal(ks[6], (E, E), jnp.float32),
        "bo": jnp.zeros((1, E), jnp.float32),
        "ln2_w": jnp.ones((1, E), jnp.float32),
        "ln2_b": jnp.zeros((1, E), jnp.float32),
        "w1": s * jax.random.normal(ks[7], (E, H), jnp.float32),
        "b1": s * jax.random.normal(ks[8], (1, H), jnp.float32),
        "w2": s * jax.random.normal(ks[9], (H, E), jnp.float32),
        "b2": jnp.zeros((1, E), jnp.float32),
    }


if __name__ == "__main__":
    # seq_len, batch, embeddingdim, hidden_dim (small demo shapes; note this
    # toy config is lane-starved (E=32) -- do not use it for perf tuning).
    L, N, E, H = 8, 16, 32, 64
    key = jax.random.PRNGKey(0)
    kx, kp = jax.random.split(key)
    x = jax.random.normal(kx, (L, N, E), jnp.float32)
    params = init_params(kp, E, H)

    prepared = prepare_params(params, compute_dtype=jnp.bfloat16)
    out = jax.block_until_ready(bertlayer_forward(x, prepared))

    ref = reference_forward(x, params)
    assert out.shape == (L, N, E)
    err = float(jnp.max(jnp.abs(out.astype(jnp.float32) - ref)))
    assert err < 5e-2, f"mismatch vs reference: {err}"

    # TODO(synk): key_padding_mask path (module default None) not implemented.
    print("KERNEL_OK")
</pallas_src>

<mosaic_0001>
module attributes {stable_mosaic.version = 11 : i64} {
  func.func @bertlayer_kernel(%arg0: i32, %arg1: memref<8x8x32xf32, #tpu.memory_space<vmem>>, %arg2: memref<1x32xf32, #tpu.memory_space<vmem>>, %arg3: memref<1x32xf32, #tpu.memory_space<vmem>>, %arg4: memref<32x96xbf16, #tpu.memory_space<vmem>>, %arg5: memref<1x96xf32, #tpu.memory_space<vmem>>, %arg6: memref<32x32xbf16, #tpu.memory_space<vmem>>, %arg7: memref<1x32xf32, #tpu.memory_space<vmem>>, %arg8: memref<1x32xf32, #tpu.memory_space<vmem>>, %arg9: memref<1x32xf32, #tpu.memory_space<vmem>>, %arg10: memref<32x64xbf16, #tpu.memory_space<vmem>>, %arg11: memref<1x64xf32, #tpu.memory_space<vmem>>, %arg12: memref<64x32xbf16, #tpu.memory_space<vmem>>, %arg13: memref<1x32xf32, #tpu.memory_space<vmem>>, %arg14: memref<8x8x32xf32, #tpu.memory_space<vmem>>) attributes {dimension_semantics = [#tpu.dimension_semantics<parallel>], iteration_bounds = array<i64: 2>, scalar_prefetch = 0 : i64, scratch_operands = 0 : i64, tpu.core_type = #tpu.core_type<tc>, window_params = [{transform_indices = @transform_0, window_bounds = array<i64: 8, 8, 32>}, {pipeline_mode = #tpu.pipeline_mode<synchronous>, transform_indices = @transform_1, window_bounds = array<i64: 1, 32>}, {pipeline_mode = #tpu.pipeline_mode<synchronous>, transform_indices = @transform_2, window_bounds = array<i64: 1, 32>}, {pipeline_mode = #tpu.pipeline_mode<synchronous>, transform_indices = @transform_3, window_bounds = array<i64: 32, 96>}, {pipeline_mode = #tpu.pipeline_mode<synchronous>, transform_indices = @transform_4, window_bounds = array<i64: 1, 96>}, {pipeline_mode = #tpu.pipeline_mode<synchronous>, transform_indices = @transform_5, window_bounds = array<i64: 32, 32>}, {pipeline_mode = #tpu.pipeline_mode<synchronous>, transform_indices = @transform_6, window_bounds = array<i64: 1, 32>}, {pipeline_mode = #tpu.pipeline_mode<synchronous>, transform_indices = @transform_7, window_bounds = array<i64: 1, 32>}, {pipeline_mode = #tpu.pipeline_mode<synchronous>, transform_indices = @transform_8, window_bounds = array<i64: 1, 32>}, {pipeline_mode = #tpu.pipeline_mode<synchronous>, transform_indices = @transform_9, window_bounds = array<i64: 32, 64>}, {pipeline_mode = #tpu.pipeline_mode<synchronous>, transform_indices = @transform_10, window_bounds = array<i64: 1, 64>}, {pipeline_mode = #tpu.pipeline_mode<synchronous>, transform_indices = @transform_11, window_bounds = array<i64: 64, 32>}, {pipeline_mode = #tpu.pipeline_mode<synchronous>, transform_indices = @transform_12, window_bounds = array<i64: 1, 32>}, {transform_indices = @transform_13, window_bounds = array<i64: 8, 8, 32>}]} {
    %c0 = arith.constant 0 : index
    %c0_0 = arith.constant 0 : index
    %c0_1 = arith.constant 0 : index
    %0 = vector.load %arg1[%c0, %c0_0, %c0_1] : memref<8x8x32xf32, #tpu.memory_space<vmem>>, vector<8x8x32xf32>
    %1 = vector.shape_cast %0 : vector<8x8x32xf32> to vector<64x32xf32>
    %c0_2 = arith.constant 0 : index
    %c0_3 = arith.constant 0 : index
    %2 = vector.load %arg2[%c0_2, %c0_3] : memref<1x32xf32, #tpu.memory_space<vmem>>, vector<1x32xf32>
    %c0_4 = arith.constant 0 : index
    %c0_5 = arith.constant 0 : index
    %3 = vector.load %arg3[%c0_4, %c0_5] : memref<1x32xf32, #tpu.memory_space<vmem>>, vector<1x32xf32>
    %cst = arith.constant dense<0.000000e+00> : vector<64xf32>
    %4 = vector.multi_reduction <add>, %1, %cst [1] : vector<64x32xf32> to vector<64xf32>
    %5 = vector.shape_cast %4 : vector<64xf32> to vector<64x1xf32>
    %cst_6 = arith.constant 3.200000e+01 : f32
    %6 = vector.broadcast %cst_6 : f32 to vector<64x1xf32>
    %7 = arith.divf %5, %6 : vector<64x1xf32>
    %8 = vector.broadcast %7 : vector<64x1xf32> to vector<64x32xf32>
    %9 = arith.subf %1, %8 : vector<64x32xf32>
    %10 = arith.mulf %9, %9 : vector<64x32xf32>
    %cst_7 = arith.constant dense<0.000000e+00> : vector<64xf32>
    %11 = vector.multi_reduction <add>, %10, %cst_7 [1] : vector<64x32xf32> to vector<64xf32>
    %12 = vector.shape_cast %11 : vector<64xf32> to vector<64x1xf32>
    %cst_8 = arith.constant 3.200000e+01 : f32
    %13 = vector.broadcast %cst_8 : f32 to vector<64x1xf32>
    %14 = arith.divf %12, %13 : vector<64x1xf32>
    %cst_9 = arith.constant 9.99999974E-6 : f32
    %15 = vector.broadcast %cst_9 : f32 to vector<64x1xf32>
    %16 = arith.addf %14, %15 : vector<64x1xf32>
    %17 = math.rsqrt %16 : vector<64x1xf32>
    %18 = vector.broadcast %17 : vector<64x1xf32> to vector<64x32xf32>
    %19 = arith.mulf %9, %18 : vector<64x32xf32>
    %20 = vector.broadcast %2 : vector<1x32xf32> to vector<64x32xf32>
    %21 = arith.mulf %19, %20 : vector<64x32xf32>
    %22 = vector.broadcast %3 : vector<1x32xf32> to vector<64x32xf32>
    %23 = arith.addf %21, %22 : vector<64x32xf32>
    %24 = arith.truncf %23 : vector<64x32xf32> to vector<64x32xbf16>
    %c0_10 = arith.constant 0 : index
    %c0_11 = arith.constant 0 : index
    %25 = vector.load %arg4[%c0_10, %c0_11] : memref<32x96xbf16, #tpu.memory_space<vmem>>, vector<32x96xbf16>
    %cst_12 = arith.constant dense<0.000000e+00> : vector<64x96xf32>
    %26 = tpu.matmul %24, %25, %cst_12 {dimension_numbers = #tpu.dot_dimension_numbers<[1], [0], [0], [1], [0, 0, 1, 1], [], []>} : vector<64x32xbf16>, vector<32x96xbf16>, vector<64x96xf32> -> vector<64x96xf32>
    %c0_13 = arith.constant 0 : index
    %c0_14 = arith.constant 0 : index
    %27 = vector.load %arg5[%c0_13, %c0_14] : memref<1x96xf32, #tpu.memory_space<vmem>>, vector<1x96xf32>
    %28 = vector.broadcast %27 : vector<1x96xf32> to vector<64x96xf32>
    %29 = arith.addf %26, %28 : vector<64x96xf32>
    %30 = vector.extract_strided_slice %29 {offsets = [0, 0], sizes = [64, 32], strides = [1, 1]} : vector<64x96xf32> to vector<64x32xf32>
    %31 = vector.shape_cast %30 : vector<64x32xf32> to vector<8x8x32xf32>
    %32 = vector.extract_strided_slice %29 {offsets = [0, 32], sizes = [64, 32], strides = [1, 1]} : vector<64x96xf32> to vector<64x32xf32>
    %33 = vector.shape_cast %32 : vector<64x32xf32> to vector<8x8x32xf32>
    %34 = vector.extract_strided_slice %29 {offsets = [0, 64], sizes = [64, 32], strides = [1, 1]} : vector<64x96xf32> to vector<64x32xf32>
    %35 = vector.shape_cast %34 : vector<64x32xf32> to vector<8x8x32xf32>
    %36 = tpu.transpose %31, [1, 0, 2] : vector<8x8x32xf32> -> vector<8x8x32xf32>
    %37 = arith.truncf %36 : vector<8x8x32xf32> to vector<8x8x32xbf16>
    %38 = tpu.transpose %33, [1, 0, 2] : vector<8x8x32xf32> -> vector<8x8x32xf32>
    %39 = arith.truncf %38 : vector<8x8x32xf32> to vector<8x8x32xbf16>
    %40 = tpu.transpose %35, [1, 0, 2] : vector<8x8x32xf32> -> vector<8x8x32xf32>
    %41 = arith.truncf %40 : vector<8x8x32xf32> to vector<8x8x32xbf16>
    "tpu.trace_start"() <{level = 10 : i32, message = "bqe,bke->bqk"}> : () -> ()
    %cst_15 = arith.constant dense<0.000000e+00> : vector<8x8x8xf32>
    %42 = tpu.matmul %37, %39, %cst_15 {dimension_numbers = #tpu.dot_dimension_numbers<[2], [2], [1], [1], [0, 0, 0, 1, 1, 1], [0], [0]>} : vector<8x8x32xbf16>, vector<8x8x32xbf16>, vector<8x8x8xf32> -> vector<8x8x8xf32>
    "tpu.trace_stop"() : () -> ()
    %cst_16 = arith.constant dense<0xFF800000> : vector<8x8xf32>
    %43 = vector.multi_reduction <maximumf>, %42, %cst_16 [2] : vector<8x8x8xf32> to vector<8x8xf32>
    %44 = vector.shape_cast %43 : vector<8x8xf32> to vector<8x8x1xf32>
    %45 = vector.broadcast %44 : vector<8x8x1xf32> to vector<8x8x8xf32>
    %46 = arith.subf %42, %45 : vector<8x8x8xf32>
    %47 = math.exp %46 : vector<8x8x8xf32>
    %cst_17 = arith.constant dense<0.000000e+00> : vector<8x8xf32>
    %48 = vector.multi_reduction <add>, %47, %cst_17 [2] : vector<8x8x8xf32> to vector<8x8xf32>
    %49 = vector.shape_cast %48 : vector<8x8xf32> to vector<8x8x1xf32>
    %50 = tpu.reciprocal %49 {approx = true} : vector<8x8x1xf32> -> vector<8x8x1xf32>
    %51 = vector.broadcast %50 : vector<8x8x1xf32> to vector<8x8x8xf32>
    %52 = arith.mulf %47, %51 : vector<8x8x8xf32>
    %53 = arith.truncf %52 : vector<8x8x8xf32> to vector<8x8x8xbf16>
    "tpu.trace_start"() <{level = 10 : i32, message = "bqk,bke->bqe"}> : () -> ()
    %cst_18 = arith.constant dense<0.000000e+00> : vector<8x8x32xf32>
    %54 = tpu.matmul %53, %41, %cst_18 {dimension_numbers = #tpu.dot_dimension_numbers<[2], [1], [1], [2], [0, 0, 0, 1, 1, 2], [0], [0]>} : vector<8x8x8xbf16>, vector<8x8x32xbf16>, vector<8x8x32xf32> -> vector<8x8x32xf32>
    "tpu.trace_stop"() : () -> ()
    %55 = tpu.transpose %54, [1, 0, 2] : vector<8x8x32xf32> -> vector<8x8x32xf32>
    %56 = vector.shape_cast %55 : vector<8x8x32xf32> to vector<64x32xf32>
    %57 = arith.truncf %56 : vector<64x32xf32> to vector<64x32xbf16>
    %c0_19 = arith.constant 0 : index
    %c0_20 = arith.constant 0 : index
    %58 = vector.load %arg6[%c0_19, %c0_20] : memref<32x32xbf16, #tpu.memory_space<vmem>>, vector<32x32xbf16>
    %cst_21 = arith.constant dense<0.000000e+00> : vector<64x32xf32>
    %59 = tpu.matmul %57, %58, %cst_21 {dimension_numbers = #tpu.dot_dimension_numbers<[1], [0], [0], [1], [0, 0, 1, 1], [], []>} : vector<64x32xbf16>, vector<32x32xbf16>, vector<64x32xf32> -> vector<64x32xf32>
    %c0_22 = arith.constant 0 : index
    %c0_23 = arith.constant 0 : index
    %60 = vector.load %arg7[%c0_22, %c0_23] : memref<1x32xf32, #tpu.memory_space<vmem>>, vector<1x32xf32>
    %61 = vector.broadcast %60 : vector<1x32xf32> to vector<64x32xf32>
    %62 = arith.addf %59, %61 : vector<64x32xf32>
    %63 = arith.addf %62, %1 : vector<64x32xf32>
    %c0_24 = arith.constant 0 : index
    %c0_25 = arith.constant 0 : index
    %64 = vector.load %arg8[%c0_24, %c0_25] : memref<1x32xf32, #tpu.memory_space<vmem>>, vector<1x32xf32>
    %c0_26 = arith.constant 0 : index
    %c0_27 = arith.constant 0 : index
    %65 = vector.load %arg9[%c0_26, %c0_27] : memref<1x32xf32, #tpu.memory_space<vmem>>, vector<1x32xf32>
    %cst_28 = arith.constant dense<0.000000e+00> : vector<64xf32>
    %66 = vector.multi_reduction <add>, %63, %cst_28 [1] : vector<64x32xf32> to vector<64xf32>
    %67 = vector.shape_cast %66 : vector<64xf32> to vector<64x1xf32>
    %cst_29 = arith.constant 3.200000e+01 : f32
    %68 = vector.broadcast %cst_29 : f32 to vector<64x1xf32>
    %69 = arith.divf %67, %68 : vector<64x1xf32>
    %70 = vector.broadcast %69 : vector<64x1xf32> to vector<64x32xf32>
    %71 = arith.subf %63, %70 : vector<64x32xf32>
    %72 = arith.mulf %71, %71 : vector<64x32xf32>
    %cst_30 = arith.constant dense<0.000000e+00> : vector<64xf32>
    %73 = vector.multi_reduction <add>, %72, %cst_30 [1] : vector<64x32xf32> to vector<64xf32>
    %74 = vector.shape_cast %73 : vector<64xf32> to vector<64x1xf32>
    %cst_31 = arith.constant 3.200000e+01 : f32
    %75 = vector.broadcast %cst_31 : f32 to vector<64x1xf32>
    %76 = arith.divf %74, %75 : vector<64x1xf32>
    %cst_32 = arith.constant 9.99999974E-6 : f32
    %77 = vector.broadcast %cst_32 : f32 to vector<64x1xf32>
    %78 = arith.addf %76, %77 : vector<64x1xf32>
    %79 = math.rsqrt %78 : vector<64x1xf32>
    %80 = vector.broadcast %79 : vector<64x1xf32> to vector<64x32xf32>
    %81 = arith.mulf %71, %80 : vector<64x32xf32>
    %82 = vector.broadcast %64 : vector<1x32xf32> to vector<64x32xf32>
    %83 = arith.mulf %81, %82 : vector<64x32xf32>
    %84 = vector.broadcast %65 : vector<1x32xf32> to vector<64x32xf32>
    %85 = arith.addf %83, %84 : vector<64x32xf32>
    %86 = arith.truncf %85 : vector<64x32xf32> to vector<64x32xbf16>
    %cst_33 = arith.constant 0.000000e+00 : f32
    %87 = vector.broadcast %cst_33 : f32 to vector<64x32xf32>
    %c0_34 = arith.constant 0 : index
    %c0_35 = arith.constant 0 : index
    %88 = vector.load %arg10[%c0_34, %c0_35] : memref<32x64xbf16, #tpu.memory_space<vmem>>, vector<32x64xbf16>
    %cst_36 = arith.constant dense<0.000000e+00> : vector<64x64xf32>
    %89 = tpu.matmul %86, %88, %cst_36 {dimension_numbers = #tpu.dot_dimension_numbers<[1], [0], [0], [1], [0, 0, 1, 1], [], []>} : vector<64x32xbf16>, vector<32x64xbf16>, vector<64x64xf32> -> vector<64x64xf32>
    %c0_37 = arith.constant 0 : index
    %c0_38 = arith.constant 0 : index
    %90 = vector.load %arg11[%c0_37, %c0_38] : memref<1x64xf32, #tpu.memory_space<vmem>>, vector<1x64xf32>
    %91 = vector.broadcast %90 : vector<1x64xf32> to vector<64x64xf32>
    %92 = arith.addf %89, %91 : vector<64x64xf32>
    %cst_39 = arith.constant 0.000000e+00 : f32
    %93 = vector.broadcast %cst_39 : f32 to vector<64x64xf32>
    %94 = arith.maximumf %92, %93 : vector<64x64xf32>
    %95 = arith.truncf %94 : vector<64x64xf32> to vector<64x64xbf16>
    %c0_40 = arith.constant 0 : index
    %c0_41 = arith.constant 0 : index
    %96 = vector.load %arg12[%c0_40, %c0_41] : memref<64x32xbf16, #tpu.memory_space<vmem>>, vector<64x32xbf16>
    %cst_42 = arith.constant dense<0.000000e+00> : vector<64x32xf32>
    %97 = tpu.matmul %95, %96, %cst_42 {dimension_numbers = #tpu.dot_dimension_numbers<[1], [0], [0], [1], [0, 0, 1, 1], [], []>} : vector<64x64xbf16>, vector<64x32xbf16>, vector<64x32xf32> -> vector<64x32xf32>
    %98 = arith.addf %87, %97 : vector<64x32xf32>
    %c0_43 = arith.constant 0 : index
    %c0_44 = arith.constant 0 : index
    %99 = vector.load %arg13[%c0_43, %c0_44] : memref<1x32xf32, #tpu.memory_space<vmem>>, vector<1x32xf32>
    %100 = vector.broadcast %99 : vector<1x32xf32> to vector<64x32xf32>
    %101 = arith.addf %98, %100 : vector<64x32xf32>
    %102 = arith.addf %63, %85 : vector<64x32xf32>
    %103 = arith.addf %102, %101 : vector<64x32xf32>
    %104 = vector.shape_cast %103 : vector<64x32xf32> to vector<8x8x32xf32>
    %c0_45 = arith.constant 0 : index
    %c0_46 = arith.constant 0 : index
    %c0_47 = arith.constant 0 : index
    %105 = vector.load %arg14[%c0_45, %c0_46, %c0_47] : memref<8x8x32xf32, #tpu.memory_space<vmem>>, vector<8x8x32xf32>
    tpu.vector_store %arg14[%c0_45, %c0_46, %c0_47], %104 {strides = array<i32>} : memref<8x8x32xf32, #tpu.memory_space<vmem>>, vector<8x8x32xf32>,
    return
  }
  func.func @transform_0(%arg0: i32) -> (i32, i32, i32) {
    %c0_i32 = arith.constant 0 : i32
    %c0_i32_0 = arith.constant 0 : i32
    %c0_i32_1 = arith.constant 0 : i32
    return %c0_i32, %arg0, %c0_i32_0 : i32, i32, i32
  }
  func.func @transform_1(%arg0: i32) -> (i32, i32) {
    %c0_i32 = arith.constant 0 : i32
    %c0_i32_0 = arith.constant 0 : i32
    %c0_i32_1 = arith.constant 0 : i32
    return %c0_i32, %c0_i32_0 : i32, i32
  }
  func.func @transform_2(%arg0: i32) -> (i32, i32) {
    %c0_i32 = arith.constant 0 : i32
    %c0_i32_0 = arith.constant 0 : i32
    %c0_i32_1 = arith.constant 0 : i32
    return %c0_i32, %c0_i32_0 : i32, i32
  }
  func.func @transform_3(%arg0: i32) -> (i32, i32) {
    %c0_i32 = arith.constant 0 : i32
    %c0_i32_0 = arith.constant 0 : i32
    %c0_i32_1 = arith.constant 0 : i32
    return %c0_i32, %c0_i32_0 : i32, i32
  }
  func.func @transform_4(%arg0: i32) -> (i32, i32) {
    %c0_i32 = arith.constant 0 : i32
    %c0_i32_0 = arith.constant 0 : i32
    %c0_i32_1 = arith.constant 0 : i32
    return %c0_i32, %c0_i32_0 : i32, i32
  }
  func.func @transform_5(%arg0: i32) -> (i32, i32) {
    %c0_i32 = arith.constant 0 : i32
    %c0_i32_0 = arith.constant 0 : i32
    %c0_i32_1 = arith.constant 0 : i32
    return %c0_i32, %c0_i32_0 : i32, i32
  }
  func.func @transform_6(%arg0: i32) -> (i32, i32) {
    %c0_i32 = arith.constant 0 : i32
    %c0_i32_0 = arith.constant 0 : i32
    %c0_i32_1 = arith.constant 0 : i32
    return %c0_i32, %c0_i32_0 : i32, i32
  }
  func.func @transform_7(%arg0: i32) -> (i32, i32) {
    %c0_i32 = arith.constant 0 : i32
    %c0_i32_0 = arith.constant 0 : i32
    %c0_i32_1 = arith.constant 0 : i32
    return %c0_i32, %c0_i32_0 : i32, i32
  }
  func.func @transform_8(%arg0: i32) -> (i32, i32) {
    %c0_i32 = arith.constant 0 : i32
    %c0_i32_0 = arith.constant 0 : i32
    %c0_i32_1 = arith.constant 0 : i32
    return %c0_i32, %c0_i32_0 : i32, i32
  }
  func.func @transform_9(%arg0: i32) -> (i32, i32) {
    %c0_i32 = arith.constant 0 : i32
    %c0_i32_0 = arith.constant 0 : i32
    %c0_i32_1 = arith.constant 0 : i32
    return %c0_i32, %c0_i32_0 : i32, i32
  }
  func.func @transform_10(%arg0: i32) -> (i32, i32) {
    %c0_i32 = arith.constant 0 : i32
    %c0_i32_0 = arith.constant 0 : i32
    %c0_i32_1 = arith.constant 0 : i32
    return %c0_i32, %c0_i32_0 : i32, i32
  }
  func.func @transform_11(%arg0: i32) -> (i32, i32) {
    %c0_i32 = arith.constant 0 : i32
    %c0_i32_0 = arith.constant 0 : i32
    %c0_i32_1 = arith.constant 0 : i32
    return %c0_i32, %c0_i32_0 : i32, i32
  }
  func.func @transform_12(%arg0: i32) -> (i32, i32) {
    %c0_i32 = arith.constant 0 : i32
    %c0_i32_0 = arith.constant 0 : i32
    %c0_i32_1 = arith.constant 0 : i32
    return %c0_i32, %c0_i32_0 : i32, i32
  }
  func.func @transform_13(%arg0: i32) -> (i32, i32, i32) {
    %c0_i32 = arith.constant 0 : i32
    %c0_i32_0 = arith.constant 0 : i32
    %c0_i32_1 = arith.constant 0 : i32
    return %c0_i32, %arg0, %c0_i32_0 : i32, i32, i32
  }
}

module attributes {stable_mosaic.version = 11 : i64} {
  func.func @bertlayer_kernel(%arg0: i32, %arg1: memref<8x8x32xf32, #tpu.memory_space<vmem>>, %arg2: memref<1x32xf32, #tpu.memory_space<vmem>>, %arg3: memref<1x32xf32, #tpu.memory_space<vmem>>, %arg4: memref<32x96xbf16, #tpu.memory_space<vmem>>, %arg5: memref<1x96xf32, #tpu.memory_space<vmem>>, %arg6: memref<32x32xbf16, #tpu.memory_space<vmem>>, %arg7: memref<1x32xf32, #tpu.memory_space<vmem>>, %arg8: memref<1x32xf32, #tpu.memory_space<vmem>>, %arg9: memref<1x32xf32, #tpu.memory_space<vmem>>, %arg10: memref<32x64xbf16, #tpu.memory_space<vmem>>, %arg11: memref<1x64xf32, #tpu.memory_space<vmem>>, %arg12: memref<64x32xbf16, #tpu.memory_space<vmem>>, %arg13: memref<1x32xf32, #tpu.memory_space<vmem>>, %arg14: memref<8x8x32xf32, #tpu.memory_space<vmem>>) attributes {dimension_semantics = [#tpu.dimension_semantics<parallel>], iteration_bounds = array<i64: 2>, scalar_prefetch = 0 : i64, scratch_operands = 0 : i64, tpu.core_type = #tpu.core_type<tc>, window_params = [{transform_indices = @transform_0, window_bounds = array<i64: 8, 8, 32>}, {pipeline_mode = #tpu.pipeline_mode<synchronous>, transform_indices = @transform_1, window_bounds = array<i64: 1, 32>}, {pipeline_mode = #tpu.pipeline_mode<synchronous>, transform_indices = @transform_2, window_bounds = array<i64: 1, 32>}, {pipeline_mode = #tpu.pipeline_mode<synchronous>, transform_indices = @transform_3, window_bounds = array<i64: 32, 96>}, {pipeline_mode = #tpu.pipeline_mode<synchronous>, transform_indices = @transform_4, window_bounds = array<i64: 1, 96>}, {pipeline_mode = #tpu.pipeline_mode<synchronous>, transform_indices = @transform_5, window_bounds = array<i64: 32, 32>}, {pipeline_mode = #tpu.pipeline_mode<synchronous>, transform_indices = @transform_6, window_bounds = array<i64: 1, 32>}, {pipeline_mode = #tpu.pipeline_mode<synchronous>, transform_indices = @transform_7, window_bounds = array<i64: 1, 32>}, {pipeline_mode = #tpu.pipeline_mode<synchronous>, transform_indices = @transform_8, window_bounds = array<i64: 1, 32>}, {pipeline_mode = #tpu.pipeline_mode<synchronous>, transform_indices = @transform_9, window_bounds = array<i64: 32, 64>}, {pipeline_mode = #tpu.pipeline_mode<synchronous>, transform_indices = @transform_10, window_bounds = array<i64: 1, 64>}, {pipeline_mode = #tpu.pipeline_mode<synchronous>, transform_indices = @transform_11, window_bounds = array<i64: 64, 32>}, {pipeline_mode = #tpu.pipeline_mode<synchronous>, transform_indices = @transform_12, window_bounds = array<i64: 1, 32>}, {transform_indices = @transform_13, window_bounds = array<i64: 8, 8, 32>}]} {
    %c0 = arith.constant 0 : index
    %c0_0 = arith.constant 0 : index
    %c0_1 = arith.constant 0 : index
    %0 = vector.load %arg1[%c0, %c0_0, %c0_1] : memref<8x8x32xf32, #tpu.memory_space<vmem>>, vector<8x8x32xf32>
    %1 = vector.shape_cast %0 : vector<8x8x32xf32> to vector<64x32xf32>
    %c0_2 = arith.constant 0 : index
    %c0_3 = arith.constant 0 : index
    %2 = vector.load %arg2[%c0_2, %c0_3] : memref<1x32xf32, #tpu.memory_space<vmem>>, vector<1x32xf32>
    %c0_4 = arith.constant 0 : index
    %c0_5 = arith.constant 0 : index
    %3 = vector.load %arg3[%c0_4, %c0_5] : memref<1x32xf32, #tpu.memory_space<vmem>>, vector<1x32xf32>
    %cst = arith.constant dense<0.000000e+00> : vector<64xf32>
    %4 = vector.multi_reduction <add>, %1, %cst [1] : vector<64x32xf32> to vector<64xf32>
    %5 = vector.shape_cast %4 : vector<64xf32> to vector<64x1xf32>
    %cst_6 = arith.constant 3.200000e+01 : f32
    %6 = vector.broadcast %cst_6 : f32 to vector<64x1xf32>
    %7 = arith.divf %5, %6 : vector<64x1xf32>
    %8 = vector.broadcast %7 : vector<64x1xf32> to vector<64x32xf32>
    %9 = arith.subf %1, %8 : vector<64x32xf32>
    %10 = arith.mulf %9, %9 : vector<64x32xf32>
    %cst_7 = arith.constant dense<0.000000e+00> : vector<64xf32>
    %11 = vector.multi_reduction <add>, %10, %cst_7 [1] : vector<64x32xf32> to vector<64xf32>
    %12 = vector.shape_cast %11 : vector<64xf32> to vector<64x1xf32>
    %cst_8 = arith.constant 3.200000e+01 : f32
    %13 = vector.broadcast %cst_8 : f32 to vector<64x1xf32>
    %14 = arith.divf %12, %13 : vector<64x1xf32>
    %cst_9 = arith.constant 9.99999974E-6 : f32
    %15 = vector.broadcast %cst_9 : f32 to vector<64x1xf32>
    %16 = arith.addf %14, %15 : vector<64x1xf32>
    %17 = math.rsqrt %16 : vector<64x1xf32>
    %18 = vector.broadcast %17 : vector<64x1xf32> to vector<64x32xf32>
    %19 = arith.mulf %9, %18 : vector<64x32xf32>
    %20 = vector.broadcast %2 : vector<1x32xf32> to vector<64x32xf32>
    %21 = arith.mulf %19, %20 : vector<64x32xf32>
    %22 = vector.broadcast %3 : vector<1x32xf32> to vector<64x32xf32>
    %23 = arith.addf %21, %22 : vector<64x32xf32>
    %24 = arith.truncf %23 : vector<64x32xf32> to vector<64x32xbf16>
    %c0_10 = arith.constant 0 : index
    %c0_11 = arith.constant 0 : index
    %25 = vector.load %arg4[%c0_10, %c0_11] : memref<32x96xbf16, #tpu.memory_space<vmem>>, vector<32x96xbf16>
    %cst_12 = arith.constant dense<0.000000e+00> : vector<64x96xf32>
    %26 = tpu.matmul %24, %25, %cst_12 {dimension_numbers = #tpu.dot_dimension_numbers<[1], [0], [0], [1], [0, 0, 1, 1], [], []>} : vector<64x32xbf16>, vector<32x96xbf16>, vector<64x96xf32> -> vector<64x96xf32>
    %c0_13 = arith.constant 0 : index
    %c0_14 = arith.constant 0 : index
    %27 = vector.load %arg5[%c0_13, %c0_14] : memref<1x96xf32, #tpu.memory_space<vmem>>, vector<1x96xf32>
    %28 = vector.broadcast %27 : vector<1x96xf32> to vector<64x96xf32>
    %29 = arith.addf %26, %28 : vector<64x96xf32>
    %30 = vector.extract_strided_slice %29 {offsets = [0, 0], sizes = [64, 32], strides = [1, 1]} : vector<64x96xf32> to vector<64x32xf32>
    %31 = vector.shape_cast %30 : vector<64x32xf32> to vector<8x8x32xf32>
    %32 = vector.extract_strided_slice %29 {offsets = [0, 32], sizes = [64, 32], strides = [1, 1]} : vector<64x96xf32> to vector<64x32xf32>
    %33 = vector.shape_cast %32 : vector<64x32xf32> to vector<8x8x32xf32>
    %34 = vector.extract_strided_slice %29 {offsets = [0, 64], sizes = [64, 32], strides = [1, 1]} : vector<64x96xf32> to vector<64x32xf32>
    %35 = vector.shape_cast %34 : vector<64x32xf32> to vector<8x8x32xf32>
    %36 = tpu.transpose %31, [1, 0, 2] : vector<8x8x32xf32> -> vector<8x8x32xf32>
    %37 = arith.truncf %36 : vector<8x8x32xf32> to vector<8x8x32xbf16>
    %38 = tpu.transpose %33, [1, 0, 2] : vector<8x8x32xf32> -> vector<8x8x32xf32>
    %39 = arith.truncf %38 : vector<8x8x32xf32> to vector<8x8x32xbf16>
    %40 = tpu.transpose %35, [1, 0, 2] : vector<8x8x32xf32> -> vector<8x8x32xf32>
    %41 = arith.truncf %40 : vector<8x8x32xf32> to vector<8x8x32xbf16>
    "tpu.trace_start"() <{level = 10 : i32, message = "bqe,bke->bqk"}> : () -> ()
    %cst_15 = arith.constant dense<0.000000e+00> : vector<8x8x8xf32>
    %42 = tpu.matmul %37, %39, %cst_15 {dimension_numbers = #tpu.dot_dimension_numbers<[2], [2], [1], [1], [0, 0, 0, 1, 1, 1], [0], [0]>} : vector<8x8x32xbf16>, vector<8x8x32xbf16>, vector<8x8x8xf32> -> vector<8x8x8xf32>
    "tpu.trace_stop"() : () -> ()
    %cst_16 = arith.constant dense<0xFF800000> : vector<8x8xf32>
    %43 = vector.multi_reduction <maximumf>, %42, %cst_16 [2] : vector<8x8x8xf32> to vector<8x8xf32>
    %44 = vector.shape_cast %43 : vector<8x8xf32> to vector<8x8x1xf32>
    %45 = vector.broadcast %44 : vector<8x8x1xf32> to vector<8x8x8xf32>
    %46 = arith.subf %42, %45 : vector<8x8x8xf32>
    %47 = math.exp %46 : vector<8x8x8xf32>
    %cst_17 = arith.constant dense<0.000000e+00> : vector<8x8xf32>
    %48 = vector.multi_reduction <add>, %47, %cst_17 [2] : vector<8x8x8xf32> to vector<8x8xf32>
    %49 = vector.shape_cast %48 : vector<8x8xf32> to vector<8x8x1xf32>
    %50 = tpu.reciprocal %49 {approx = true} : vector<8x8x1xf32> -> vector<8x8x1xf32>
    %51 = vector.broadcast %50 : vector<8x8x1xf32> to vector<8x8x8xf32>
    %52 = arith.mulf %47, %51 : vector<8x8x8xf32>
    %53 = arith.truncf %52 : vector<8x8x8xf32> to vector<8x8x8xbf16>
    "tpu.trace_start"() <{level = 10 : i32, message = "bqk,bke->bqe"}> : () -> ()
    %cst_18 = arith.constant dense<0.000000e+00> : vector<8x8x32xf32>
    %54 = tpu.matmul %53, %41, %cst_18 {dimension_numbers = #tpu.dot_dimension_numbers<[2], [1], [1], [2], [0, 0, 0, 1, 1, 2], [0], [0]>} : vector<8x8x8xbf16>, vector<8x8x32xbf16>, vector<8x8x32xf32> -> vector<8x8x32xf32>
    "tpu.trace_stop"() : () -> ()
    %55 = tpu.transpose %54, [1, 0, 2] : vector<8x8x32xf32> -> vector<8x8x32xf32>
    %56 = vector.shape_cast %55 : vector<8x8x32xf32> to vector<64x32xf32>
    %57 = arith.truncf %56 : vector<64x32xf32> to vector<64x32xbf16>
    %c0_19 = arith.constant 0 : index
    %c0_20 = arith.constant 0 : index
    %58 = vector.load %arg6[%c0_19, %c0_20] : memref<32x32xbf16, #tpu.memory_space<vmem>>, vector<32x32xbf16>
    %cst_21 = arith.constant dense<0.000000e+00> : vector<64x32xf32>
    %59 = tpu.matmul %57, %58, %cst_21 {dimension_numbers = #tpu.dot_dimension_numbers<[1], [0], [0], [1], [0, 0, 1, 1], [], []>} : vector<64x32xbf16>, vector<32x32xbf16>, vector<64x32xf32> -> vector<64x32xf32>
    %c0_22 = arith.constant 0 : index
    %c0_23 = arith.constant 0 : index
    %60 = vector.load %arg7[%c0_22, %c0_23] : memref<1x32xf32, #tpu.memory_space<vmem>>, vector<1x32xf32>
    %61 = vector.broadcast %60 : vector<1x32xf32> to vector<64x32xf32>
    %62 = arith.addf %59, %61 : vector<64x32xf32>
    %63 = arith.addf %62, %1 : vector<64x32xf32>
    %c0_24 = arith.constant 0 : index
    %c0_25 = arith.constant 0 : index
    %64 = vector.load %arg8[%c0_24, %c0_25] : memref<1x32xf32, #tpu.memory_space<vmem>>, vector<1x32xf32>
    %c0_26 = arith.constant 0 : index
    %c0_27 = arith.constant 0 : index
    %65 = vector.load %arg9[%c0_26, %c0_27] : memref<1x32xf32, #tpu.memory_space<vmem>>, vector<1x32xf32>
    %cst_28 = arith.constant dense<0.000000e+00> : vector<64xf32>
    %66 = vector.multi_reduction <add>, %63, %cst_28 [1] : vector<64x32xf32> to vector<64xf32>
    %67 = vector.shape_cast %66 : vector<64xf32> to vector<64x1xf32>
    %cst_29 = arith.constant 3.200000e+01 : f32
    %68 = vector.broadcast %cst_29 : f32 to vector<64x1xf32>
    %69 = arith.divf %67, %68 : vector<64x1xf32>
    %70 = vector.broadcast %69 : vector<64x1xf32> to vector<64x32xf32>
    %71 = arith.subf %63, %70 : vector<64x32xf32>
    %72 = arith.mulf %71, %71 : vector<64x32xf32>
    %cst_30 = arith.constant dense<0.000000e+00> : vector<64xf32>
    %73 = vector.multi_reduction <add>, %72, %cst_30 [1] : vector<64x32xf32> to vector<64xf32>
    %74 = vector.shape_cast %73 : vector<64xf32> to vector<64x1xf32>
    %cst_31 = arith.constant 3.200000e+01 : f32
    %75 = vector.broadcast %cst_31 : f32 to vector<64x1xf32>
    %76 = arith.divf %74, %75 : vector<64x1xf32>
    %cst_32 = arith.constant 9.99999974E-6 : f32
    %77 = vector.broadcast %cst_32 : f32 to vector<64x1xf32>
    %78 = arith.addf %76, %77 : vector<64x1xf32>
    %79 = math.rsqrt %78 : vector<64x1xf32>
    %80 = vector.broadcast %79 : vector<64x1xf32> to vector<64x32xf32>
    %81 = arith.mulf %71, %80 : vector<64x32xf32>
    %82 = vector.broadcast %64 : vector<1x32xf32> to vector<64x32xf32>
    %83 = arith.mulf %81, %82 : vector<64x32xf32>
    %84 = vector.broadcast %65 : vector<1x32xf32> to vector<64x32xf32>
    %85 = arith.addf %83, %84 : vector<64x32xf32>
    %86 = arith.truncf %85 : vector<64x32xf32> to vector<64x32xbf16>
    %cst_33 = arith.constant 0.000000e+00 : f32
    %87 = vector.broadcast %cst_33 : f32 to vector<64x32xf32>
    %c0_34 = arith.constant 0 : index
    %c0_35 = arith.constant 0 : index
    %88 = vector.load %arg10[%c0_34, %c0_35] : memref<32x64xbf16, #tpu.memory_space<vmem>>, vector<32x64xbf16>
    %cst_36 = arith.constant dense<0.000000e+00> : vector<64x64xf32>
    %89 = tpu.matmul %86, %88, %cst_36 {dimension_numbers = #tpu.dot_dimension_numbers<[1], [0], [0], [1], [0, 0, 1, 1], [], []>} : vector<64x32xbf16>, vector<32x64xbf16>, vector<64x64xf32> -> vector<64x64xf32>
    %c0_37 = arith.constant 0 : index
    %c0_38 = arith.constant 0 : index
    %90 = vector.load %arg11[%c0_37, %c0_38] : memref<1x64xf32, #tpu.memory_space<vmem>>, vector<1x64xf32>
    %91 = vector.broadcast %90 : vector<1x64xf32> to vector<64x64xf32>
    %92 = arith.addf %89, %91 : vector<64x64xf32>
    %cst_39 = arith.constant 0.000000e+00 : f32
    %93 = vector.broadcast %cst_39 : f32 to vector<64x64xf32>
    %94 = arith.maximumf %92, %93 : vector<64x64xf32>
    %95 = arith.truncf %94 : vector<64x64xf32> to vector<64x64xbf16>
    %c0_40 = arith.constant 0 : index
    %c0_41 = arith.constant 0 : index
    %96 = vector.load %arg12[%c0_40, %c0_41] : memref<64x32xbf16, #tpu.memory_space<vmem>>, vector<64x32xbf16>
    %cst_42 = arith.constant dense<0.000000e+00> : vector<64x32xf32>
    %97 = tpu.matmul %95, %96, %cst_42 {dimension_numbers = #tpu.dot_dimension_numbers<[1], [0], [0], [1], [0, 0, 1, 1], [], []>} : vector<64x64xbf16>, vector<64x32xbf16>, vector<64x32xf32> -> vector<64x32xf32>
    %98 = arith.addf %87, %97 : vector<64x32xf32>
    %c0_43 = arith.constant 0 : index
    %c0_44 = arith.constant 0 : index
    %99 = vector.load %arg13[%c0_43, %c0_44] : memref<1x32xf32, #tpu.memory_space<vmem>>, vector<1x32xf32>
    %100 = vector.broadcast %99 : vector<1x32xf32> to vector<64x32xf32>
    %101 = arith.addf %98, %100 : vector<64x32xf32>
    %102 = arith.addf %63, %85 : vector<64x32xf32>
    %103 = arith.addf %102, %101 : vector<64x32xf32>
    %104 = vector.shape_cast %103 : vector<64x32xf32> to vector<8x8x32xf32>
    %c0_45 = arith.constant 0 : index
    %c0_46 = arith.constant 0 : index
    %c0_47 = arith.constant 0 : index
    %105 = vector.load %arg14[%c0_45, %c0_46, %c0_47] : memref<8x8x32xf32, #tpu.memory_space<vmem>>, vector<8x8x32xf32>
    tpu.vector_store %arg14[%c0_45, %c0_46, %c0_47], %104 {strides = array<i32>} : memref<8x8x32xf32, #tpu.memory_space<vmem>>, vector<8x8x32xf32>,
    return
  }
  func.func @transform_0(%arg0: i32) -> (i32, i32, i32) {
    %c0_i32 = arith.constant 0 : i32
    %c0_i32_0 = arith.constant 0 : i32
    %c0_i32_1 = arith.constant 0 : i32
    return %c0_i32, %arg0, %c0_i32_0 : i32, i32, i32
  }
  func.func @transform_1(%arg0: i32) -> (i32, i32) {
    %c0_i32 = arith.constant 0 : i32
    %c0_i32_0 = arith.constant 0 : i32
    %c0_i32_1 = arith.constant 0 : i32
    return %c0_i32, %c0_i32_0 : i32, i32
  }
  func.func @transform_2(%arg0: i32) -> (i32, i32) {
    %c0_i32 = arith.constant 0 : i32
    %c0_i32_0 = arith.constant 0 : i32
    %c0_i32_1 = arith.constant 0 : i32
    return %c0_i32, %c0_i32_0 : i32, i32
  }
  func.func @transform_3(%arg0: i32) -> (i32, i32) {
    %c0_i32 = arith.constant 0 : i32
    %c0_i32_0 = arith.constant 0 : i32
    %c0_i32_1 = arith.constant 0 : i32
    return %c0_i32, %c0_i32_0 : i32, i32
  }
  func.func @transform_4(%arg0: i32) -> (i32, i32) {
    %c0_i32 = arith.constant 0 : i32
    %c0_i32_0 = arith.constant 0 : i32
    %c0_i32_1 = arith.constant 0 : i32
    return %c0_i32, %c0_i32_0 : i32, i32
  }
  func.func @transform_5(%arg0: i32) -> (i32, i32) {
    %c0_i32 = arith.constant 0 : i32
    %c0_i32_0 = arith.constant 0 : i32
    %c0_i32_1 = arith.constant 0 : i32
    return %c0_i32, %c0_i32_0 : i32, i32
  }
  func.func @transform_6(%arg0: i32) -> (i32, i32) {
    %c0_i32 = arith.constant 0 : i32
    %c0_i32_0 = arith.constant 0 : i32
    %c0_i32_1 = arith.constant 0 : i32
    return %c0_i32, %c0_i32_0 : i32, i32
  }
  func.func @transform_7(%arg0: i32) -> (i32, i32) {
    %c0_i32 = arith.constant 0 : i32
    %c0_i32_0 = arith.constant 0 : i32
    %c0_i32_1 = arith.constant 0 : i32
    return %c0_i32, %c0_i32_0 : i32, i32
  }
  func.func @transform_8(%arg0: i32) -> (i32, i32) {
    %c0_i32 = arith.constant 0 : i32
    %c0_i32_0 = arith.constant 0 : i32
    %c0_i32_1 = arith.constant 0 : i32
    return %c0_i32, %c0_i32_0 : i32, i32
  }
  func.func @transform_9(%arg0: i32) -> (i32, i32) {
    %c0_i32 = arith.constant 0 : i32
    %c0_i32_0 = arith.constant 0 : i32
    %c0_i32_1 = arith.constant 0 : i32
    return %c0_i32, %c0_i32_0 : i32, i32
  }
  func.func @transform_10(%arg0: i32) -> (i32, i32) {
    %c0_i32 = arith.constant 0 : i32
    %c0_i32_0 = arith.constant 0 : i32
    %c0_i32_1 = arith.constant 0 : i32
    return %c0_i32, %c0_i32_0 : i32, i32
  }
  func.func @transform_11(%arg0: i32) -> (i32, i32) {
    %c0_i32 = arith.constant 0 : i32
    %c0_i32_0 = arith.constant 0 : i32
    %c0_i32_1 = arith.constant 0 : i32
    return %c0_i32, %c0_i32_0 : i32, i32
  }
  func.func @transform_12(%arg0: i32) -> (i32, i32) {
    %c0_i32 = arith.constant 0 : i32
    %c0_i32_0 = arith.constant 0 : i32
    %c0_i32_1 = arith.constant 0 : i32
    return %c0_i32, %c0_i32_0 : i32, i32
  }
  func.func @transform_13(%arg0: i32) -> (i32, i32, i32) {
    %c0_i32 = arith.constant 0 : i32
    %c0_i32_0 = arith.constant 0 : i32
    %c0_i32_1 = arith.constant 0 : i32
    return %c0_i32, %arg0, %c0_i32_0 : i32, i32, i32
  }
}

</mosaic_0001>

<bundles_post_ra>
// kernel: tpu_custom_call.1
= control target key start
LH: loop header
LB: loop body
LE: loop exit
PB: predicated region body
PF: predicated region fallthrough
CT: control target
= control target key end

     0   :  { %18 = vsyncpa [#allocation3], 0  ;;  %s4136_s0 = inlined_call_operand.hbm [shape: f32[8,16,32], index: 0, kind: input, shape index: {}]   ;;  %s4137_s1 = inlined_call_operand.vmem [shape: f32[1,32], index: 1, kind: input, shape index: {}]   ;;  %s4138_s2 = inlined_call_operand.vmem [shape: f32[1,32], index: 2, kind: input, shape index: {}]   ;;  %s4139_s3 = inlined_call_operand.vmem [shape: bf16[32,96], index: 3, kind: input, shape index: {}]   ;;  %s4140_s4 = inlined_call_operand.vmem [shape: f32[1,96], index: 4, kind: input, shape index: {}]   ;;  %s4141_s5 = inlined_call_operand.vmem [shape: bf16[32,32], index: 5, kind: input, shape index: {}]   ;;  %s4142_s6 = inlined_call_operand.vmem [shape: f32[1,32], index: 6, kind: input, shape index: {}]   ;;  %s4143_s7 = inlined_call_operand.vmem [shape: f32[1,32], index: 7, kind: input, shape index: {}]   ;;  %s4144_s8 = inlined_call_operand.vmem [shape: f32[1,32], index: 8, kind: input, shape index: {}]   ;;  %s4145_s9 = inlined_call_operand.vmem [shape: bf16[32,64], index: 9, kind: input, shape index: {}]   ;;  %s4146_s10 = inlined_call_operand.vmem [shape: f32[1,64], index: 10, kind: input, shape index: {}]   ;;  %s4147_s11 = inlined_call_operand.vmem [shape: bf16[64,32], index: 11, kind: input, shape index: {}]   ;;  %s4148_s12 = inlined_call_operand.vmem [shape: f32[1,32], index: 12, kind: input, shape index: {}]   ;;  %s4149_s13 = inlined_call_operand.hbm [shape: f32[8,16,32], index: 13, kind: output, shape index: {}]  }
   0x1   :  { %20 = vsyncpa [#allocation3 + $0x1], 0 }
   0x2   :  { %21 = vsyncpa [#allocation4], 0 }
   0x3   :  { %23 = vsyncpa [#allocation4 + $0x1], 0  ;;  %s3348_s25 = smov 0   ;;  %s3350_s26 = smov 0  }
   0x4   :  { %s3352_s27 = smov 0   ;;  %s3354_s28 = smov 0  }
   0x5 LB: > { %4155 = sst [smem:[#allocation8_spill]] %s3250_s25  ;;  %s3369_s29 = sadd.s32 4294967295, %s3262_s28   ;;  %s3262_s28 = sphi %s3354_s28, %s4169_s28   ;;  %s3258_s27 = sphi %s3352_s27, %s4171_s27   ;;  %s3254_s26 = sphi %s3350_s26, %s4173_s26   ;;  %s3250_s25 = sphi %s3348_s25, %s4172_s25  }
   0x6   : > { %4156 = sst [smem:[#allocation9_spill]] %s3258_s27  ;;  %s2754_s30 = sadd.s32 4294967294, %s3262_s28  }
   0x7   : > { %s3373_s14 = sadd.s32 1, %s3262_s28   ;;  %s36_s15 = sadd.s32 1, %s3258_s27 }
   0x8   : > { %4157 = sst [smem:[#allocation10_spill]] %s3373_s14  ;;  %s33_s16 = ssub.s32 %s3262_s28, %s3373_s14 }
   0x9   : > { %p43_p0 = scmp.ne.s32.totalorder %s3258_s27, %s3254_s26  ;;  %p34_p1 = scmp.eq.s32.totalorder %s33_s16, 0 }
   0xa   : > { %p44_p2 = scmp.eq.s32.totalorder %s3262_s28, 0  ;;  %p49_p3 = scmp.ne.s32.totalorder %s3254_s26, %s3250_s25 }
   0xb   : > { %p50_p4 = scmp.eq.s32.totalorder %s3369_s29, 0  ;;  %p325_p7 = scmp.eq.s32.totalorder %s3369_s29, 1 }
   0xc   : > { %s3385_s17 = scalar_select %p34_p1, %s3258_s27, %s36_s15  }
   0xd   : > { %p3387_p5 = por %p44_p2, %p43_p0  ;;  %p3391_p6 = por %p50_p4, %p49_p3 }
   0xe   : > { %4158 = sst [smem:[#allocation11_spill]] %s3385_s17  ;;  %p331_p8 = scmp.eq.s32.totalorder %s2754_s30, 1 }
   0xf   : > { %p3038_p10 = scmp.lt.s32.totalorder %s3262_s28, 2  ;;  %p3398_p11 = por %p325_p7, %p43_p0 }
  0x10   : > { %p3402_p12 = por %p331_p8, %p49_p3  ;;  %s387_s22 = sand.u32 1, %s3258_s27  }
  0x11   : > { %s4161_s20 = scalar_select %p3398_p11, 1, 0 }
  0x12   : > { %s4162_s21 = scalar_select %p3402_p12, 1, 0 }
  0x13   : > { %s2758_s23 = sshll.u32 %s3262_s28, 7  ;;  %s2757_s24 = sshll.u32 %s387_s22, 6 }
  0x14   : > { %s3411_s17 = scalar_lea.hbm %s4136_s0, %s2758_s23  ;;  %s391_s30 = scalar_lea.vmem [#allocation2], %s2757_s24 }
  0x15   : > { %s397_s14 = sshll.u32 %s391_s30, 4  ;;  %p3415_p13 = pnand %p3038_p10, %p3387_p5  ;;  %s3419_s14 = int_to_ptr.vmem [resolvable:$true] %s397_s14 }
  0x16   : > { %s3422_s27 = scalar_lea.sflag [#allocation3], %s387_s22  ;;  %s3166_s23 = scalar_lea.hbm %s3411_s17, 1024 }
  0x17   : > { %p3167_p1 = scmp.ne.s32.totalorder %s3411_s17, %s3166_s23  ;;  %p3168_p2 = pneg %p3415_p13 }
  0x18   : > { %s3171_s15 = scalar_lea.hbm %s4136_s0, 2048  ;;  %p3172_p5 = scmp.lt.u32.totalorder %s3411_s17, %s4136_s0 }
  0x19   : > { %p3169_p3 = pnand %p3168_p2, %p3167_p1  ;;  %p3173_p7 = scmp.lt.u32.totalorder %s3171_s15, %s3166_s23 }
  0x1a   : > { %p3175_p10 = scmp.lt.u32.totalorder %s3166_s23, %s3411_s17 }
  0x1b   : > { %p3170_p4 = pneg %p3169_p3  ;;  %p3174_p8 = por %p3173_p7, %p3172_p5 }
  0x1d   : > { %p3176_p9 = por %p3175_p10, %p3174_p8 }
  0x1f   : > { %p3177_p0 = pnand %p3176_p9, %p3170_p4 }
  0x21   : > { %3180 = shalt.err (!%p3177_p0)
}
  0x22   : > { %s3181_s22 = scalar_lea.vmem %s3419_s14, 1024  ;;  %s3264_s18 = smov [#allocation2]  }
  0x23   : > { %p3182_p1 = scmp.ne.s32.totalorder %s3419_s14, %s3181_s22  ;;  %s3186_s24 = sshll.u32 %s3264_s18, 4  ;;  %s3187_s24 = int_to_ptr.vmem [resolvable:$false] %s3186_s24 }
  0x24   : > { %s3188_s16 = scalar_lea.vmem %s3187_s24, 2048  ;;  %p3189_p11 = scmp.lt.s32.totalorder %s3419_s14, %s3187_s24 }
  0x25   : > { %p3184_p3 = pnand %p3182_p1, %p3168_p2  ;;  %p3190_p5 = scmp.lt.s32.totalorder %s3188_s16, %s3181_s22 }
  0x27   : > { %p3185_p12 = pneg %p3184_p3  ;;  %p3191_p7 = por %p3190_p5, %p3189_p11 }
  0x29   : > { %p3192_p8 = pnand %p3191_p7, %p3185_p12 }
  0x2b   : > { %3195 = shalt.err (!%p3192_p8)
}
  0x2c   : > { %s3265_s23 = smov 256   ;;  %s3266_s15 = smov 128  }
  0x2d   : > { %s3267_s30 = smov 8   ;;  %p405_p9 = scmp.lt.s32.totalorder %s3262_s28, 3 }
  0x2e   : > { %3033 = dma.hbm_to_vmem [thread:$0]  (!%p3415_p13), %s3411_s17, 1024, %s3419_s14, %s3422_s27, %s3265_s23, %s3266_s15, %s3267_s30  }
  0x2f   : > { %p4164_p0 = scmp.ge.s32.totalorder %s3262_s28, 1 }
  0x31   : > { %p406_p2 = pnand %p4164_p0, %p405_p9 }
  0x32   : > { %s3454_s22 = sand.u32 (!%p406_p2), 1, %s3254_s26  }
  0x33   : > { %409 = sbr.rel (%p406_p2) target bundleno = 2585 (0xa19), region = 72  ;;  %s2760_s18 = sshll.u32 (!%p406_p2), %s3454_s22, 6 }
  0x34   : > { %s412_s24 = scalar_lea.sflag (!%p406_p2), [#allocation3], %s3454_s22  ;;  %s3460_s16 = scalar_lea.vmem (!%p406_p2), [#allocation2], %s2760_s18 }
  0x3a   : > { %3241 = dma.done.wait (%p3391_p6), %s412_s24, 1024  }
  0x3b   : > { %3243 = vsyncadd (%p3391_p6), %s412_s24, 4294966272  ;;  %vm469_vm0 = vcmask 261120   ;;  %v459_v0 = vld [vmem:[%s3460_s16] sm:$0xff]  ;;  %v460_v2 = vld [vmem:[%s3460_s16 + $0x8] sm:$0xff]  ;;  %s3269_s27 = smov 96   ;;  %s3270_s14 = smov 64  }
  0x3c   : > { %v463_v1 = vld [vmem:[%s3460_s16 + $0x20] sm:$0xff]  ;;  %v470_v3 = vsel %vm469_vm0, %v459_v0, 0.0  ;;  %v464_v5 = vld [vmem:[%s3460_s16 + $0x28] sm:$0xff]  ;;  %v461_v6 = vld [vmem:[%s3460_s16 + $0x10] sm:$0xff]  ;;  %v473_v8 = vsel %vm469_vm0, %v460_v2, 0.0  ;;  %vm3272_vm1 = vmmov 0  }
  0x3d   : > { %v482_v4 = vsel %vm469_vm0, %v463_v1, 0.0  ;;  %v462_v7 = vld [vmem:[%s3460_s16 + $0x18] sm:$0xff]  ;;  %471 = vadd.xlane.f32.xlu0 %v470_v3  ;;  %v485_v9 = vsel %vm469_vm0, %v464_v5, 0.0  ;;  %v476_v10 = vsel %vm469_vm0, %v461_v6, 0.0  ;;  %v465_v12 = vld [vmem:[%s3460_s16 + $0x30] sm:$0xff]  ;;  %v3084_v56 = vld [vmem:[%s4139_s3] sm:$0xff]  }
  0x3e   : > { %483 = vadd.xlane.f32.xlu1 %v482_v4  ;;  %v479_v11 = vsel %vm469_vm0, %v462_v7, 0.0  ;;  %v466_v13 = vld [vmem:[%s3460_s16 + $0x38] sm:$0xff]  ;;  %v488_v14 = vsel %vm469_vm0, %v465_v12, 0.0  ;;  %2874 = vmatprep.subr.bf16.mxu0 %v3084_v56  ;;  %v3085_v57 = vld [vmem:[%s4139_s3 + $0x8] sm:$0xff]   ;;  %vm1563_vm2 = vcmask 64512   ;;  %vm1663_vm3 = vcmask 1043456  }
  0x3f   : > { %v491_v15 = vsel %vm469_vm0, %v466_v13, 0.0  ;;  %3022 = vmatprep.subr.bf16.mxu1 %v3084_v56  ;;  %2875 = vmatpush3.bf16.msra.mxu0 %v3084_v56  ;;  %vm2566_vm4 = vcmask 523264   ;;  %s2669_s17 = scalar_lea.sflag [#allocation4], %s3454_s22  ;;  %p4165_p11 = scmp.ne.s32.totalorder %s4161_s20, 0 }
  0x40   : > { %3024 = vmatpush3.bf16.msra.mxu1 %v3084_v56  ;;  %2876 = vmatprep.subr.bf16.mxu0 %v3085_v57  ;;  %s3274_s23 = smov [#allocation5]  }
  0x41   : > { %474 = vadd.xlane.f32.xlu0 %v473_v8  ;;  %3023 = vmatprep.subr.bf16.mxu1 %v3085_v57  ;;  %s3200_s15 = sshll.u32 %s3274_s23, 4  ;;  %s3201_s15 = int_to_ptr.vmem [resolvable:$false] %s3200_s15 }
  0x42   : > { %486 = vadd.xlane.f32.xlu1 %v485_v9  ;;  %s3202_s30 = scalar_lea.vmem %s3201_s15, 2048 }
  0x43   : > { %2877 = vmatpush3.bf16.msra.mxu0 %v3085_v57 }
  0x44   : > { %3025 = vmatpush3.bf16.msra.mxu1 %v3085_v57 }
  0x45   : > { %477 = vadd.xlane.f32.xlu0 %v476_v10 }
  0x46   : > { %480 = vadd.xlane.f32.xlu1 %v479_v11 }
  0x49   : > { %489 = vadd.xlane.f32.xlu0 %v488_v14 }
  0x4a   : > { %492 = vadd.xlane.f32.xlu1 %v491_v15 }
  0xca   : > { %v472_v16 = vpop.xlane.xlu0 %471 }
  0xcb   : > { %v484_v17 = vpop.xlane.xlu1 %483  ;;  %v495_v18 = vmul.f32 0.03125, %v472_v16 }
  0xcc   : > { %v499_v19 = vmul.f32 0.03125, %v484_v17 }
  0xcd   : > { %v3482_v20 = vsub.f32 %v459_v0, %v495_v18 }
  0xce   : > { %v3484_v21 = vsub.f32 %v463_v1, %v499_v19  ;;  %v475_v22 = vpop.xlane.xlu0 %474  ;;  %v2762_v19 = vld [vmem:[%s4137_s1] ss:$0 sm:$0xff] }
  0xcf   : > { %v487_v23 = vpop.xlane.xlu1 %486  ;;  %v496_v24 = vmul.f32 0.03125, %v475_v22  ;;  %v511_v26 = vmul.f32 %v3482_v20, %v3482_v20 }
  0xd0   : > { %v500_v25 = vmul.f32 0.03125, %v487_v23  ;;  %v515_v27 = vmul.f32 %v3484_v21, %v3484_v21 }
  0xd1   : > { %v3490_v28 = vsub.f32 %v460_v2, %v496_v24  ;;  %v519_v30 = vsel %vm469_vm0, %v511_v26, 0.0 }
  0xd2   : > { %v3492_v29 = vsub.f32 %v464_v5, %v500_v25  ;;  %520 = vadd.xlane.f32.xlu0 %v519_v30  ;;  %v478_v31 = vpop.xlane.xlu0 %477  ;;  %v531_v33 = vsel %vm469_vm0, %v515_v27, 0.0  ;;  %v2763_v27 = vld [vmem:[%s4138_s2] ss:$0 sm:$0xff] }
  0xd3   : > { %v481_v32 = vpop.xlane.xlu1 %480  ;;  %v497_v34 = vmul.f32 0.03125, %v478_v31  ;;  %v512_v36 = vmul.f32 %v3490_v28, %v3490_v28 }
  0xd4   : > { %v498_v35 = vmul.f32 0.03125, %v481_v32  ;;  %v516_v37 = vmul.f32 %v3492_v29, %v3492_v29 }
  0xd5   : > { %v3500_v38 = vsub.f32 %v461_v6, %v497_v34  ;;  %v522_v40 = vsel %vm469_vm0, %v512_v36, 0.0 }
  0xd6   : > { %v3502_v39 = vsub.f32 %v462_v7, %v498_v35  ;;  %532 = vadd.xlane.f32.xlu0 %v531_v33  ;;  %523 = vadd.xlane.f32.xlu1 %v522_v40  ;;  %v490_v41 = vpop.xlane.xlu0 %489  ;;  %v534_v43 = vsel %vm469_vm0, %v516_v37, 0.0 }
  0xd7   : > { %v493_v42 = vpop.xlane.xlu1 %492  ;;  %v501_v44 = vmul.f32 0.03125, %v490_v41  ;;  %v513_v46 = vmul.f32 %v3500_v38, %v3500_v38 }
  0xd8   : > { %v502_v45 = vmul.f32 0.03125, %v493_v42  ;;  %v514_v47 = vmul.f32 %v3502_v39, %v3502_v39 }
  0xd9   : > { %v3510_v48 = vsub.f32 %v465_v12, %v501_v44  ;;  %v525_v50 = vsel %vm469_vm0, %v513_v46, 0.0 }
  0xda   : > { %v3512_v49 = vsub.f32 %v466_v13, %v502_v45  ;;  %535 = vadd.xlane.f32.xlu1 %v534_v43  ;;  %526 = vadd.xlane.f32.xlu0 %v525_v50  ;;  %v528_v51 = vsel %vm469_vm0, %v514_v47, 0.0 }
  0xdb   : > { %v517_v52 = vmul.f32 %v3510_v48, %v3510_v48 }
  0xdc   : > { %v518_v53 = vmul.f32 %v3512_v49, %v3512_v49 }
  0xdd   : > { %v537_v54 = vsel %vm469_vm0, %v517_v52, 0.0 }
  0xde   : > { %529 = vadd.xlane.f32.xlu1 %v528_v51  ;;  %538 = vadd.xlane.f32.xlu0 %v537_v54  ;;  %v540_v55 = vsel %vm469_vm0, %v518_v53, 0.0 }
  0xe2   : > { %541 = vadd.xlane.f32.xlu1 %v540_v55 }
 0x15f   : > { %v521_v58 = vpop.xlane.xlu0 %520 }
 0x160   : > { %v543_v59 = vmul.f32 0.03125, %v521_v58 }
 0x162   : > { %v551_v60 = vadd.f32 1e-05, %v543_v59  ;;  %v712_v59 = vlaneseq }
 0x163   : > { %v524_v61 = vpop.xlane.xlu1 %523  ;;  %v533_v62 = vpop.xlane.xlu0 %532 }
 0x164   : > { %3094 = vrsqrt.f32 %v551_v60  ;;  %v544_v63 = vmul.f32 0.03125, %v524_v61  ;;  %v547_v0 = vmul.f32 0.03125, %v533_v62  ;;  %v3549_v62 = vshrl.u32 %v712_v59, 7 }
 0x166   : > { %v552_v1 = vadd.f32 1e-05, %v544_v63  ;;  %v555_v2 = vadd.f32 1e-05, %v547_v0 }
 0x167   : > { %v536_v3 = vpop.xlane.xlu1 %535  ;;  %v527_v4 = vpop.xlane.xlu0 %526 }
 0x168   : > { %3096 = vrsqrt.f32 %v552_v1  ;;  %v548_v5 = vmul.f32 0.03125, %v536_v3  ;;  %v545_v6 = vmul.f32 0.03125, %v527_v4 }
 0x169   : > { %3098 = vrsqrt.f32 %v555_v2 }
 0x16a   : > { %v556_v7 = vadd.f32 1e-05, %v548_v5  ;;  %v553_v8 = vadd.f32 1e-05, %v545_v6 }
 0x16b   : > { %v530_v9 = vpop.xlane.xlu1 %529  ;;  %v539_v10 = vpop.xlane.xlu0 %538 }
 0x16c   : > { %3100 = vrsqrt.f32 %v556_v7  ;;  %v546_v11 = vmul.f32 0.03125, %v530_v9  ;;  %v549_v12 = vmul.f32 0.03125, %v539_v10 }
 0x16d   : > { %3102 = vrsqrt.f32 %v553_v8 }
 0x16e   : > { %v3095_v13 = vpop.eup %3094  ;;  %v554_v14 = vadd.f32 1e-05, %v546_v11  ;;  %v557_v15 = vadd.f32 1e-05, %v549_v12 }
 0x16f   : > { %v542_v16 = vpop.xlane.xlu1 %541  ;;  %v567_v17 = vmul.f32 %v3095_v13, %v3482_v20 }
 0x170   : > { %3104 = vrsqrt.f32 %v554_v14  ;;  %v550_v18 = vmul.f32 0.03125, %v542_v16 }
 0x171   : > { %3106 = vrsqrt.f32 %v557_v15  ;;  %v581_v26 = vmul.f32 %v2762_v19, %v567_v17 }
 0x172   : > { %v3097_v22 = vpop.eup %3096  ;;  %v558_v23 = vadd.f32 1e-05, %v550_v18 }
 0x173   : > { %v3099_v24 = vpop.eup %3098  ;;  %v568_v25 = vmul.f32 %v3097_v22, %v3490_v28  ;;  %v595_v33 = vadd.f32 %v2763_v27, %v581_v26 }
 0x174   : > { %3108 = vrsqrt.f32 %v558_v23  ;;  %v571_v20 = vmul.f32 %v3099_v24, %v3484_v21 }
 0x175   : > { %v582_v30 = vmul.f32 %v2762_v19, %v568_v25 }
 0x176   : > { %v3101_v31 = vpop.eup %3100  ;;  %v585_v36 = vmul.f32 %v2762_v19, %v571_v20 }
 0x177   : > { %v3103_v32 = vpop.eup %3102  ;;  %v596_v34 = vadd.f32 %v2763_v27, %v582_v30  ;;  %v572_v35 = vmul.f32 %v3101_v31, %v3492_v29  ;;  %v3271_v30 = vmov 0.0  }
 0x178   : > { %v569_v37 = vmul.f32 %v3103_v32, %v3500_v38  ;;  %v599_v44 = vadd.f32 %v2763_v27, %v585_v36  ;;  %2886 = vmatprep.subr.bf16.mxu1 %v3271_v30  ;;  %2898 = vmatprep.subr.bf16.mxu0 %v3271_v30 }
 0x179   : > { %v603_v40 = vpack.c.bf16 %v596_v34, %v595_v33  ;;  %v586_v28 = vmul.f32 %v2762_v19, %v572_v35 }
 0x17a   : > { %v3105_v41 = vpop.eup %3104  ;;  %v583_v45 = vmul.f32 %v2762_v19, %v569_v37 }
 0x17b   : > { %v3107_v42 = vpop.eup %3106  ;;  %v570_v43 = vmul.f32 %v3105_v41, %v3502_v39  ;;  %2878 = vmatprep.mubr.msk.bf16.mxu0 %vm469_vm0, %v603_v40  ;;  %v600_v21 = vadd.f32 %v2763_v27, %v586_v28  ;;  %v3273_v28 = vmov 1934713408  }
 0x17c   : > { %v573_v46 = vmul.f32 %v3107_v42, %v3510_v48  ;;  %v597_v38 = vadd.f32 %v2763_v27, %v583_v45  ;;  %v3268_v48 = vmov 1983009808   ;;  %v774_v41 = vunpack.c.l.s4 %v3273_v28 }
 0x17d   : > { %v605_v47 = vpack.c.bf16 %v600_v21, %v599_v44  ;;  %v584_v50 = vmul.f32 %v2762_v19, %v570_v43  ;;  %v710_v58 = vunpack.c.l.s4 %v3268_v48 }
 0x17e   : > { %v3109_v51 = vpop.eup %3108  ;;  %v587_v53 = vmul.f32 %v2762_v19, %v573_v46 }
 0x17f   : > { %v574_v29 = vmul.f32 %v3109_v51, %v3512_v49  ;;  %2882 = vmatprep.mubr.msk.bf16.mxu1 %vm469_vm0, %v605_v47  ;;  %v598_v52 = vadd.f32 %v2763_v27, %v584_v50  ;;  %v2764_v49 = vld [vmem:[%s4140_s4] ss:$0 sm:$0xff]  ;;  %v711_v61 = vunpack.c.0.s8 %v710_v58 }
 0x180   : > { %v601_v39 = vadd.f32 %v2763_v27, %v587_v53 }
 0x181   : > { %v604_v54 = vpack.c.bf16 %v598_v52, %v597_v38  ;;  %v588_v55 = vmul.f32 %v2762_v19, %v574_v29  ;;  %v3553_v7 = vsub.s32 %v711_v61, %v3549_v62  ;;  %v775_v38 = vunpack.c.0.s8 %v774_v41 }
 0x183   : > { %2879 = vmatmul.mubr.msk.bf16.vlgmr.msra.gmra.mrb[0].mxu0 %vm469_vm0, %v604_v54  ;;  %v602_v56 = vadd.f32 %v2763_v27, %v588_v55 }
 0x184   : > { %2900 = vmatprep.mubr.msk.bf16.mxu0 %vm3272_vm1, %v3271_v30 }
 0x185   : > { %v606_v57 = vpack.c.bf16 %v602_v56, %v601_v39 }
 0x187   : > { %2883 = vmatmul.mubr.msk.bf16.vlgmr.msra.gmra.mrb[0].mxu1 %vm469_vm0, %v606_v57 }
 0x188   : > { %2888 = vmatprep.mubr.msk.bf16.mxu1 %vm3272_vm1, %v3271_v30 }
 0x256   : > { %v2880_v60 = vpop.f32.mrb[0].mxu0 }
 0x257   : > { %v685_v63 = vadd.f32 %v2880_v60, %v2764_v49  ;;  %v676_v0 = vpop.f32.mrb[1].mxu0 }
 0x258   : > { %v677_v1 = vadd.f32 %v2764_v49, %v676_v0  ;;  %v2881_v2 = vpop.f32.mrb[2].mxu0  ;;  %v3623_v0 = vsub.s32 %v775_v38, %v3549_v62 }
 0x259   : > { %v688_v3 = vadd.f32 %v2881_v2, %v2764_v49  ;;  %863 = vrot.lane.b32.xlu1 %v685_v63, %s3269_s27  ;;  %v679_v4 = vpop.f32.mrb[3].mxu0 }
 0x25a   : > { %v707_v5 = vcombine.low %v677_v1, %v685_v63  ;;  %v708_v6 = vcombine.high %v677_v1, %v685_v63  ;;  %v680_v8 = vadd.f32 %v2764_v49, %v679_v4  ;;  %859 = vrot.lane.b32.xlu0 %v677_v1, %s3269_s27  ;;  %v2884_v9 = vpop.f32.mrb[0].mxu1 }
 0x25b   : > { %v692_v10 = vpop.f32.mrb[1].mxu1  ;;  %v3581_v26 = vadd.f32 %v2884_v9, %v2764_v49 }
 0x25c   : > { %v723_v11 = vcombine.low %v680_v8, %v688_v3  ;;  %v724_v12 = vcombine.high %v680_v8, %v688_v3  ;;  %v2885_v13 = vpop.f32.mrb[2].mxu1  ;;  %v3556_v14 = vadd.f32 %v2764_v49, %v692_v10  ;;  %v3560_v16 = vrot.slane %v707_v5, %v3553_v7 }
 0x25d   : > { %865 = vrot.lane.b32.xlu1 %v688_v3, %s3269_s27  ;;  %v695_v15 = vpop.f32.mrb[3].mxu1  ;;  %v3563_v17 = vrot.slane %v708_v6, %v3553_v7  ;;  %v3590_v20 = vadd.f32 %v2885_v13, %v2764_v49 }
 0x25e   : > { %v3566_v18 = vrot.slane %v723_v11, %v3553_v7  ;;  %v3569_v19 = vrot.slane %v724_v12, %v3553_v7  ;;  %867 = vrot.lane.b32.xlu0 %v3556_v14, %s3269_s27  ;;  %v3584_v27 = vadd.f32 %v2764_v49, %v695_v15  ;;  %v739_v44 = vcombine.low %v3556_v14, %v3581_v26 }
 0x25f   : > { %v740_v2 = vcombine.high %v3556_v14, %v3581_v26 }
 0x260   : > { %v771_v22 = vcombine.low %v3560_v16, %v3566_v18  ;;  %v772_v23 = vcombine.high %v3560_v16, %v3566_v18  ;;  %v787_v24 = vcombine.low %v3563_v17, %v3569_v19  ;;  %v788_v25 = vcombine.high %v3563_v17, %v3569_v19 }
 0x261   : > { %861 = vrot.lane.b32.xlu1 %v680_v8, %s3269_s27  ;;  %v755_v37 = vcombine.low %v3584_v27, %v3590_v20  ;;  %v747_v53 = vrot.slane %v739_v44, %v3553_v7  ;;  %v756_v39 = vcombine.high %v3584_v27, %v3590_v20 }
 0x262   : > { %871 = vrot.lane.b32.xlu0 %v3581_v26, %s3269_s27  ;;  %v3653_v28 = vrot.slane %v772_v23, %v3623_v0 }
 0x263   : > { %v763_v50 = vrot.slane %v755_v37, %v3553_v7  ;;  %v3628_v6 = vrot.slane %v756_v39, %v3553_v7 }
 0x265   : > { %869 = vrot.lane.b32.xlu1 %v3584_v27, %s3269_s27  ;;  %v803_v61 = vcombine.low %v747_v53, %v763_v50 }
 0x266   : > { %1027 = vrot.lane.b32.xlu0 %v677_v1, %s3270_s14 }
 0x269   : > { %873 = vrot.lane.b32.xlu1 %v3590_v20, %s3269_s27 }
 0x26d   : > { %1031 = vrot.lane.b32.xlu1 %v685_v63, %s3270_s14 }
 0x271   : > { %1033 = vrot.lane.b32.xlu1 %v688_v3, %s3270_s14 }
 0x275   : > { %1029 = vrot.lane.b32.xlu1 %v680_v8, %s3270_s14  ;;  %v804_v8 = vcombine.high %v747_v53, %v763_v50 }
 0x277   : > { %v3656_v41 = vrot.slane %v804_v8, %v3623_v0 }
 0x2cb   : > { %v864_v31 = vpop.permute.xlu1 %863 }
 0x2cc   : > { %v860_v32 = vpop.permute.xlu0 %859 }
 0x2cd   : > { %v883_v40 = vcombine.low %v860_v32, %v864_v31  ;;  %v884_v51 = vcombine.high %v860_v32, %v864_v31  ;;  %v811_v31 = vrot.slane %v803_v61, %v3623_v0  ;;  %v3640_v32 = vrot.slane %v740_v2, %v3553_v7 }
 0x2ce   : > { %v795_v2 = vrot.slane %v787_v24, %v3623_v0 }
 0x2cf   : > { %v866_v33 = vpop.permute.xlu1 %865  ;;  %v891_v29 = vrot.slane %v883_v40, %v3553_v7  ;;  %v898_v63 = vrot.slane %v884_v51, %v3553_v7 }
 0x2d0   : > { %v868_v34 = vpop.permute.xlu0 %867 }
 0x2d3   : > { %v862_v35 = vpop.permute.xlu1 %861 }
 0x2d4   : > { %v899_v36 = vcombine.low %v862_v35, %v866_v33  ;;  %v872_v42 = vpop.permute.xlu0 %871  ;;  %v900_v21 = vcombine.high %v862_v35, %v866_v33 }
 0x2d5   : > { %v915_v46 = vcombine.low %v868_v34, %v872_v42  ;;  %v916_v47 = vcombine.high %v868_v34, %v872_v42  ;;  %v819_v42 = vcombine.low %v3640_v32, %v3628_v6 }
 0x2d6   : > { %v907_v45 = vrot.slane %v899_v36, %v3553_v7  ;;  %v3615_v56 = vrot.slane %v900_v21, %v3553_v7  ;;  %v779_v36 = vrot.slane %v771_v22, %v3623_v0 }
 0x2d7   : > { %v870_v43 = vpop.permute.xlu1 %869  ;;  %v923_v58 = vrot.slane %v915_v46, %v3553_v7  ;;  %v930_v59 = vrot.slane %v916_v47, %v3553_v7 }
 0x2d8   : > { %v947_v57 = vcombine.low %v891_v29, %v907_v45  ;;  %v948_v48 = vcombine.high %v891_v29, %v907_v45  ;;  %v963_v9 = vcombine.low %v898_v63, %v3615_v56  ;;  %v1028_v33 = vpop.permute.xlu0 %1027  ;;  %v835_v46 = vcombine.low %v779_v36, %v811_v31 }
 0x2d9   : > { %v964_v29 = vcombine.high %v898_v63, %v3615_v56  ;;  %v836_v24 = vcombine.high %v779_v36, %v811_v31  ;;  %v802_v31 = vrot.slane %v788_v25, %v3623_v0 }
 0x2da   : > { %v955_v10 = vrot.slane %v947_v57, %v3623_v0  ;;  %v962_v11 = vrot.slane %v948_v48, %v3623_v0  ;;  %v3647_v37 = vrot.slane %v963_v9, %v3623_v0  ;;  %v843_v61 = vpack.c.bf16 %v835_v46, %v835_v46 }
 0x2db   : > { %v874_v52 = vpop.permute.xlu1 %873  ;;  %v820_v9 = vcombine.high %v3640_v32, %v3628_v6 }
 0x2dc   : > { %v931_v54 = vcombine.low %v870_v43, %v874_v52  ;;  %v932_v55 = vcombine.high %v870_v43, %v874_v52  ;;  %v837_v52 = vcombine.low %v3653_v28, %v3656_v41 }
 0x2de   : > { %v939_v49 = vrot.slane %v931_v54, %v3553_v7  ;;  %v946_v60 = vrot.slane %v932_v55, %v3553_v7  ;;  %v845_v63 = vpack.c.bf16 %v837_v52, %v837_v52 }
 0x2df   : > { %v1032_v1 = vpop.permute.xlu1 %1031 }
 0x2e0   : > { %v979_v3 = vcombine.low %v923_v58, %v939_v49  ;;  %v980_v4 = vcombine.high %v923_v58, %v939_v49  ;;  %v995_v5 = vcombine.low %v930_v59, %v946_v60  ;;  %v1051_v40 = vcombine.low %v1028_v33, %v1032_v1 }
 0x2e1   : > { %v1052_v43 = vcombine.high %v1028_v33, %v1032_v1  ;;  %v996_v22 = vcombine.high %v930_v59, %v946_v60  ;;  %v978_v60 = vrot.slane %v964_v29, %v3623_v0  ;;  %v827_v1 = vrot.slane %v819_v42, %v3623_v0 }
 0x2e2   : > { %v987_v62 = vrot.slane %v979_v3, %v3623_v0  ;;  %v994_v12 = vrot.slane %v980_v4, %v3623_v0  ;;  %v3636_v13 = vrot.slane %v995_v5, %v3623_v0  ;;  %v3666_v38 = vrot.slane %v1051_v40, %v3553_v7 }
 0x2e3   : > { %v1034_v15 = vpop.permute.xlu1 %1033  ;;  %v3671_v53 = vrot.slane %v1052_v43, %v3553_v7  ;;  %v1010_v39 = vrot.slane %v996_v22, %v3623_v0  ;;  %v834_v33 = vrot.slane %v820_v9, %v3623_v0  ;;  %v840_v40 = vcombine.high %v795_v2, %v827_v1 }
 0x2e4   : > { %v1011_v34 = vcombine.low %v955_v10, %v987_v62  ;;  %v1013_v35 = vcombine.low %v962_v11, %v994_v12  ;;  %v1012_v47 = vcombine.high %v955_v10, %v987_v62  ;;  %v1015_v50 = vcombine.low %v3647_v37, %v3636_v13 }
 0x2e5   : > { %v1014_v5 = vcombine.high %v962_v11, %v994_v12  ;;  %v1017_v8 = vcombine.low %v978_v60, %v1010_v39  ;;  %v839_v10 = vcombine.low %v795_v2, %v827_v1  ;;  %v844_v12 = vpack.c.bf16 %v836_v24, %v836_v24 }
 0x2e6   : > { %v1019_v44 = vpack.c.bf16 %v1011_v34, %v1011_v34  ;;  %v1021_v21 = vpack.c.bf16 %v1013_v35, %v1013_v35  ;;  %v1020_v56 = vpack.c.bf16 %v1012_v47, %v1012_v47  ;;  %v1023_v57 = vpack.c.bf16 %v1015_v50, %v1015_v50 }
 0x2e7   : > { %v1030_v45 = vpop.permute.xlu1 %1029  ;;  %v1022_v62 = vpack.c.bf16 %v1014_v5, %v1014_v5  ;;  %v1025_v11 = vpack.c.bf16 %v1017_v8, %v1017_v8  ;;  %v1016_v34 = vcombine.high %v3647_v37, %v3636_v13  ;;  %v838_v35 = vcombine.high %v3653_v28, %v3656_v41 }
 0x2e8   : > { %v1067_v51 = vcombine.low %v1030_v45, %v1034_v15  ;;  %v1068_v16 = vcombine.high %v1030_v45, %v1034_v15  ;;  %v1199_v18 = vsel %vm469_vm0, %v1019_v44, 0  ;;  %v1291_v23 = vsel %vm469_vm0, %v1021_v21, 0 }
 0x2e9   : > { %2887 = vmatpush3.bf16.xpose.msra.mxu1 %v1199_v18  ;;  %2899 = vmatpush3.bf16.xpose.msra.mxu0 %v1291_v23  ;;  %v1245_v3 = vsel %vm469_vm0, %v1020_v56, 0  ;;  %v1383_v4 = vsel %vm469_vm0, %v1023_v57, 0  ;;  %v847_v15 = vpack.c.bf16 %v839_v10, %v839_v10  ;;  %v1337_v6 = vsel %vm469_vm0, %v1022_v62, 0 }
 0x2ea   : > { %v3674_v54 = vrot.slane %v1067_v51, %v3553_v7  ;;  %v3677_v55 = vrot.slane %v1068_v16, %v3553_v7  ;;  %2892 = vmatprep.subr.bf16.mxu1 %v3271_v30  ;;  %2910 = vmatprep.subr.bf16.mxu0 %v3271_v30  ;;  %v1475_v32 = vsel %vm469_vm0, %v1025_v11, 0  ;;  %v841_v36 = vcombine.low %v802_v31, %v834_v33 }
 0x2eb   : > { %v1024_v17 = vpack.c.bf16 %v1016_v34, %v1016_v34  ;;  %v846_v19 = vpack.c.bf16 %v838_v35, %v838_v35  ;;  %v1018_v37 = vcombine.high %v978_v60, %v1010_v39  ;;  %v848_v41 = vpack.c.bf16 %v840_v40, %v840_v40 }
 0x2ec   : > { %v1115_v48 = vcombine.low %v3666_v38, %v3674_v54  ;;  %v1116_v58 = vcombine.high %v3666_v38, %v3674_v54  ;;  %v1131_v59 = vcombine.low %v3671_v53, %v3677_v55  ;;  %v1132_v49 = vcombine.high %v3671_v53, %v3677_v55 }
 0x2ed   : > { %v849_v25 = vpack.c.bf16 %v841_v36, %v841_v36  ;;  %v1429_v13 = vsel %vm469_vm0, %v1024_v17, 0  ;;  %v1026_v28 = vpack.c.bf16 %v1018_v37, %v1018_v37  ;;  %v842_v43 = vcombine.high %v802_v31, %v834_v33 }
 0x2ef   : > { %v1521_v42 = vsel %vm469_vm0, %v1026_v28, 0  ;;  %v850_v44 = vpack.c.bf16 %v842_v43, %v842_v43 }
 0x2f0   : > { %2889 = vmatmul.mubr.msk.bf16.vlgmr.msra.gmra.mrb[4].mxu1 %vm469_vm0, %v843_v61  ;;  %2901 = vmatmul.mubr.msk.bf16.vlgmr.msra.gmra.mrb[4].mxu0 %vm469_vm0, %v845_v63 }
 0x2f1   : > { %2893 = vmatpush3.bf16.xpose.msra.mxu1 %v1245_v3  ;;  %2911 = vmatpush3.bf16.xpose.msra.mxu0 %v1383_v4 }
 0x2f2   : > { %2894 = vmatprep.mubr.msk.bf16.mxu1 %vm3272_vm1, %v3271_v30  ;;  %2912 = vmatprep.mubr.msk.bf16.mxu0 %vm3272_vm1, %v3271_v30 }
 0x2f3   : > { %2904 = vmatprep.subr.bf16.mxu1 %v3271_v30  ;;  %2922 = vmatprep.subr.bf16.mxu0 %v3271_v30 }
 0x2f8   : > { %2895 = vmatmul.mubr.msk.bf16.vlgmr.msra.gmra.mrb[8].mxu1 %vm469_vm0, %v844_v12  ;;  %2913 = vmatmul.mubr.msk.bf16.vlgmr.msra.gmra.mrb[8].mxu0 %vm469_vm0, %v847_v15 }
 0x2f9   : > { %2905 = vmatpush3.bf16.xpose.msra.mxu1 %v1337_v6  ;;  %2923 = vmatpush3.bf16.xpose.msra.mxu0 %v1475_v32 }
 0x2fa   : > { %2906 = vmatprep.mubr.msk.bf16.mxu1 %vm3272_vm1, %v3271_v30  ;;  %2924 = vmatprep.mubr.msk.bf16.mxu0 %vm3272_vm1, %v3271_v30 }
 0x2fb   : > { %2916 = vmatprep.subr.bf16.mxu1 %v3271_v30  ;;  %2934 = vmatprep.subr.bf16.mxu0 %v3271_v30 }
 0x300   : > { %2907 = vmatmul.mubr.msk.bf16.vlgmr.msra.gmra.mrb[12].mxu1 %vm469_vm0, %v846_v19  ;;  %2925 = vmatmul.mubr.msk.bf16.vlgmr.msra.gmra.mrb[12].mxu0 %vm469_vm0, %v849_v25 }
 0x301   : > { %2917 = vmatpush3.bf16.xpose.msra.mxu1 %v1429_v13  ;;  %2918 = vmatprep.mubr.msk.bf16.mxu1 %vm3272_vm1, %v3271_v30 }
 0x302   : > { %2928 = vmatprep.subr.bf16.mxu1 %v3271_v30  ;;  %2936 = vmatprep.mubr.msk.bf16.mxu0 %vm3272_vm1, %v3271_v30 }
 0x308   : > { %2919 = vmatmul.mubr.msk.bf16.vlgmr.msra.gmra.mrb[16].mxu1 %vm469_vm0, %v848_v41 }
 0x309   : > { %2929 = vmatpush3.bf16.xpose.msra.mxu1 %v1521_v42  ;;  %2930 = vmatprep.mubr.msk.bf16.mxu1 %vm3272_vm1, %v3271_v30 }
 0x30a   : > { %2940 = vmatprep.subr.bf16.mxu1 %v3271_v30 }
 0x310   : > { %2931 = vmatmul.mubr.msk.bf16.vlgmr.msra.gmra.mrb[20].mxu1 %vm469_vm0, %v850_v44 }
 0x311   : > { %2942 = vmatprep.mubr.msk.bf16.mxu1 %vm3272_vm1, %v3271_v30 }
 0x3c3   : > { %v1235_v21 = vpop.f32.mrb[4].mxu1  ;;  %v1327_v22 = vpop.f32.mrb[4].mxu0 }
 0x3c4   : > { %v2890_v45 = vpop.f32.mrb[5].mxu1  ;;  %v2902_v46 = vpop.f32.mrb[5].mxu0  ;;  %v1564_v47 = vsel %vm1563_vm2, %v1235_v21, -inf  ;;  %v1570_v23 = vsel %vm1563_vm2, %v1327_v22, -inf }
 0x3c5   : > { %v1330_v50 = vpop.f32.mrb[6].mxu0  ;;  %1565 = vmax.xlane.f32.xlu0 %v1564_v47  ;;  %v1238_v51 = vpop.f32.mrb[6].mxu1 }
 0x3c6   : > { %v2891_v16 = vpop.f32.mrb[7].mxu1  ;;  %v2903_v18 = vpop.f32.mrb[7].mxu0 }
 0x3c9   : > { %1571 = vmax.xlane.f32.xlu0 %v1570_v23 }
 0x3cb   : > { %v1281_v29 = vpop.f32.mrb[8].mxu1  ;;  %v3745_v52 = vpop.f32.mrb[8].mxu0 }
 0x3cc   : > { %v2896_v39 = vpop.f32.mrb[9].mxu1  ;;  %v2914_v56 = vpop.f32.mrb[9].mxu0  ;;  %v1576_v57 = vsel %vm1563_vm2, %v3745_v52, -inf  ;;  %v1567_v60 = vsel %vm1563_vm2, %v1281_v29, -inf }
 0x3cd   : > { %v1422_v61 = vpop.f32.mrb[10].mxu0  ;;  %1577 = vmax.xlane.f32.xlu0 %v1576_v57  ;;  %1568 = vmax.xlane.f32.xlu1 %v1567_v60  ;;  %v1284_v63 = vpop.f32.mrb[10].mxu1 }
 0x3ce   : > { %v2897_v1 = vpop.f32.mrb[11].mxu1  ;;  %v2915_v2 = vpop.f32.mrb[11].mxu0 }
 0x3d3   : > { %v1373_v3 = vpop.f32.mrb[12].mxu1  ;;  %v3750_v4 = vpop.f32.mrb[12].mxu0 }
 0x3d4   : > { %v2908_v5 = vpop.f32.mrb[13].mxu1  ;;  %v2926_v8 = vpop.f32.mrb[13].mxu0  ;;  %v1573_v9 = vsel %vm1563_vm2, %v1373_v3, -inf  ;;  %v1582_v12 = vsel %vm1563_vm2, %v3750_v4, -inf }
 0x3d5   : > { %v1514_v24 = vpop.f32.mrb[14].mxu0  ;;  %1574 = vmax.xlane.f32.xlu0 %v1573_v9  ;;  %v1376_v10 = vpop.f32.mrb[14].mxu1 }
 0x3d6   : > { %v2909_v62 = vpop.f32.mrb[15].mxu1  ;;  %v2927_v11 = vpop.f32.mrb[15].mxu0 }
 0x3d9   : > { %1583 = vmax.xlane.f32.xlu0 %v1582_v12 }
 0x3db   : > { %v1465_v15 = vpop.f32.mrb[16].mxu1 }
 0x3dc   : > { %v2920_v33 = vpop.f32.mrb[17].mxu1  ;;  %v1579_v6 = vsel %vm1563_vm2, %v1465_v15, -inf }
 0x3dd   : > { %1580 = vmax.xlane.f32.xlu1 %v1579_v6  ;;  %v1468_v32 = vpop.f32.mrb[18].mxu1 }
 0x3de   : > { %v2921_v31 = vpop.f32.mrb[19].mxu1 }
 0x3e3   : > { %v1557_v34 = vpop.f32.mrb[20].mxu1 }
 0x3e4   : > { %v2932_v35 = vpop.f32.mrb[21].mxu1  ;;  %v1585_v36 = vsel %vm1563_vm2, %v1557_v34, -inf }
 0x3e5   : > { %1586 = vmax.xlane.f32.xlu1 %v1585_v36  ;;  %v1560_v17 = vpop.f32.mrb[22].mxu1 }
 0x3e6   : > { %v2933_v19 = vpop.f32.mrb[23].mxu1 }
 0x3ef   : > { %1035 = vrot.lane.b32.xlu0 %v3556_v14, %s3270_s14 }
 0x3f6   : > { %1037 = vrot.lane.b32.xlu1 %v3584_v27, %s3270_s14 }
 0x452   : > { %v1566_v25 = vpop.xlane.xlu0 %1565 }
 0x453   : > { %v1588_v13 = vsub.f32 %v1235_v21, %v1566_v25 }
 0x455   : > { %v1596_v37 = vmul.f32 1.442695, %v1588_v13 }
 0x456   : > { %v1572_v40 = vpop.xlane.xlu0 %1571 }
 0x457   : > { %3110 = vpow2.f32 %v1596_v37  ;;  %v1590_v28 = vsub.f32 %v1327_v22, %v1572_v40 }
 0x459   : > { %v1600_v41 = vmul.f32 1.442695, %v1590_v28 }
 0x45a   : > { %v1569_v42 = vpop.xlane.xlu1 %1568  ;;  %v1578_v45 = vpop.xlane.xlu0 %1577 }
 0x45b   : > { %3112 = vpow2.f32 %v1600_v41  ;;  %v1589_v43 = vsub.f32 %v1281_v29, %v1569_v42  ;;  %v1592_v29 = vsub.f32 %v3745_v52, %v1578_v45  ;;  %v1123_v42 = vrot.slane %v1115_v48, %v3623_v0 }
 0x45d   : > { %v1598_v44 = vmul.f32 1.442695, %v1589_v43  ;;  %v1604_v57 = vmul.f32 1.442695, %v1592_v29  ;;  %v1130_v43 = vrot.slane %v1116_v58, %v3623_v0 }
 0x45f   : > { %3114 = vpow2.f32 %v1598_v44 }
 0x461   : > { %v3761_v46 = vpop.eup %3110 }
 0x462   : > { %v1575_v47 = vpop.xlane.xlu0 %1574  ;;  %v1612_v14 = vsel %vm1563_vm2, %v3761_v46, 0.0 }
 0x463   : > { %v1591_v27 = vsub.f32 %v1373_v3, %v1575_v47  ;;  %1613 = vadd.xlane.f32.xlu0 %v1612_v14 }
 0x465   : > { %v3765_v21 = vpop.eup %3112  ;;  %v1602_v50 = vmul.f32 1.442695, %v1591_v27 }
 0x466   : > { %v1618_v22 = vsel %vm1563_vm2, %v3765_v21, 0.0  ;;  %v1584_v39 = vpop.xlane.xlu0 %1583 }
 0x467   : > { %3116 = vpow2.f32 %v1602_v50  ;;  %1619 = vadd.xlane.f32.xlu0 %v1618_v22  ;;  %v1594_v60 = vsub.f32 %v3750_v4, %v1584_v39 }
 0x468   : > { %3118 = vpow2.f32 %v1604_v57 }
 0x469   : > { %v3769_v51 = vpop.eup %3114  ;;  %v1608_v63 = vmul.f32 1.442695, %v1594_v60 }
 0x46a   : > { %v1615_v16 = vsel %vm1563_vm2, %v3769_v51, 0.0  ;;  %v1581_v56 = vpop.xlane.xlu1 %1580  ;;  %v1036_v62 = vpop.permute.xlu0 %1035 }
 0x46b   : > { %1616 = vadd.xlane.f32.xlu1 %v1615_v16  ;;  %3120 = vpow2.f32 %v1608_v63  ;;  %v1593_v2 = vsub.f32 %v1465_v15, %v1581_v56 }
 0x46d   : > { %v1606_v5 = vmul.f32 1.442695, %v1593_v2 }
 0x471   : > { %v3773_v18 = vpop.eup %3116 }
 0x472   : > { %v1621_v23 = vsel %vm1563_vm2, %v3773_v18, 0.0  ;;  %v1587_v61 = vpop.xlane.xlu1 %1586 }
 0x473   : > { %1622 = vadd.xlane.f32.xlu1 %v1621_v23  ;;  %v1595_v1 = vsub.f32 %v1557_v34, %v1587_v61 }
 0x475   : > { %v1610_v3 = vmul.f32 1.442695, %v1595_v1 }
 0x476   : > { %v1038_v12 = vpop.permute.xlu1 %1037 }
 0x477   : > { %3122 = vpow2.f32 %v1610_v3 }
 0x478   : > { %3124 = vpow2.f32 %v1606_v5 }
 0x47d   : > { %1039 = vrot.lane.b32.xlu0 %v3581_v26, %s3270_s14  ;;  %v3783_v26 = vpop.eup %3118 }
 0x47e   : > { %v3787_v52 = vpop.eup %3120 }
 0x47f   : > { %v1630_v4 = vsel %vm1563_vm2, %v3787_v52, 0.0 }
 0x481   : > { %v3791_v8 = vpop.eup %3122 }
 0x482   : > { %v1633_v9 = vsel %vm1563_vm2, %v3791_v8, 0.0  ;;  %v3795_v24 = vpop.eup %3124 }
 0x483   : > { %v1627_v10 = vsel %vm1563_vm2, %v3795_v24, 0.0 }
 0x484   : > { %1041 = vrot.lane.b32.xlu1 %v3590_v20, %s3270_s14  ;;  %v1624_v20 = vsel %vm1563_vm2, %v3783_v26, 0.0 }
 0x49c   : > { %1625 = vadd.xlane.f32.xlu0 %v1624_v20 }
 0x4a0   : > { %1631 = vadd.xlane.f32.xlu0 %v1630_v4 }
 0x4a4   : > { %1634 = vadd.xlane.f32.xlu0 %v1633_v9 }
 0x4a8   : > { %1628 = vadd.xlane.f32.xlu1 %v1627_v10 }
 0x4f0   : > { %v1614_v11 = vpop.xlane.xlu0 %1613 }
 0x4f1   : > { %3126 = vrcp.f32 %v1614_v11 }
 0x4f4   : > { %v1620_v15 = vpop.xlane.xlu0 %1619 }
 0x4f8   : > { %v1617_v33 = vpop.xlane.xlu1 %1616  ;;  %v1040_v6 = vpop.permute.xlu0 %1039 }
 0x4f9   : > { %3128 = vrcp.f32 %v1617_v33  ;;  %v1083_v31 = vcombine.low %v1036_v62, %v1040_v6  ;;  %v1084_v17 = vcombine.high %v1036_v62, %v1040_v6  ;;  %v1146_v6 = vrot.slane %v1132_v49, %v3623_v0 }
 0x4fa   : > { %3130 = vrcp.f32 %v1620_v15 }
 0x4fb   : > { %v1091_v19 = vrot.slane %v1083_v31, %v3553_v7  ;;  %v3805_v28 = vrot.slane %v1084_v17, %v3553_v7  ;;  %v3127_v41 = vpop.eup %3126 }
 0x4fc   : > { %v1644_v48 = vmul.f32 %v3127_v41, %v3761_v46  ;;  %v1139_v46 = vrot.slane %v1131_v59, %v3623_v0 }
 0x4fe   : > { %v1652_v61 = vpack.c.bf16 %v1644_v48, %v1644_v48 }
 0x500   : > { %v1623_v32 = vpop.xlane.xlu1 %1622 }
 0x501   : > { %3132 = vrcp.f32 %v1623_v32 }
 0x503   : > { %v3129_v47 = vpop.eup %3128 }
 0x504   : > { %v1042_v34 = vpop.permute.xlu1 %1041  ;;  %v1645_v23 = vmul.f32 %v3129_v47, %v3769_v51  ;;  %v3131_v60 = vpop.eup %3130 }
 0x505   : > { %v1099_v35 = vcombine.low %v1038_v12, %v1042_v34  ;;  %v1100_v36 = vcombine.high %v1038_v12, %v1042_v34  ;;  %v1646_v59 = vmul.f32 %v3131_v60, %v3765_v21 }
 0x506   : > { %v1653_v51 = vpack.c.bf16 %v1645_v23, %v1645_v23 }
 0x507   : > { %v1107_v25 = vrot.slane %v1099_v35, %v3553_v7  ;;  %v3802_v13 = vrot.slane %v1100_v36, %v3553_v7  ;;  %v1654_v10 = vpack.c.bf16 %v1646_v59, %v1646_v59 }
 0x509   : > { %v1147_v37 = vcombine.low %v1091_v19, %v1107_v25  ;;  %v1148_v40 = vcombine.high %v1091_v19, %v1107_v25  ;;  %v1163_v14 = vcombine.low %v3805_v28, %v3802_v13  ;;  %v1164_v11 = vcombine.high %v3805_v28, %v3802_v13 }
 0x50b   : > { %v1155_v44 = vrot.slane %v1147_v37, %v3623_v0  ;;  %v1162_v45 = vrot.slane %v1148_v40, %v3623_v0  ;;  %v1171_v54 = vrot.slane %v1163_v14, %v3623_v0  ;;  %v3133_v63 = vpop.eup %3132  ;;  %v1178_v15 = vrot.slane %v1164_v11, %v3623_v0 }
 0x50c   : > { %v1647_v20 = vmul.f32 %v3133_v63, %v3773_v18 }
 0x50d   : > { %v1179_v27 = vcombine.low %v1123_v42, %v1155_v44  ;;  %v1180_v50 = vcombine.high %v1123_v42, %v1155_v44  ;;  %v1181_v22 = vcombine.low %v1130_v43, %v1162_v45  ;;  %v1182_v16 = vcombine.high %v1130_v43, %v1162_v45  ;;  %v3087_v44 = vld [vmem:[%s4141_s5 + $0x8] sm:$0xff]  }
 0x50e   : > { %v1183_v3 = vcombine.low %v1139_v46, %v1171_v54  ;;  %v1184_v5 = vcombine.high %v1139_v46, %v1171_v54  ;;  %v1655_v62 = vpack.c.bf16 %v1647_v20, %v1647_v20  ;;  %v1185_v32 = vcombine.low %v1146_v6, %v1178_v15 }
 0x50f   : > { %v1187_v29 = vpack.c.bf16 %v1179_v27, %v1179_v27  ;;  %v1188_v38 = vpack.c.bf16 %v1180_v50, %v1180_v50  ;;  %v1189_v56 = vpack.c.bf16 %v1181_v22, %v1181_v22  ;;  %v1190_v57 = vpack.c.bf16 %v1182_v16, %v1182_v16 }
 0x510   : > { %v1191_v4 = vpack.c.bf16 %v1183_v3, %v1183_v3  ;;  %v1192_v9 = vpack.c.bf16 %v1184_v5, %v1184_v5  ;;  %v1193_v36 = vpack.c.bf16 %v1185_v32, %v1185_v32  ;;  %v1186_v55 = vcombine.high %v1146_v6, %v1178_v15 }
 0x511   : > { %v1665_v58 = vsel %vm1663_vm3, %v1187_v29, 0  ;;  %v1711_v39 = vsel %vm1663_vm3, %v1188_v38, 0  ;;  %v1757_v1 = vsel %vm1663_vm3, %v1189_v56, 0  ;;  %v1803_v2 = vsel %vm1663_vm3, %v1190_v57, 0 }
 0x512   : > { %2935 = vmatpush3.bf16.msra.mxu0 %v1665_v58  ;;  %2941 = vmatpush3.bf16.msra.mxu1 %v1711_v39  ;;  %v1849_v21 = vsel %vm1663_vm3, %v1191_v4, 0  ;;  %v1895_v18 = vsel %vm1663_vm3, %v1192_v9, 0  ;;  %v1941_v13 = vsel %vm1663_vm3, %v1193_v36, 0  ;;  %v1194_v40 = vpack.c.bf16 %v1186_v55, %v1186_v55 }
 0x513   : > { %2946 = vmatprep.subr.bf16.mxu0 %v3271_v30  ;;  %2952 = vmatprep.subr.bf16.mxu1 %v3271_v30 }
 0x514   : > { %v1987_v42 = vsel %vm1663_vm3, %v1194_v40, 0 }
 0x515   : > { %2937 = vmatmul.mubr.msk.bf16.vlgmr.msra.gmra.mrb[16].mxu0 %vm1563_vm2, %v1652_v61  ;;  %2943 = vmatmul.mubr.msk.bf16.vlgmr.msra.gmra.mrb[24].mxu1 %vm1563_vm2, %v1653_v51 }
 0x516   : > { %2947 = vmatpush3.bf16.msra.mxu0 %v1757_v1  ;;  %2953 = vmatpush3.bf16.msra.mxu1 %v1803_v2 }
 0x517   : > { %2948 = vmatprep.mubr.msk.bf16.mxu0 %vm3272_vm1, %v3271_v30  ;;  %2954 = vmatprep.mubr.msk.bf16.mxu1 %vm3272_vm1, %v3271_v30 }
 0x518   : > { %2958 = vmatprep.subr.bf16.mxu0 %v3271_v30  ;;  %2964 = vmatprep.subr.bf16.mxu1 %v3271_v30 }
 0x51d   : > { %2949 = vmatmul.mubr.msk.bf16.vlgmr.msra.gmra.mrb[20].mxu0 %vm1563_vm2, %v1654_v10  ;;  %2955 = vmatmul.mubr.msk.bf16.vlgmr.msra.gmra.mrb[28].mxu1 %vm1563_vm2, %v1655_v62 }
 0x51e   : > { %2959 = vmatpush3.bf16.msra.mxu0 %v1849_v21  ;;  %2965 = vmatpush3.bf16.msra.mxu1 %v1895_v18 }
 0x51f   : > { %2960 = vmatprep.mubr.msk.bf16.mxu0 %vm3272_vm1, %v3271_v30  ;;  %2970 = vmatprep.subr.bf16.mxu0 %v3271_v30 }
 0x520   : > { %2966 = vmatprep.mubr.msk.bf16.mxu1 %vm3272_vm1, %v3271_v30  ;;  %2976 = vmatprep.subr.bf16.mxu1 %v3271_v30 }
 0x529   : > { %v1626_v12 = vpop.xlane.xlu0 %1625 }
 0x52a   : > { %3134 = vrcp.f32 %v1626_v12 }
 0x52d   : > { %v1632_v33 = vpop.xlane.xlu0 %1631 }
 0x52e   : > { %3136 = vrcp.f32 %v1632_v33 }
 0x531   : > { %v1635_v17 = vpop.xlane.xlu0 %1634 }
 0x534   : > { %v3135_v31 = vpop.eup %3134 }
 0x535   : > { %v1648_v34 = vmul.f32 %v3135_v31, %v3783_v26  ;;  %v1629_v35 = vpop.xlane.xlu1 %1628 }
 0x536   : > { %3138 = vrcp.f32 %v1629_v35 }
 0x537   : > { %v1656_v19 = vpack.c.bf16 %v1648_v34, %v1648_v34  ;;  %3140 = vrcp.f32 %v1635_v17 }
 0x538   : > { %v3137_v25 = vpop.eup %3136 }
 0x539   : > { %2961 = vmatmul.mubr.msk.bf16.vlgmr.msra.gmra.mrb[24].mxu0 %vm1563_vm2, %v1656_v19  ;;  %v1650_v53 = vmul.f32 %v3137_v25, %v3787_v52 }
 0x53a   : > { %2971 = vmatpush3.bf16.msra.mxu0 %v1941_v13  ;;  %2972 = vmatprep.mubr.msk.bf16.mxu0 %vm3272_vm1, %v3271_v30 }
 0x53b   : > { %v1658_v49 = vpack.c.bf16 %v1650_v53, %v1650_v53 }
 0x540   : > { %v3139_v26 = vpop.eup %3138 }
 0x541   : > { %v1649_v37 = vmul.f32 %v3139_v26, %v3795_v24  ;;  %2973 = vmatmul.mubr.msk.bf16.vlgmr.msra.gmra.mrb[28].mxu0 %vm1563_vm2, %v1658_v49  ;;  %v3141_v41 = vpop.eup %3140  ;;  %v3086_v24 = vld [vmem:[%s4141_s5] sm:$0xff]  }
 0x542   : > { %v1651_v52 = vmul.f32 %v3141_v41, %v3791_v8  ;;  %2982 = vmatprep.subr.bf16.mxu0 %v3086_v24 }
 0x543   : > { %v1657_v28 = vpack.c.bf16 %v1649_v37, %v1649_v37  ;;  %2983 = vmatpush3.bf16.msra.mxu0 %v3086_v24 }
 0x544   : > { %v1659_v43 = vpack.c.bf16 %v1651_v52, %v1651_v52  ;;  %2984 = vmatprep.subr.bf16.mxu0 %v3087_v44 }
 0x545   : > { %2967 = vmatmul.mubr.msk.bf16.vlgmr.msra.gmra.mrb[32].mxu1 %vm1563_vm2, %v1657_v28 }
 0x546   : > { %2977 = vmatpush3.bf16.msra.mxu1 %v1987_v42  ;;  %2978 = vmatprep.mubr.msk.bf16.mxu1 %vm3272_vm1, %v3271_v30 }
 0x547   : > { %2985 = vmatpush3.bf16.msra.mxu0 %v3087_v44 }
 0x54d   : > { %2979 = vmatmul.mubr.msk.bf16.vlgmr.msra.gmra.mrb[36].mxu1 %vm1563_vm2, %v1659_v43 }
 0x5e8   : > { %v1701_v45 = vpop.f32.mrb[16].mxu0  ;;  %v1747_v47 = vpop.f32.mrb[24].mxu1 }
 0x5e9   : > { %v2938_v30 = vpop.f32.mrb[17].mxu0  ;;  %v2944_v14 = vpop.f32.mrb[25].mxu1 }
 0x5ea   : > { %v1704_v8 = vpop.f32.mrb[18].mxu0  ;;  %v1750_v27 = vpop.f32.mrb[26].mxu1 }
 0x5eb   : > { %v2939_v50 = vpop.f32.mrb[19].mxu0  ;;  %v2945_v22 = vpop.f32.mrb[27].mxu1 }
 0x5f0   : > { %v1793_v16 = vpop.f32.mrb[20].mxu0  ;;  %v1839_v48 = vpop.f32.mrb[28].mxu1 }
 0x5f1   : > { %v2029_v23 = vcombine.low %v1701_v45, %v1793_v16  ;;  %v2030_v29 = vcombine.high %v1701_v45, %v1793_v16  ;;  %v2045_v38 = vcombine.low %v1747_v47, %v1839_v48  ;;  %v2046_v54 = vcombine.high %v1747_v47, %v1839_v48  ;;  %v2950_v58 = vpop.f32.mrb[21].mxu0  ;;  %v2956_v39 = vpop.f32.mrb[29].mxu1 }
 0x5f2   : > { %v1796_v56 = vpop.f32.mrb[22].mxu0  ;;  %v1842_v57 = vpop.f32.mrb[30].mxu1 }
 0x5f3   : > { %v2037_v60 = vrot.slane %v2029_v23, %v3553_v7  ;;  %v2044_v46 = vrot.slane %v2030_v29, %v3553_v7  ;;  %v2053_v61 = vrot.slane %v2045_v38, %v3553_v7  ;;  %v2060_v51 = vrot.slane %v2046_v54, %v3553_v7  ;;  %v2951_v63 = vpop.f32.mrb[23].mxu0  ;;  %v2957_v1 = vpop.f32.mrb[31].mxu1 }
 0x5f4   : > { %v3159_v1 = vld [vmem:[%s3460_s16 + $0x10] sm:$0xff] }
 0x5f5   : > { %v2093_v2 = vcombine.low %v2037_v60, %v2053_v61  ;;  %v2094_v3 = vcombine.high %v2037_v60, %v2053_v61  ;;  %v2109_v5 = vcombine.low %v2044_v46, %v2060_v51  ;;  %v2110_v59 = vcombine.high %v2044_v46, %v2060_v51  ;;  %v3158_v46 = vld [vmem:[%s3460_s16] sm:$0xff] }
 0x5f7   : > { %v2101_v41 = vrot.slane %v2093_v2, %v3623_v0  ;;  %v2108_v42 = vrot.slane %v2094_v3, %v3623_v0  ;;  %v2117_v45 = vrot.slane %v2109_v5, %v3623_v0  ;;  %v3160_v3 = vld [vmem:[%s3460_s16 + $0x8] sm:$0xff] }
 0x60c   : > { %v1885_v20 = vpop.f32.mrb[24].mxu0 }
 0x60d   : > { %v2962_v4 = vpop.f32.mrb[25].mxu0 }
 0x60e   : > { %v1888_v9 = vpop.f32.mrb[26].mxu0 }
 0x60f   : > { %v2963_v10 = vpop.f32.mrb[27].mxu0 }
 0x614   : > { %v1977_v62 = vpop.f32.mrb[28].mxu0 }
 0x615   : > { %v2061_v21 = vcombine.low %v1885_v20, %v1977_v62  ;;  %v2062_v18 = vcombine.high %v1885_v20, %v1977_v62  ;;  %v2974_v11 = vpop.f32.mrb[29].mxu0  ;;  %v3161_v20 = vld [vmem:[%s3460_s16 + $0x18] sm:$0xff] }
 0x616   : > { %v1980_v12 = vpop.f32.mrb[30].mxu0 }
 0x617   : > { %v2975_v15 = vpop.f32.mrb[31].mxu0  ;;  %v2069_v25 = vrot.slane %v2061_v21, %v3553_v7  ;;  %v2076_v13 = vrot.slane %v2062_v18, %v3553_v7 }
 0x618   : > { %v1931_v33 = vpop.f32.mrb[32].mxu1 }
 0x619   : > { %v2968_v6 = vpop.f32.mrb[33].mxu1 }
 0x61a   : > { %v1934_v32 = vpop.f32.mrb[34].mxu1 }
 0x61b   : > { %v2969_v31 = vpop.f32.mrb[35].mxu1 }
 0x620   : > { %v2023_v34 = vpop.f32.mrb[36].mxu1 }
 0x621   : > { %v2077_v35 = vcombine.low %v1931_v33, %v2023_v34  ;;  %v2078_v36 = vcombine.high %v1931_v33, %v2023_v34  ;;  %v2980_v17 = vpop.f32.mrb[37].mxu1  ;;  %v3162_v33 = vld [vmem:[%s3460_s16 + $0x20] sm:$0xff] }
 0x622   : > { %v2026_v19 = vpop.f32.mrb[38].mxu1  ;;  %v3164_v17 = vld [vmem:[%s3460_s16 + $0x28] sm:$0xff] }
 0x623   : > { %v2085_v53 = vrot.slane %v2077_v35, %v3553_v7  ;;  %v2092_v55 = vrot.slane %v2078_v36, %v3553_v7  ;;  %v2981_v49 = vpop.f32.mrb[39].mxu1  ;;  %v2124_v7 = vrot.slane %v2110_v59, %v3623_v0  ;;  %v3163_v35 = vld [vmem:[%s3460_s16 + $0x30] sm:$0xff] }
 0x625   : > { %v2125_v26 = vcombine.low %v2069_v25, %v2085_v53  ;;  %v2126_v37 = vcombine.high %v2069_v25, %v2085_v53  ;;  %v2141_v40 = vcombine.low %v2076_v13, %v2092_v55  ;;  %v2142_v28 = vcombine.high %v2076_v13, %v2092_v55  ;;  %v3165_v13 = vld [vmem:[%s3460_s16 + $0x38] sm:$0xff]  ;;  %s457_s16 = scalar_lea.vmem [#allocation5], %s2760_s18  ;;  %s2813_s18 = sshll.u32 %s3369_s29, 7 }
 0x626   : > { %s2681_s25 = sshll.u32 %s457_s16, 4  ;;  %s4089_s14 = scalar_lea.hbm %s4149_s13, %s2813_s18  ;;  %s4081_s25 = int_to_ptr.vmem [resolvable:$true] %s2681_s25 }
 0x627   : > { %v2133_v52 = vrot.slane %v2125_v26, %v3623_v0  ;;  %v2140_v43 = vrot.slane %v2126_v37, %v3623_v0  ;;  %v2149_v24 = vrot.slane %v2141_v40, %v3623_v0  ;;  %v2156_v44 = vrot.slane %v2142_v28, %v3623_v0  ;;  %v2787_v0 = vld [vmem:[%s4142_s6] ss:$0 sm:$0xff]  ;;  %s3196_s19 = scalar_lea.vmem %s4081_s25, 1024  ;;  %p3203_p4 = scmp.lt.s32.totalorder %s4081_s25, %s3201_s15 }
 0x628   : > { %p3197_p6 = scmp.ne.s32.totalorder %s4081_s25, %s3196_s19  ;;  %p3204_p10 = scmp.lt.s32.totalorder %s3202_s30, %s3196_s19 }
 0x629   : > { %v2159_v47 = vcombine.low %v2108_v42, %v2140_v43  ;;  %v2160_v30 = vcombine.high %v2108_v42, %v2140_v43  ;;  %v2157_v14 = vcombine.low %v2101_v41, %v2133_v52  ;;  %v2158_v8 = vcombine.high %v2101_v41, %v2133_v52 }
 0x62a   : > { %v2161_v27 = vcombine.low %v2117_v45, %v2149_v24  ;;  %v2162_v50 = vcombine.high %v2117_v45, %v2149_v24  ;;  %v2163_v22 = vcombine.low %v2124_v7, %v2156_v44  ;;  %v2164_v16 = vcombine.high %v2124_v7, %v2156_v44  ;;  %p3198_p12 = pnand %p3197_p6, %p4165_p11  ;;  %p3205_p1 = por %p3204_p10, %p3203_p4 }
 0x62b   : > { %v2166_v48 = vpack.c.bf16 %v2160_v30, %v2159_v47  ;;  %v2165_v23 = vpack.c.bf16 %v2158_v8, %v2157_v14 }
 0x62c   : > { %v2167_v29 = vpack.c.bf16 %v2162_v50, %v2161_v27  ;;  %v2168_v38 = vpack.c.bf16 %v2164_v16, %v2163_v22  ;;  %p3199_p13 = pneg %p3198_p12 }
 0x62d   : > { %2986 = vmatprep.mubr.msk.bf16.mxu0 %vm469_vm0, %v2165_v23 }
 0x62e   : > { %2987 = vmatmul.mubr.msk.bf16.vlgmr.msra.gmra.mrb[32].mxu0 %vm469_vm0, %v2166_v48  ;;  %p3206_p3 = pnand %p3205_p1, %p3199_p13 }
 0x62f   : > { %2990 = vmatprep.mubr.msk.bf16.mxu0 %vm469_vm0, %v2167_v29 }
 0x636   : > { %2991 = vmatmul.mubr.msk.bf16.gmra.mrb[36].mxu0 %vm469_vm0, %v2168_v38 }
 0x701   : > { %v2988_v54 = vpop.f32.mrb[32].mxu0 }
 0x702   : > { %v2238_v58 = vpop.f32.mrb[33].mxu0  ;;  %v2247_v39 = vadd.f32 %v2988_v54, %v2787_v0 }
 0x703   : > { %v2239_v56 = vadd.f32 %v2787_v0, %v2238_v58  ;;  %v2989_v57 = vpop.f32.mrb[34].mxu0 }
 0x704   : > { %v2241_v60 = vpop.f32.mrb[35].mxu0  ;;  %v2250_v51 = vadd.f32 %v2989_v57, %v2787_v0  ;;  %v3906_v2 = vadd.f32 %v3159_v1, %v2247_v39 }
 0x705   : > { %v3903_v61 = vadd.f32 %v3158_v46, %v2239_v56  ;;  %v2242_v63 = vadd.f32 %v2787_v0, %v2241_v60 }
 0x706   : > { %v3914_v4 = vadd.f32 %v3161_v20, %v2250_v51  ;;  %v2285_v12 = vsel %vm469_vm0, %v3906_v2, 0.0 }
 0x707   : > { %v3909_v5 = vadd.f32 %v3160_v3, %v2242_v63  ;;  %v2279_v59 = vsel %vm469_vm0, %v3903_v61, 0.0 }
 0x708   : > { %2280 = vadd.xlane.f32.xlu0 %v2279_v59  ;;  %v2288_v34 = vsel %vm469_vm0, %v3914_v4, 0.0 }
 0x709   : > { %v2992_v9 = vpop.f32.mrb[36].mxu0  ;;  %v2282_v10 = vsel %vm469_vm0, %v3909_v5, 0.0 }
 0x70a   : > { %v2254_v62 = vpop.f32.mrb[37].mxu0  ;;  %2283 = vadd.xlane.f32.xlu1 %v2282_v10  ;;  %v2263_v21 = vadd.f32 %v2992_v9, %v2787_v0 }
 0x70b   : > { %v2255_v18 = vadd.f32 %v2787_v0, %v2254_v62  ;;  %v2993_v11 = vpop.f32.mrb[38].mxu0 }
 0x70c   : > { %v2257_v15 = vpop.f32.mrb[39].mxu0  ;;  %2286 = vadd.xlane.f32.xlu0 %v2285_v12  ;;  %v2266_v32 = vadd.f32 %v2993_v11, %v2787_v0  ;;  %v3926_v36 = vadd.f32 %v3163_v35, %v2263_v21  ;;  %v3088_v21 = vld [vmem:[%s4145_s9] sm:$0xff]   ;;  %v3091_v12 = vld [vmem:[%s4147_s11 + $0x8] sm:$0xff]  }
 0x70d   : > { %v3921_v6 = vadd.f32 %v3162_v33, %v2255_v18  ;;  %v2258_v31 = vadd.f32 %v2787_v0, %v2257_v15  ;;  %2994 = vmatprep.subr.bf16.mxu1 %v3088_v21  ;;  %v3089_v18 = vld [vmem:[%s4145_s9 + $0x8] sm:$0xff]   ;;  %v3090_v11 = vld [vmem:[%s4147_s11] sm:$0xff]  }
 0x70e   : > { %2289 = vadd.xlane.f32.xlu1 %v2288_v34  ;;  %v3934_v53 = vadd.f32 %v3165_v13, %v2266_v32  ;;  %v2297_v49 = vsel %vm469_vm0, %v3926_v36, 0.0  ;;  %2995 = vmatpush3.bf16.msra.mxu1 %v3088_v21 }
 0x70f   : > { %v3929_v19 = vadd.f32 %v3164_v17, %v2258_v31  ;;  %v2291_v25 = vsel %vm469_vm0, %v3921_v6, 0.0  ;;  %2996 = vmatprep.subr.bf16.mxu1 %v3089_v18  ;;  %3006 = vmatprep.subr.bf16.mxu0 %v3090_v11 }
 0x710   : > { %2292 = vadd.xlane.f32.xlu0 %v2291_v25  ;;  %v2300_v26 = vsel %vm469_vm0, %v3934_v53, 0.0  ;;  %3007 = vmatpush3.bf16.msra.mxu0 %v3090_v11 }
 0x711   : > { %v2294_v55 = vsel %vm469_vm0, %v3929_v19, 0.0  ;;  %3008 = vmatprep.subr.bf16.mxu0 %v3091_v12 }
 0x712   : > { %2295 = vadd.xlane.f32.xlu1 %v2294_v55  ;;  %2997 = vmatpush3.bf16.msra.mxu1 %v3089_v18 }
 0x714   : > { %2298 = vadd.xlane.f32.xlu0 %v2297_v49  ;;  %3009 = vmatpush3.bf16.msra.mxu0 %v3091_v12 }
 0x716   : > { %2301 = vadd.xlane.f32.xlu1 %v2300_v26 }
 0x795   : > { %v2281_v37 = vpop.xlane.xlu0 %2280 }
 0x796   : > { %v2303_v40 = vmul.f32 0.03125, %v2281_v37 }
 0x797   : > { %v2284_v28 = vpop.xlane.xlu1 %2283 }
 0x798   : > { %v3943_v41 = vsub.f32 %v3903_v61, %v2303_v40  ;;  %v2304_v42 = vmul.f32 0.03125, %v2284_v28 }
 0x799   : > { %v2287_v52 = vpop.xlane.xlu0 %2286 }
 0x79a   : > { %v3946_v43 = vsub.f32 %v3909_v5, %v2304_v42  ;;  %v2305_v24 = vmul.f32 0.03125, %v2287_v52  ;;  %v2319_v44 = vmul.f32 %v3943_v41, %v3943_v41 }
 0x79b   : > { %v2290_v45 = vpop.xlane.xlu1 %2289 }
 0x79c   : > { %v3951_v7 = vsub.f32 %v3906_v2, %v2305_v24  ;;  %v2306_v47 = vmul.f32 0.03125, %v2290_v45  ;;  %v2327_v30 = vsel %vm469_vm0, %v2319_v44, 0.0  ;;  %v2320_v14 = vmul.f32 %v3946_v43, %v3946_v43 }
 0x79d   : > { %2328 = vadd.xlane.f32.xlu0 %v2327_v30  ;;  %v2293_v8 = vpop.xlane.xlu0 %2292 }
 0x79e   : > { %v3957_v27 = vsub.f32 %v3914_v4, %v2306_v47  ;;  %v2307_v50 = vmul.f32 0.03125, %v2293_v8  ;;  %v2330_v22 = vsel %vm469_vm0, %v2320_v14, 0.0  ;;  %v2321_v16 = vmul.f32 %v3951_v7, %v3951_v7  ;;  %v2794_v14 = vld [vmem:[%s4143_s7] ss:$0 sm:$0xff] }
 0x79f   : > { %2331 = vadd.xlane.f32.xlu1 %v2330_v22  ;;  %v2296_v48 = vpop.xlane.xlu1 %2295 }
 0x7a0   : > { %v3963_v23 = vsub.f32 %v3921_v6, %v2307_v50  ;;  %v2308_v29 = vmul.f32 0.03125, %v2296_v48  ;;  %v2333_v38 = vsel %vm469_vm0, %v2321_v16, 0.0  ;;  %v2322_v0 = vmul.f32 %v3957_v27, %v3957_v27 }
 0x7a1   : > { %2334 = vadd.xlane.f32.xlu0 %v2333_v38  ;;  %v2299_v54 = vpop.xlane.xlu0 %2298 }
 0x7a2   : > { %v3969_v58 = vsub.f32 %v3929_v19, %v2308_v29  ;;  %v2309_v39 = vmul.f32 0.03125, %v2299_v54  ;;  %v2336_v56 = vsel %vm469_vm0, %v2322_v0, 0.0  ;;  %v2323_v57 = vmul.f32 %v3963_v23, %v3963_v23  ;;  %v2795_v54 = vld [vmem:[%s4144_s8] ss:$0 sm:$0xff] }
 0x7a3   : > { %2337 = vadd.xlane.f32.xlu1 %v2336_v56  ;;  %v2302_v60 = vpop.xlane.xlu1 %2301 }
 0x7a4   : > { %v3975_v46 = vsub.f32 %v3926_v36, %v2309_v39  ;;  %v2310_v51 = vmul.f32 0.03125, %v2302_v60  ;;  %v2339_v63 = vsel %vm469_vm0, %v2323_v57, 0.0  ;;  %v2324_v1 = vmul.f32 %v3969_v58, %v3969_v58 }
 0x7a5   : > { %2340 = vadd.xlane.f32.xlu0 %v2339_v63 }
 0x7a6   : > { %v3981_v3 = vsub.f32 %v3934_v53, %v2310_v51  ;;  %v2342_v59 = vsel %vm469_vm0, %v2324_v1, 0.0  ;;  %v2325_v20 = vmul.f32 %v3975_v46, %v3975_v46 }
 0x7a7   : > { %2343 = vadd.xlane.f32.xlu1 %v2342_v59 }
 0x7a8   : > { %v2345_v9 = vsel %vm469_vm0, %v2325_v20, 0.0  ;;  %v2326_v10 = vmul.f32 %v3981_v3, %v3981_v3 }
 0x7a9   : > { %2346 = vadd.xlane.f32.xlu0 %v2345_v9 }
 0x7aa   : > { %v2348_v62 = vsel %vm469_vm0, %v2326_v10, 0.0 }
 0x7ab   : > { %2349 = vadd.xlane.f32.xlu1 %v2348_v62 }
 0x82a   : > { %v2329_v15 = vpop.xlane.xlu0 %2328 }
 0x82b   : > { %v2351_v33 = vmul.f32 0.03125, %v2329_v15 }
 0x82c   : > { %v2332_v32 = vpop.xlane.xlu1 %2331 }
 0x82d   : > { %v2359_v31 = vadd.f32 1e-05, %v2351_v33  ;;  %v2352_v34 = vmul.f32 0.03125, %v2332_v32 }
 0x82e   : > { %v2335_v35 = vpop.xlane.xlu0 %2334 }
 0x82f   : > { %3142 = vrsqrt.f32 %v2359_v31  ;;  %v2360_v17 = vadd.f32 1e-05, %v2352_v34  ;;  %v2353_v25 = vmul.f32 0.03125, %v2335_v35 }
 0x830   : > { %v2338_v13 = vpop.xlane.xlu1 %2337 }
 0x831   : > { %3144 = vrsqrt.f32 %v2360_v17  ;;  %v2361_v55 = vadd.f32 1e-05, %v2353_v25  ;;  %v2354_v49 = vmul.f32 0.03125, %v2338_v13  ;;  %v3092_v17 = vld [vmem:[%s4147_s11 + $0x10] sm:$0xff]   ;;  %v3093_v25 = vld [vmem:[%s4147_s11 + $0x18] sm:$0xff]  }
 0x832   : > { %v2341_v26 = vpop.xlane.xlu0 %2340  ;;  %3010 = vmatprep.subr.bf16.mxu0 %v3092_v17  ;;  %v2796_v13 = vld [vmem:[%s4146_s10] ss:$0 sm:$0xff] }
 0x833   : > { %3146 = vrsqrt.f32 %v2361_v55  ;;  %v2362_v37 = vadd.f32 1e-05, %v2354_v49  ;;  %v2355_v40 = vmul.f32 0.03125, %v2341_v26  ;;  %3011 = vmatpush3.bf16.msra.mxu0 %v3092_v17 }
 0x834   : > { %v2344_v28 = vpop.xlane.xlu1 %2343  ;;  %3012 = vmatprep.subr.bf16.mxu0 %v3093_v25 }
 0x835   : > { %3148 = vrsqrt.f32 %v2362_v37  ;;  %v2363_v42 = vadd.f32 1e-05, %v2355_v40  ;;  %v2356_v52 = vmul.f32 0.03125, %v2344_v28 }
 0x836   : > { %v2347_v24 = vpop.xlane.xlu0 %2346 }
 0x837   : > { %3150 = vrsqrt.f32 %v2363_v42  ;;  %v2364_v44 = vadd.f32 1e-05, %v2356_v52  ;;  %v2357_v45 = vmul.f32 0.03125, %v2347_v24  ;;  %3013 = vmatpush3.bf16.msra.mxu0 %v3093_v25 }
 0x838   : > { %v2350_v47 = vpop.xlane.xlu1 %2349 }
 0x839   : > { %v3143_v30 = vpop.eup %3142  ;;  %3152 = vrsqrt.f32 %v2364_v44  ;;  %v2365_v8 = vadd.f32 1e-05, %v2357_v45  ;;  %v2358_v50 = vmul.f32 0.03125, %v2350_v47 }
 0x83a   : > { %v2375_v22 = vmul.f32 %v3143_v30, %v3943_v41 }
 0x83b   : > { %v3145_v16 = vpop.eup %3144  ;;  %3154 = vrsqrt.f32 %v2365_v8  ;;  %v2366_v48 = vadd.f32 1e-05, %v2358_v50 }
 0x83c   : > { %v2376_v29 = vmul.f32 %v3145_v16, %v3946_v43  ;;  %v2389_v38 = vmul.f32 %v2794_v14, %v2375_v22 }
 0x83d   : > { %v3147_v0 = vpop.eup %3146  ;;  %3156 = vrsqrt.f32 %v2366_v48 }
 0x83e   : > { %v2377_v39 = vmul.f32 %v3147_v0, %v3951_v7  ;;  %v2390_v56 = vmul.f32 %v2794_v14, %v2376_v29  ;;  %v4012_v41 = vadd.f32 %v2795_v54, %v2389_v38 }
 0x83f   : > { %v3149_v57 = vpop.eup %3148 }
 0x840   : > { %v2391_v60 = vmul.f32 %v2794_v14, %v2377_v39  ;;  %v2378_v51 = vmul.f32 %v3149_v57, %v3957_v27  ;;  %v4014_v63 = vadd.f32 %v2795_v54, %v2390_v56 }
 0x841   : > { %v3151_v1 = vpop.eup %3150 }
 0x842   : > { %v2392_v43 = vmul.f32 %v2794_v14, %v2378_v51  ;;  %v2379_v59 = vmul.f32 %v3151_v1, %v3963_v23  ;;  %v2411_v20 = vpack.c.bf16 %v4014_v63, %v4012_v41  ;;  %v4021_v7 = vadd.f32 %v2795_v54, %v2391_v60  ;;  %v2803_v1 = vld [vmem:[%s4148_s12] ss:$0 sm:$0xff] }
 0x843   : > { %v3153_v9 = vpop.eup %3152 }
 0x844   : > { %v2380_v10 = vmul.f32 %v3153_v9, %v3969_v58  ;;  %2998 = vmatprep.mubr.msk.bf16.mxu1 %vm469_vm0, %v2411_v20  ;;  %v4023_v62 = vadd.f32 %v2795_v54, %v2392_v43  ;;  %v2393_v27 = vmul.f32 %v2794_v14, %v2379_v59  ;;  %v2646_v20 = vadd.f32 %v4021_v7, %v3906_v2 }
 0x845   : > { %v3155_v21 = vpop.eup %3154 }
 0x846   : > { %v2381_v18 = vmul.f32 %v3155_v21, %v3975_v46  ;;  %v2412_v11 = vpack.c.bf16 %v4023_v62, %v4021_v7  ;;  %v2394_v23 = vmul.f32 %v2794_v14, %v2380_v10  ;;  %v4030_v58 = vadd.f32 %v2795_v54, %v2393_v27 }
 0x847   : > { %v3157_v12 = vpop.eup %3156  ;;  %v2644_v27 = vadd.f32 %v4012_v41, %v3903_v61 }
 0x848   : > { %v2382_v15 = vmul.f32 %v3157_v12, %v3981_v3  ;;  %2999 = vmatmul.mubr.msk.bf16.vlgmr.msra.gmra.mrb[40].mxu1 %vm469_vm0, %v2412_v11  ;;  %v4032_v33 = vadd.f32 %v2795_v54, %v2394_v23  ;;  %v2395_v32 = vmul.f32 %v2794_v14, %v2381_v18  ;;  %v2647_v23 = vadd.f32 %v4023_v62, %v3914_v4 }
 0x849   : > { %v2648_v62 = vadd.f32 %v4030_v58, %v3921_v6 }
 0x84a   : > { %v2413_v31 = vpack.c.bf16 %v4032_v33, %v4030_v58  ;;  %v2396_v34 = vmul.f32 %v2794_v14, %v2382_v15  ;;  %v4037_v46 = vadd.f32 %v2795_v54, %v2395_v32 }
 0x84c   : > { %3002 = vmatprep.mubr.msk.bf16.mxu1 %vm469_vm0, %v2413_v31  ;;  %v4039_v35 = vadd.f32 %v2795_v54, %v2396_v34  ;;  %v2645_v31 = vadd.f32 %v4014_v63, %v3909_v5  ;;  %v2650_v7 = vadd.f32 %v4037_v46, %v3926_v36 }
 0x84e   : > { %v2414_v3 = vpack.c.bf16 %v4039_v35, %v4037_v46  ;;  %v2651_v25 = vadd.f32 %v4039_v35, %v3934_v53 }
 0x850   : > { %3003 = vmatmul.mubr.msk.bf16.gmra.mrb[44].mxu1 %vm469_vm0, %v2414_v3 }
 0x91b   : > { %v3000_v55 = vpop.f32.mrb[40].mxu1 }
 0x91c   : > { %v2493_v49 = vadd.f32 %v3000_v55, %v2796_v13  ;;  %v2484_v26 = vpop.f32.mrb[41].mxu1  ;;  %v2649_v55 = vadd.f32 %v4032_v33, %v3929_v19 }
 0x91d   : > { %v2485_v37 = vadd.f32 %v2796_v13, %v2484_v26  ;;  %v3001_v40 = vpop.f32.mrb[42].mxu1 }
 0x91e   : > { %v2496_v28 = vadd.f32 %v3001_v40, %v2796_v13  ;;  %v2487_v42 = vpop.f32.mrb[43].mxu1  ;;  %v2517_v24 = vmax.f32 %v2493_v49, 0.0 }
 0x91f   : > { %v2488_v52 = vadd.f32 %v2796_v13, %v2487_v42  ;;  %v2515_v45 = vmax.f32 %v2485_v37, 0.0 }
 0x920   : > { %v2518_v44 = vmax.f32 %v2496_v28, 0.0 }
 0x921   : > { %v2516_v47 = vmax.f32 %v2488_v52, 0.0 }
 0x922   : > { %v2524_v30 = vpack.c.bf16 %v2518_v44, %v2517_v24 }
 0x923   : > { %v2523_v14 = vpack.c.bf16 %v2516_v47, %v2515_v45  ;;  %v3004_v8 = vpop.f32.mrb[44].mxu1 }
 0x924   : > { %v2509_v50 = vadd.f32 %v3004_v8, %v2796_v13  ;;  %v2500_v22 = vpop.f32.mrb[45].mxu1 }
 0x925   : > { %v2501_v16 = vadd.f32 %v2796_v13, %v2500_v22  ;;  %v3005_v48 = vpop.f32.mrb[46].mxu1  ;;  %3014 = vmatprep.mubr.msk.bf16.mxu0 %vm2566_vm4, %v2523_v14 }
 0x926   : > { %v2512_v29 = vadd.f32 %v3005_v48, %v2796_v13  ;;  %v2503_v38 = vpop.f32.mrb[47].mxu1  ;;  %3015 = vmatmul.mubr.msk.bf16.vlgmr.msra.gmra.mrb[40].mxu0 %vm2566_vm4, %v2524_v30  ;;  %v2521_v54 = vmax.f32 %v2509_v50, 0.0 }
 0x927   : > { %v2504_v0 = vadd.f32 %v2796_v13, %v2503_v38  ;;  %v2519_v56 = vmax.f32 %v2501_v16, 0.0 }
 0x928   : > { %v2522_v39 = vmax.f32 %v2512_v29, 0.0 }
 0x929   : > { %v2520_v57 = vmax.f32 %v2504_v0, 0.0 }
 0x92a   : > { %v2526_v60 = vpack.c.bf16 %v2522_v39, %v2521_v54 }
 0x92b   : > { %v2525_v51 = vpack.c.bf16 %v2520_v57, %v2519_v56 }
 0x92d   : > { %3018 = vmatprep.mubr.msk.bf16.mxu0 %vm2566_vm4, %v2525_v51 }
 0x92e   : > { %3019 = vmatmul.mubr.msk.bf16.gmra.mrb[44].mxu0 %vm2566_vm4, %v2526_v60 }
 0x9f9   : > { %v3016_v43 = vpop.f32.mrb[40].mxu0 }
 0x9fa   : > { %v2622_v59 = vadd.f32 %v3016_v43, %v2803_v1  ;;  %v2613_v9 = vpop.f32.mrb[41].mxu0 }
 0x9fb   : > { %v2614_v10 = vadd.f32 %v2803_v1, %v2613_v9  ;;  %v3017_v21 = vpop.f32.mrb[42].mxu0 }
 0x9fc   : > { %v2654_v18 = vadd.f32 %v2646_v20, %v2622_v59  ;;  %v2625_v11 = vadd.f32 %v3017_v21, %v2803_v1  ;;  %v2616_v12 = vpop.f32.mrb[43].mxu0 }
 0x9fd   : > { %v2652_v15 = vadd.f32 %v2644_v27, %v2614_v10  ;;  %v2617_v32 = vadd.f32 %v2803_v1, %v2616_v12 }
 0x9fe   : > { %2662 = vst.msk [vmem:[%s457_s16 + $0x10] sm:$0xff] %vm469_vm0, %v2654_v18  ;;  %v2655_v2 = vadd.f32 %v2647_v23, %v2625_v11 }
 0x9ff   : > { %2660 = vst.msk [vmem:[%s457_s16] sm:$0xff] %vm469_vm0, %v2652_v15  ;;  %v2653_v61 = vadd.f32 %v2645_v31, %v2617_v32 }
 0xa00   : > { %2663 = vst.msk [vmem:[%s457_s16 + $0x18] sm:$0xff] %vm469_vm0, %v2655_v2 }
 0xa01   : > { %2661 = vst.msk [vmem:[%s457_s16 + $0x8] sm:$0xff] %vm469_vm0, %v2653_v61  ;;  %v3020_v4 = vpop.f32.mrb[44].mxu0 }
 0xa02   : > { %v2638_v41 = vadd.f32 %v3020_v4, %v2803_v1  ;;  %v2629_v5 = vpop.f32.mrb[45].mxu0 }
 0xa03   : > { %v2630_v63 = vadd.f32 %v2803_v1, %v2629_v5  ;;  %v3021_v34 = vpop.f32.mrb[46].mxu0 }
 0xa04   : > { %v2658_v3 = vadd.f32 %v2650_v7, %v2638_v41  ;;  %v2641_v17 = vadd.f32 %v3021_v34, %v2803_v1  ;;  %v2632_v13 = vpop.f32.mrb[47].mxu0 }
 0xa05   : > { %v2656_v36 = vadd.f32 %v2648_v62, %v2630_v63  ;;  %v2633_v46 = vadd.f32 %v2803_v1, %v2632_v13 }
 0xa06   : > { %2666 = vst.msk [vmem:[%s457_s16 + $0x30] sm:$0xff] %vm469_vm0, %v2658_v3  ;;  %v2659_v6 = vadd.f32 %v2651_v25, %v2641_v17 }
 0xa07   : > { %2664 = vst.msk [vmem:[%s457_s16 + $0x20] sm:$0xff] %vm469_vm0, %v2656_v36  ;;  %v2657_v53 = vadd.f32 %v2649_v55, %v2633_v46 }
 0xa08   : > { %2667 = vst.msk [vmem:[%s457_s16 + $0x38] sm:$0xff] %vm469_vm0, %v2659_v6 }
 0xa09   : > { %2665 = vst.msk [vmem:[%s457_s16 + $0x28] sm:$0xff] %vm469_vm0, %v2657_v53 }
 0xa0a   : > { %3209 = shalt.err (!%p3206_p3)
}
 0xa0b   : > { %s3210_s24 = scalar_lea.hbm %s4089_s14, 1024  ;;  %s3214_s29 = scalar_lea.hbm %s4149_s13, 2048 }
 0xa0c   : > { %p3211_p5 = scmp.ne.s32.totalorder %s4089_s14, %s3210_s24  ;;  %p3215_p9 = scmp.lt.u32.totalorder %s4089_s14, %s4149_s13 }
 0xa0d   : > { %p3216_p0 = scmp.lt.u32.totalorder %s3214_s29, %s3210_s24  ;;  %p3218_p6 = scmp.lt.u32.totalorder %s3210_s24, %s4089_s14 }
 0xa0e   : > { %p3212_p7 = pnand %p3211_p5, %p4165_p11 }
 0xa0f   : > { %p3217_p2 = por %p3216_p0, %p3215_p9 }
 0xa10   : > { %p3213_p8 = pneg %p3212_p7 }
 0xa11   : > { %p3219_p12 = por %p3218_p6, %p3217_p2 }
 0xa13   : > { %p3220_p13 = pnand %p3219_p12, %p3213_p8 }
 0xa15   : > { %3223 = shalt.err (!%p3220_p13)
}
 0xa16   : > { %s3275_s19 = smov 128   ;;  %s3276_s15 = smov 256  }
 0xa17   : > { %s3277_s30 = smov 8  }
 0xa18   : > { %3028 = dma.vmem_to_hbm [thread:$0]  (%p4165_p11), %s4081_s25, 1024, %s4089_s14, %s2669_s17, %s3275_s19, %s3276_s15, %s3277_s30  }
 0xa19 PF: > { %s4166_s16 = sld [smem:[#allocation8_spill]]  ;;  %p4167_p4 = scmp.ne.s32.totalorder %s4162_s21, 0 }
 0xa1a   : > { %p4168_p10 = scmp.ge.s32.totalorder %s3262_s28, 2 }
 0xa1c   : > { %p3035_p1 = pnand %p4168_p10, %p4167_p4 }
 0xa1f   : > { %s2696_s18 = sand.u32 1, %s4166_s16  }
 0xa20   : > { %s2697_s24 = scalar_lea.sflag [#allocation4], %s2696_s18 }
 0xa21   : > { %3245 = dma.done.wait (!%p3035_p1), %s2697_s24, 1024  }
 0xa22   : > { %3247 = vsyncadd (!%p3035_p1), %s2697_s24, 4294966272  ;;  %s4169_s28 = sld [smem:[#allocation10_spill]]  ;;  %s4170_s29 = sld [smem:[#allocation9_spill]] }
 0xa23   : > { %s4171_s27 = sld [smem:[#allocation11_spill]]  ;;  %s4172_s25 = smov %s3254_s26 }
 0xa28   : > { %p26_p3 = scmp.ge.s32.totalorder %s4169_s28, 4   ;;  %s4173_s26 = smov %s4170_s29 }
 0xa2a   :  { %28 = sbr.rel (!%p26_p3) target bundleno = 5 (0x5), region = 117 }
 0xa31   :  { %2702 = vsyncpa [#allocation3], 1 }
 0xa32   :  { %2704 = vsyncpa [#allocation3 + $0x1], 1 }
 0xa33   :  { %2705 = vsyncpa [#allocation4], 1 }
 0xa34   :  { %2707 = vsyncpa [#allocation4 + $0x1], 1 }

// kernel: tpu_custom_call.1
= control target key start
LH: loop header
LB: loop body
LE: loop exit
PB: predicated region body
PF: predicated region fallthrough
CT: control target
= control target key end

     0   :  { %18 = vsyncpa [#allocation3], 0  ;;  %s4136_s0 = inlined_call_operand.hbm [shape: f32[8,16,32], index: 0, kind: input, shape index: {}]   ;;  %s4137_s1 = inlined_call_operand.vmem [shape: f32[1,32], index: 1, kind: input, shape index: {}]   ;;  %s4138_s2 = inlined_call_operand.vmem [shape: f32[1,32], index: 2, kind: input, shape index: {}]   ;;  %s4139_s3 = inlined_call_operand.vmem [shape: bf16[32,96], index: 3, kind: input, shape index: {}]   ;;  %s4140_s4 = inlined_call_operand.vmem [shape: f32[1,96], index: 4, kind: input, shape index: {}]   ;;  %s4141_s5 = inlined_call_operand.vmem [shape: bf16[32,32], index: 5, kind: input, shape index: {}]   ;;  %s4142_s6 = inlined_call_operand.vmem [shape: f32[1,32], index: 6, kind: input, shape index: {}]   ;;  %s4143_s7 = inlined_call_operand.vmem [shape: f32[1,32], index: 7, kind: input, shape index: {}]   ;;  %s4144_s8 = inlined_call_operand.vmem [shape: f32[1,32], index: 8, kind: input, shape index: {}]   ;;  %s4145_s9 = inlined_call_operand.vmem [shape: bf16[32,64], index: 9, kind: input, shape index: {}]   ;;  %s4146_s10 = inlined_call_operand.vmem [shape: f32[1,64], index: 10, kind: input, shape index: {}]   ;;  %s4147_s11 = inlined_call_operand.vmem [shape: bf16[64,32], index: 11, kind: input, shape index: {}]   ;;  %s4148_s12 = inlined_call_operand.vmem [shape: f32[1,32], index: 12, kind: input, shape index: {}]   ;;  %s4149_s13 = inlined_call_operand.hbm [shape: f32[8,16,32], index: 13, kind: output, shape index: {}]  }
   0x1   :  { %20 = vsyncpa [#allocation3 + $0x1], 0 }
   0x2   :  { %21 = vsyncpa [#allocation4], 0 }
   0x3   :  { %23 = vsyncpa [#allocation4 + $0x1], 0  ;;  %s3348_s25 = smov 0   ;;  %s3350_s26 = smov 0  }
   0x4   :  { %s3352_s27 = smov 0   ;;  %s3354_s28 = smov 0  }
   0x5 LB: > { %4155 = sst [smem:[#allocation8_spill]] %s3250_s25  ;;  %s3369_s29 = sadd.s32 4294967295, %s3262_s28   ;;  %s3262_s28 = sphi %s3354_s28, %s4169_s28   ;;  %s3258_s27 = sphi %s3352_s27, %s4171_s27   ;;  %s3254_s26 = sphi %s3350_s26, %s4173_s26   ;;  %s3250_s25 = sphi %s3348_s25, %s4172_s25  }
   0x6   : > { %4156 = sst [smem:[#allocation9_spill]] %s3258_s27  ;;  %s2754_s30 = sadd.s32 4294967294, %s3262_s28  }
   0x7   : > { %s3373_s14 = sadd.s32 1, %s3262_s28   ;;  %s36_s15 = sadd.s32 1, %s3258_s27 }
   0x8   : > { %4157 = sst [smem:[#allocation10_spill]] %s3373_s14  ;;  %s33_s16 = ssub.s32 %s3262_s28, %s3373_s14 }
   0x9   : > { %p43_p0 = scmp.ne.s32.totalorder %s3258_s27, %s3254_s26  ;;  %p34_p1 = scmp.eq.s32.totalorder %s33_s16, 0 }
   0xa   : > { %p44_p2 = scmp.eq.s32.totalorder %s3262_s28, 0  ;;  %p49_p3 = scmp.ne.s32.totalorder %s3254_s26, %s3250_s25 }
   0xb   : > { %p50_p4 = scmp.eq.s32.totalorder %s3369_s29, 0  ;;  %p325_p7 = scmp.eq.s32.totalorder %s3369_s29, 1 }
   0xc   : > { %s3385_s17 = scalar_select %p34_p1, %s3258_s27, %s36_s15  }
   0xd   : > { %p3387_p5 = por %p44_p2, %p43_p0  ;;  %p3391_p6 = por %p50_p4, %p49_p3 }
   0xe   : > { %4158 = sst [smem:[#allocation11_spill]] %s3385_s17  ;;  %p331_p8 = scmp.eq.s32.totalorder %s2754_s30, 1 }
   0xf   : > { %p3038_p10 = scmp.lt.s32.totalorder %s3262_s28, 2  ;;  %p3398_p11 = por %p325_p7, %p43_p0 }
  0x10   : > { %p3402_p12 = por %p331_p8, %p49_p3  ;;  %s387_s22 = sand.u32 1, %s3258_s27  }
  0x11   : > { %s4161_s20 = scalar_select %p3398_p11, 1, 0 }
  0x12   : > { %s4162_s21 = scalar_select %p3402_p12, 1, 0 }
  0x13   : > { %s2758_s23 = sshll.u32 %s3262_s28, 7  ;;  %s2757_s24 = sshll.u32 %s387_s22, 6 }
  0x14   : > { %s3411_s17 = scalar_lea.hbm %s4136_s0, %s2758_s23  ;;  %s391_s30 = scalar_lea.vmem [#allocation2], %s2757_s24 }
  0x15   : > { %s397_s14 = sshll.u32 %s391_s30, 4  ;;  %p3415_p13 = pnand %p3038_p10, %p3387_p5  ;;  %s3419_s14 = int_to_ptr.vmem [resolvable:$true] %s397_s14 }
  0x16   : > { %s3422_s27 = scalar_lea.sflag [#allocation3], %s387_s22  ;;  %s3166_s23 = scalar_lea.hbm %s3411_s17, 1024 }
  0x17   : > { %p3167_p1 = scmp.ne.s32.totalorder %s3411_s17, %s3166_s23  ;;  %p3168_p2 = pneg %p3415_p13 }
  0x18   : > { %s3171_s15 = scalar_lea.hbm %s4136_s0, 2048  ;;  %p3172_p5 = scmp.lt.u32.totalorder %s3411_s17, %s4136_s0 }
  0x19   : > { %p3169_p3 = pnand %p3168_p2, %p3167_p1  ;;  %p3173_p7 = scmp.lt.u32.totalorder %s3171_s15, %s3166_s23 }
  0x1a   : > { %p3175_p10 = scmp.lt.u32.totalorder %s3166_s23, %s3411_s17 }
  0x1b   : > { %p3170_p4 = pneg %p3169_p3  ;;  %p3174_p8 = por %p3173_p7, %p3172_p5 }
  0x1d   : > { %p3176_p9 = por %p3175_p10, %p3174_p8 }
  0x1f   : > { %p3177_p0 = pnand %p3176_p9, %p3170_p4 }
  0x21   : > { %3180 = shalt.err (!%p3177_p0)
}
  0x22   : > { %s3181_s22 = scalar_lea.vmem %s3419_s14, 1024  ;;  %s3264_s18 = smov [#allocation2]  }
  0x23   : > { %p3182_p1 = scmp.ne.s32.totalorder %s3419_s14, %s3181_s22  ;;  %s3186_s24 = sshll.u32 %s3264_s18, 4  ;;  %s3187_s24 = int_to_ptr.vmem [resolvable:$false] %s3186_s24 }
  0x24   : > { %s3188_s16 = scalar_lea.vmem %s3187_s24, 2048  ;;  %p3189_p11 = scmp.lt.s32.totalorder %s3419_s14, %s3187_s24 }
  0x25   : > { %p3184_p3 = pnand %p3182_p1, %p3168_p2  ;;  %p3190_p5 = scmp.lt.s32.totalorder %s3188_s16, %s3181_s22 }
  0x27   : > { %p3185_p12 = pneg %p3184_p3  ;;  %p3191_p7 = por %p3190_p5, %p3189_p11 }
  0x29   : > { %p3192_p8 = pnand %p3191_p7, %p3185_p12 }
  0x2b   : > { %3195 = shalt.err (!%p3192_p8)
}
  0x2c   : > { %s3265_s23 = smov 256   ;;  %s3266_s15 = smov 128  }
  0x2d   : > { %s3267_s30 = smov 8   ;;  %p405_p9 = scmp.lt.s32.totalorder %s3262_s28, 3 }
  0x2e   : > { %3033 = dma.hbm_to_vmem [thread:$0]  (!%p3415_p13), %s3411_s17, 1024, %s3419_s14, %s3422_s27, %s3265_s23, %s3266_s15, %s3267_s30  }
  0x2f   : > { %p4164_p0 = scmp.ge.s32.totalorder %s3262_s28, 1 }
  0x31   : > { %p406_p2 = pnand %p4164_p0, %p405_p9 }
  0x32   : > { %s3454_s22 = sand.u32 (!%p406_p2), 1, %s3254_s26  }
  0x33   : > { %409 = sbr.rel (%p406_p2) target bundleno = 2585 (0xa19), region = 72  ;;  %s2760_s18 = sshll.u32 (!%p406_p2), %s3454_s22, 6 }
  0x34   : > { %s412_s24 = scalar_lea.sflag (!%p406_p2), [#allocation3], %s3454_s22  ;;  %s3460_s16 = scalar_lea.vmem (!%p406_p2), [#allocation2], %s2760_s18 }
  0x3a   : > { %3241 = dma.done.wait (%p3391_p6), %s412_s24, 1024  }
  0x3b   : > { %3243 = vsyncadd (%p3391_p6), %s412_s24, 4294966272  ;;  %vm469_vm0 = vcmask 261120   ;;  %v459_v0 = vld [vmem:[%s3460_s16] sm:$0xff]  ;;  %v460_v2 = vld [vmem:[%s3460_s16 + $0x8] sm:$0xff]  ;;  %s3269_s27 = smov 96   ;;  %s3270_s14 = smov 64  }
  0x3c   : > { %v463_v1 = vld [vmem:[%s3460_s16 + $0x20] sm:$0xff]  ;;  %v470_v3 = vsel %vm469_vm0, %v459_v0, 0.0  ;;  %v464_v5 = vld [vmem:[%s3460_s16 + $0x28] sm:$0xff]  ;;  %v461_v6 = vld [vmem:[%s3460_s16 + $0x10] sm:$0xff]  ;;  %v473_v8 = vsel %vm469_vm0, %v460_v2, 0.0  ;;  %vm3272_vm1 = vmmov 0  }
  0x3d   : > { %v482_v4 = vsel %vm469_vm0, %v463_v1, 0.0  ;;  %v462_v7 = vld [vmem:[%s3460_s16 + $0x18] sm:$0xff]  ;;  %471 = vadd.xlane.f32.xlu0 %v470_v3  ;;  %v485_v9 = vsel %vm469_vm0, %v464_v5, 0.0  ;;  %v476_v10 = vsel %vm469_vm0, %v461_v6, 0.0  ;;  %v465_v12 = vld [vmem:[%s3460_s16 + $0x30] sm:$0xff]  ;;  %v3084_v56 = vld [vmem:[%s4139_s3] sm:$0xff]  }
  0x3e   : > { %483 = vadd.xlane.f32.xlu1 %v482_v4  ;;  %v479_v11 = vsel %vm469_vm0, %v462_v7, 0.0  ;;  %v466_v13 = vld [vmem:[%s3460_s16 + $0x38] sm:$0xff]  ;;  %v488_v14 = vsel %vm469_vm0, %v465_v12, 0.0  ;;  %2874 = vmatprep.subr.bf16.mxu0 %v3084_v56  ;;  %v3085_v57 = vld [vmem:[%s4139_s3 + $0x8] sm:$0xff]   ;;  %vm1563_vm2 = vcmask 64512   ;;  %vm1663_vm3 = vcmask 1043456  }
  0x3f   : > { %v491_v15 = vsel %vm469_vm0, %v466_v13, 0.0  ;;  %3022 = vmatprep.subr.bf16.mxu1 %v3084_v56  ;;  %2875 = vmatpush3.bf16.msra.mxu0 %v3084_v56  ;;  %vm2566_vm4 = vcmask 523264   ;;  %s2669_s17 = scalar_lea.sflag [#allocation4], %s3454_s22  ;;  %p4165_p11 = scmp.ne.s32.totalorder %s4161_s20, 0 }
  0x40   : > { %3024 = vmatpush3.bf16.msra.mxu1 %v3084_v56  ;;  %2876 = vmatprep.subr.bf16.mxu0 %v3085_v57  ;;  %s3274_s23 = smov [#allocation5]  }
  0x41   : > { %474 = vadd.xlane.f32.xlu0 %v473_v8  ;;  %3023 = vmatprep.subr.bf16.mxu1 %v3085_v57  ;;  %s3200_s15 = sshll.u32 %s3274_s23, 4  ;;  %s3201_s15 = int_to_ptr.vmem [resolvable:$false] %s3200_s15 }
  0x42   : > { %486 = vadd.xlane.f32.xlu1 %v485_v9  ;;  %s3202_s30 = scalar_lea.vmem %s3201_s15, 2048 }
  0x43   : > { %2877 = vmatpush3.bf16.msra.mxu0 %v3085_v57 }
  0x44   : > { %3025 = vmatpush3.bf16.msra.mxu1 %v3085_v57 }
  0x45   : > { %477 = vadd.xlane.f32.xlu0 %v476_v10 }
  0x46   : > { %480 = vadd.xlane.f32.xlu1 %v479_v11 }
  0x49   : > { %489 = vadd.xlane.f32.xlu0 %v488_v14 }
  0x4a   : > { %492 = vadd.xlane.f32.xlu1 %v491_v15 }
  0xca   : > { %v472_v16 = vpop.xlane.xlu0 %471 }
  0xcb   : > { %v484_v17 = vpop.xlane.xlu1 %483  ;;  %v495_v18 = vmul.f32 0.03125, %v472_v16 }
  0xcc   : > { %v499_v19 = vmul.f32 0.03125, %v484_v17 }
  0xcd   : > { %v3482_v20 = vsub.f32 %v459_v0, %v495_v18 }
  0xce   : > { %v3484_v21 = vsub.f32 %v463_v1, %v499_v19  ;;  %v475_v22 = vpop.xlane.xlu0 %474  ;;  %v2762_v19 = vld [vmem:[%s4137_s1] ss:$0 sm:$0xff] }
  0xcf   : > { %v487_v23 = vpop.xlane.xlu1 %486  ;;  %v496_v24 = vmul.f32 0.03125, %v475_v22  ;;  %v511_v26 = vmul.f32 %v3482_v20, %v3482_v20 }
  0xd0   : > { %v500_v25 = vmul.f32 0.03125, %v487_v23  ;;  %v515_v27 = vmul.f32 %v3484_v21, %v3484_v21 }
  0xd1   : > { %v3490_v28 = vsub.f32 %v460_v2, %v496_v24  ;;  %v519_v30 = vsel %vm469_vm0, %v511_v26, 0.0 }
  0xd2   : > { %v3492_v29 = vsub.f32 %v464_v5, %v500_v25  ;;  %520 = vadd.xlane.f32.xlu0 %v519_v30  ;;  %v478_v31 = vpop.xlane.xlu0 %477  ;;  %v531_v33 = vsel %vm469_vm0, %v515_v27, 0.0  ;;  %v2763_v27 = vld [vmem:[%s4138_s2] ss:$0 sm:$0xff] }
  0xd3   : > { %v481_v32 = vpop.xlane.xlu1 %480  ;;  %v497_v34 = vmul.f32 0.03125, %v478_v31  ;;  %v512_v36 = vmul.f32 %v3490_v28, %v3490_v28 }
  0xd4   : > { %v498_v35 = vmul.f32 0.03125, %v481_v32  ;;  %v516_v37 = vmul.f32 %v3492_v29, %v3492_v29 }
  0xd5   : > { %v3500_v38 = vsub.f32 %v461_v6, %v497_v34  ;;  %v522_v40 = vsel %vm469_vm0, %v512_v36, 0.0 }
  0xd6   : > { %v3502_v39 = vsub.f32 %v462_v7, %v498_v35  ;;  %532 = vadd.xlane.f32.xlu0 %v531_v33  ;;  %523 = vadd.xlane.f32.xlu1 %v522_v40  ;;  %v490_v41 = vpop.xlane.xlu0 %489  ;;  %v534_v43 = vsel %vm469_vm0, %v516_v37, 0.0 }
  0xd7   : > { %v493_v42 = vpop.xlane.xlu1 %492  ;;  %v501_v44 = vmul.f32 0.03125, %v490_v41  ;;  %v513_v46 = vmul.f32 %v3500_v38, %v3500_v38 }
  0xd8   : > { %v502_v45 = vmul.f32 0.03125, %v493_v42  ;;  %v514_v47 = vmul.f32 %v3502_v39, %v3502_v39 }
  0xd9   : > { %v3510_v48 = vsub.f32 %v465_v12, %v501_v44  ;;  %v525_v50 = vsel %vm469_vm0, %v513_v46, 0.0 }
  0xda   : > { %v3512_v49 = vsub.f32 %v466_v13, %v502_v45  ;;  %535 = vadd.xlane.f32.xlu1 %v534_v43  ;;  %526 = vadd.xlane.f32.xlu0 %v525_v50  ;;  %v528_v51 = vsel %vm469_vm0, %v514_v47, 0.0 }
  0xdb   : > { %v517_v52 = vmul.f32 %v3510_v48, %v3510_v48 }
  0xdc   : > { %v518_v53 = vmul.f32 %v3512_v49, %v3512_v49 }
  0xdd   : > { %v537_v54 = vsel %vm469_vm0, %v517_v52, 0.0 }
  0xde   : > { %529 = vadd.xlane.f32.xlu1 %v528_v51  ;;  %538 = vadd.xlane.f32.xlu0 %v537_v54  ;;  %v540_v55 = vsel %vm469_vm0, %v518_v53, 0.0 }
  0xe2   : > { %541 = vadd.xlane.f32.xlu1 %v540_v55 }
 0x15f   : > { %v521_v58 = vpop.xlane.xlu0 %520 }
 0x160   : > { %v543_v59 = vmul.f32 0.03125, %v521_v58 }
 0x162   : > { %v551_v60 = vadd.f32 1e-05, %v543_v59  ;;  %v712_v59 = vlaneseq }
 0x163   : > { %v524_v61 = vpop.xlane.xlu1 %523  ;;  %v533_v62 = vpop.xlane.xlu0 %532 }
 0x164   : > { %3094 = vrsqrt.f32 %v551_v60  ;;  %v544_v63 = vmul.f32 0.03125, %v524_v61  ;;  %v547_v0 = vmul.f32 0.03125, %v533_v62  ;;  %v3549_v62 = vshrl.u32 %v712_v59, 7 }
 0x166   : > { %v552_v1 = vadd.f32 1e-05, %v544_v63  ;;  %v555_v2 = vadd.f32 1e-05, %v547_v0 }
 0x167   : > { %v536_v3 = vpop.xlane.xlu1 %535  ;;  %v527_v4 = vpop.xlane.xlu0 %526 }
 0x168   : > { %3096 = vrsqrt.f32 %v552_v1  ;;  %v548_v5 = vmul.f32 0.03125, %v536_v3  ;;  %v545_v6 = vmul.f32 0.03125, %v527_v4 }
 0x169   : > { %3098 = vrsqrt.f32 %v555_v2 }
 0x16a   : > { %v556_v7 = vadd.f32 1e-05, %v548_v5  ;;  %v553_v8 = vadd.f32 1e-05, %v545_v6 }
 0x16b   : > { %v530_v9 = vpop.xlane.xlu1 %529  ;;  %v539_v10 = vpop.xlane.xlu0 %538 }
 0x16c   : > { %3100 = vrsqrt.f32 %v556_v7  ;;  %v546_v11 = vmul.f32 0.03125, %v530_v9  ;;  %v549_v12 = vmul.f32 0.03125, %v539_v10 }
 0x16d   : > { %3102 = vrsqrt.f32 %v553_v8 }
 0x16e   : > { %v3095_v13 = vpop.eup %3094  ;;  %v554_v14 = vadd.f32 1e-05, %v546_v11  ;;  %v557_v15 = vadd.f32 1e-05, %v549_v12 }
 0x16f   : > { %v542_v16 = vpop.xlane.xlu1 %541  ;;  %v567_v17 = vmul.f32 %v3095_v13, %v3482_v20 }
 0x170   : > { %3104 = vrsqrt.f32 %v554_v14  ;;  %v550_v18 = vmul.f32 0.03125, %v542_v16 }
 0x171   : > { %3106 = vrsqrt.f32 %v557_v15  ;;  %v581_v26 = vmul.f32 %v2762_v19, %v567_v17 }
 0x172   : > { %v3097_v22 = vpop.eup %3096  ;;  %v558_v23 = vadd.f32 1e-05, %v550_v18 }
 0x173   : > { %v3099_v24 = vpop.eup %3098  ;;  %v568_v25 = vmul.f32 %v3097_v22, %v3490_v28  ;;  %v595_v33 = vadd.f32 %v2763_v27, %v581_v26 }
 0x174   : > { %3108 = vrsqrt.f32 %v558_v23  ;;  %v571_v20 = vmul.f32 %v3099_v24, %v3484_v21 }
 0x175   : > { %v582_v30 = vmul.f32 %v2762_v19, %v568_v25 }
 0x176   : > { %v3101_v31 = vpop.eup %3100  ;;  %v585_v36 = vmul.f32 %v2762_v19, %v571_v20 }
 0x177   : > { %v3103_v32 = vpop.eup %3102  ;;  %v596_v34 = vadd.f32 %v2763_v27, %v582_v30  ;;  %v572_v35 = vmul.f32 %v3101_v31, %v3492_v29  ;;  %v3271_v30 = vmov 0.0  }
 0x178   : > { %v569_v37 = vmul.f32 %v3103_v32, %v3500_v38  ;;  %v599_v44 = vadd.f32 %v2763_v27, %v585_v36  ;;  %2886 = vmatprep.subr.bf16.mxu1 %v3271_v30  ;;  %2898 = vmatprep.subr.bf16.mxu0 %v3271_v30 }
 0x179   : > { %v603_v40 = vpack.c.bf16 %v596_v34, %v595_v33  ;;  %v586_v28 = vmul.f32 %v2762_v19, %v572_v35 }
 0x17a   : > { %v3105_v41 = vpop.eup %3104  ;;  %v583_v45 = vmul.f32 %v2762_v19, %v569_v37 }
 0x17b   : > { %v3107_v42 = vpop.eup %3106  ;;  %v570_v43 = vmul.f32 %v3105_v41, %v3502_v39  ;;  %2878 = vmatprep.mubr.msk.bf16.mxu0 %vm469_vm0, %v603_v40  ;;  %v600_v21 = vadd.f32 %v2763_v27, %v586_v28  ;;  %v3273_v28 = vmov 1934713408  }
 0x17c   : > { %v573_v46 = vmul.f32 %v3107_v42, %v3510_v48  ;;  %v597_v38 = vadd.f32 %v2763_v27, %v583_v45  ;;  %v3268_v48 = vmov 1983009808   ;;  %v774_v41 = vunpack.c.l.s4 %v3273_v28 }
 0x17d   : > { %v605_v47 = vpack.c.bf16 %v600_v21, %v599_v44  ;;  %v584_v50 = vmul.f32 %v2762_v19, %v570_v43  ;;  %v710_v58 = vunpack.c.l.s4 %v3268_v48 }
 0x17e   : > { %v3109_v51 = vpop.eup %3108  ;;  %v587_v53 = vmul.f32 %v2762_v19, %v573_v46 }
 0x17f   : > { %v574_v29 = vmul.f32 %v3109_v51, %v3512_v49  ;;  %2882 = vmatprep.mubr.msk.bf16.mxu1 %vm469_vm0, %v605_v47  ;;  %v598_v52 = vadd.f32 %v2763_v27, %v584_v50  ;;  %v2764_v49 = vld [vmem:[%s4140_s4] ss:$0 sm:$0xff]  ;;  %v711_v61 = vunpack.c.0.s8 %v710_v58 }
 0x180   : > { %v601_v39 = vadd.f32 %v2763_v27, %v587_v53 }
 0x181   : > { %v604_v54 = vpack.c.bf16 %v598_v52, %v597_v38  ;;  %v588_v55 = vmul.f32 %v2762_v19, %v574_v29  ;;  %v3553_v7 = vsub.s32 %v711_v61, %v3549_v62  ;;  %v775_v38 = vunpack.c.0.s8 %v774_v41 }
 0x183   : > { %2879 = vmatmul.mubr.msk.bf16.vlgmr.msra.gmra.mrb[0].mxu0 %vm469_vm0, %v604_v54  ;;  %v602_v56 = vadd.f32 %v2763_v27, %v588_v55 }
 0x184   : > { %2900 = vmatprep.mubr.msk.bf16.mxu0 %vm3272_vm1, %v3271_v30 }
 0x185   : > { %v606_v57 = vpack.c.bf16 %v602_v56, %v601_v39 }
 0x187   : > { %2883 = vmatmul.mubr.msk.bf16.vlgmr.msra.gmra.mrb[0].mxu1 %vm469_vm0, %v606_v57 }
 0x188   : > { %2888 = vmatprep.mubr.msk.bf16.mxu1 %vm3272_vm1, %v3271_v30 }
 0x256   : > { %v2880_v60 = vpop.f32.mrb[0].mxu0 }
 0x257   : > { %v685_v63 = vadd.f32 %v2880_v60, %v2764_v49  ;;  %v676_v0 = vpop.f32.mrb[1].mxu0 }
 0x258   : > { %v677_v1 = vadd.f32 %v2764_v49, %v676_v0  ;;  %v2881_v2 = vpop.f32.mrb[2].mxu0  ;;  %v3623_v0 = vsub.s32 %v775_v38, %v3549_v62 }
 0x259   : > { %v688_v3 = vadd.f32 %v2881_v2, %v2764_v49  ;;  %863 = vrot.lane.b32.xlu1 %v685_v63, %s3269_s27  ;;  %v679_v4 = vpop.f32.mrb[3].mxu0 }
 0x25a   : > { %v707_v5 = vcombine.low %v677_v1, %v685_v63  ;;  %v708_v6 = vcombine.high %v677_v1, %v685_v63  ;;  %v680_v8 = vadd.f32 %v2764_v49, %v679_v4  ;;  %859 = vrot.lane.b32.xlu0 %v677_v1, %s3269_s27  ;;  %v2884_v9 = vpop.f32.mrb[0].mxu1 }
 0x25b   : > { %v692_v10 = vpop.f32.mrb[1].mxu1  ;;  %v3581_v26 = vadd.f32 %v2884_v9, %v2764_v49 }
 0x25c   : > { %v723_v11 = vcombine.low %v680_v8, %v688_v3  ;;  %v724_v12 = vcombine.high %v680_v8, %v688_v3  ;;  %v2885_v13 = vpop.f32.mrb[2].mxu1  ;;  %v3556_v14 = vadd.f32 %v2764_v49, %v692_v10  ;;  %v3560_v16 = vrot.slane %v707_v5, %v3553_v7 }
 0x25d   : > { %865 = vrot.lane.b32.xlu1 %v688_v3, %s3269_s27  ;;  %v695_v15 = vpop.f32.mrb[3].mxu1  ;;  %v3563_v17 = vrot.slane %v708_v6, %v3553_v7  ;;  %v3590_v20 = vadd.f32 %v2885_v13, %v2764_v49 }
 0x25e   : > { %v3566_v18 = vrot.slane %v723_v11, %v3553_v7  ;;  %v3569_v19 = vrot.slane %v724_v12, %v3553_v7  ;;  %867 = vrot.lane.b32.xlu0 %v3556_v14, %s3269_s27  ;;  %v3584_v27 = vadd.f32 %v2764_v49, %v695_v15  ;;  %v739_v44 = vcombine.low %v3556_v14, %v3581_v26 }
 0x25f   : > { %v740_v2 = vcombine.high %v3556_v14, %v3581_v26 }
 0x260   : > { %v771_v22 = vcombine.low %v3560_v16, %v3566_v18  ;;  %v772_v23 = vcombine.high %v3560_v16, %v3566_v18  ;;  %v787_v24 = vcombine.low %v3563_v17, %v3569_v19  ;;  %v788_v25 = vcombine.high %v3563_v17, %v3569_v19 }
 0x261   : > { %861 = vrot.lane.b32.xlu1 %v680_v8, %s3269_s27  ;;  %v755_v37 = vcombine.low %v3584_v27, %v3590_v20  ;;  %v747_v53 = vrot.slane %v739_v44, %v3553_v7  ;;  %v756_v39 = vcombine.high %v3584_v27, %v3590_v20 }
 0x262   : > { %871 = vrot.lane.b32.xlu0 %v3581_v26, %s3269_s27  ;;  %v3653_v28 = vrot.slane %v772_v23, %v3623_v0 }
 0x263   : > { %v763_v50 = vrot.slane %v755_v37, %v3553_v7  ;;  %v3628_v6 = vrot.slane %v756_v39, %v3553_v7 }
 0x265   : > { %869 = vrot.lane.b32.xlu1 %v3584_v27, %s3269_s27  ;;  %v803_v61 = vcombine.low %v747_v53, %v763_v50 }
 0x266   : > { %1027 = vrot.lane.b32.xlu0 %v677_v1, %s3270_s14 }
 0x269   : > { %873 = vrot.lane.b32.xlu1 %v3590_v20, %s3269_s27 }
 0x26d   : > { %1031 = vrot.lane.b32.xlu1 %v685_v63, %s3270_s14 }
 0x271   : > { %1033 = vrot.lane.b32.xlu1 %v688_v3, %s3270_s14 }
 0x275   : > { %1029 = vrot.lane.b32.xlu1 %v680_v8, %s3270_s14  ;;  %v804_v8 = vcombine.high %v747_v53, %v763_v50 }
 0x277   : > { %v3656_v41 = vrot.slane %v804_v8, %v3623_v0 }
 0x2cb   : > { %v864_v31 = vpop.permute.xlu1 %863 }
 0x2cc   : > { %v860_v32 = vpop.permute.xlu0 %859 }
 0x2cd   : > { %v883_v40 = vcombine.low %v860_v32, %v864_v31  ;;  %v884_v51 = vcombine.high %v860_v32, %v864_v31  ;;  %v811_v31 = vrot.slane %v803_v61, %v3623_v0  ;;  %v3640_v32 = vrot.slane %v740_v2, %v3553_v7 }
 0x2ce   : > { %v795_v2 = vrot.slane %v787_v24, %v3623_v0 }
 0x2cf   : > { %v866_v33 = vpop.permute.xlu1 %865  ;;  %v891_v29 = vrot.slane %v883_v40, %v3553_v7  ;;  %v898_v63 = vrot.slane %v884_v51, %v3553_v7 }
 0x2d0   : > { %v868_v34 = vpop.permute.xlu0 %867 }
 0x2d3   : > { %v862_v35 = vpop.permute.xlu1 %861 }
 0x2d4   : > { %v899_v36 = vcombine.low %v862_v35, %v866_v33  ;;  %v872_v42 = vpop.permute.xlu0 %871  ;;  %v900_v21 = vcombine.high %v862_v35, %v866_v33 }
 0x2d5   : > { %v915_v46 = vcombine.low %v868_v34, %v872_v42  ;;  %v916_v47 = vcombine.high %v868_v34, %v872_v42  ;;  %v819_v42 = vcombine.low %v3640_v32, %v3628_v6 }
 0x2d6   : > { %v907_v45 = vrot.slane %v899_v36, %v3553_v7  ;;  %v3615_v56 = vrot.slane %v900_v21, %v3553_v7  ;;  %v779_v36 = vrot.slane %v771_v22, %v3623_v0 }
 0x2d7   : > { %v870_v43 = vpop.permute.xlu1 %869  ;;  %v923_v58 = vrot.slane %v915_v46, %v3553_v7  ;;  %v930_v59 = vrot.slane %v916_v47, %v3553_v7 }
 0x2d8   : > { %v947_v57 = vcombine.low %v891_v29, %v907_v45  ;;  %v948_v48 = vcombine.high %v891_v29, %v907_v45  ;;  %v963_v9 = vcombine.low %v898_v63, %v3615_v56  ;;  %v1028_v33 = vpop.permute.xlu0 %1027  ;;  %v835_v46 = vcombine.low %v779_v36, %v811_v31 }
 0x2d9   : > { %v964_v29 = vcombine.high %v898_v63, %v3615_v56  ;;  %v836_v24 = vcombine.high %v779_v36, %v811_v31  ;;  %v802_v31 = vrot.slane %v788_v25, %v3623_v0 }
 0x2da   : > { %v955_v10 = vrot.slane %v947_v57, %v3623_v0  ;;  %v962_v11 = vrot.slane %v948_v48, %v3623_v0  ;;  %v3647_v37 = vrot.slane %v963_v9, %v3623_v0  ;;  %v843_v61 = vpack.c.bf16 %v835_v46, %v835_v46 }
 0x2db   : > { %v874_v52 = vpop.permute.xlu1 %873  ;;  %v820_v9 = vcombine.high %v3640_v32, %v3628_v6 }
 0x2dc   : > { %v931_v54 = vcombine.low %v870_v43, %v874_v52  ;;  %v932_v55 = vcombine.high %v870_v43, %v874_v52  ;;  %v837_v52 = vcombine.low %v3653_v28, %v3656_v41 }
 0x2de   : > { %v939_v49 = vrot.slane %v931_v54, %v3553_v7  ;;  %v946_v60 = vrot.slane %v932_v55, %v3553_v7  ;;  %v845_v63 = vpack.c.bf16 %v837_v52, %v837_v52 }
 0x2df   : > { %v1032_v1 = vpop.permute.xlu1 %1031 }
 0x2e0   : > { %v979_v3 = vcombine.low %v923_v58, %v939_v49  ;;  %v980_v4 = vcombine.high %v923_v58, %v939_v49  ;;  %v995_v5 = vcombine.low %v930_v59, %v946_v60  ;;  %v1051_v40 = vcombine.low %v1028_v33, %v1032_v1 }
 0x2e1   : > { %v1052_v43 = vcombine.high %v1028_v33, %v1032_v1  ;;  %v996_v22 = vcombine.high %v930_v59, %v946_v60  ;;  %v978_v60 = vrot.slane %v964_v29, %v3623_v0  ;;  %v827_v1 = vrot.slane %v819_v42, %v3623_v0 }
 0x2e2   : > { %v987_v62 = vrot.slane %v979_v3, %v3623_v0  ;;  %v994_v12 = vrot.slane %v980_v4, %v3623_v0  ;;  %v3636_v13 = vrot.slane %v995_v5, %v3623_v0  ;;  %v3666_v38 = vrot.slane %v1051_v40, %v3553_v7 }
 0x2e3   : > { %v1034_v15 = vpop.permute.xlu1 %1033  ;;  %v3671_v53 = vrot.slane %v1052_v43, %v3553_v7  ;;  %v1010_v39 = vrot.slane %v996_v22, %v3623_v0  ;;  %v834_v33 = vrot.slane %v820_v9, %v3623_v0  ;;  %v840_v40 = vcombine.high %v795_v2, %v827_v1 }
 0x2e4   : > { %v1011_v34 = vcombine.low %v955_v10, %v987_v62  ;;  %v1013_v35 = vcombine.low %v962_v11, %v994_v12  ;;  %v1012_v47 = vcombine.high %v955_v10, %v987_v62  ;;  %v1015_v50 = vcombine.low %v3647_v37, %v3636_v13 }
 0x2e5   : > { %v1014_v5 = vcombine.high %v962_v11, %v994_v12  ;;  %v1017_v8 = vcombine.low %v978_v60, %v1010_v39  ;;  %v839_v10 = vcombine.low %v795_v2, %v827_v1  ;;  %v844_v12 = vpack.c.bf16 %v836_v24, %v836_v24 }
 0x2e6   : > { %v1019_v44 = vpack.c.bf16 %v1011_v34, %v1011_v34  ;;  %v1021_v21 = vpack.c.bf16 %v1013_v35, %v1013_v35  ;;  %v1020_v56 = vpack.c.bf16 %v1012_v47, %v1012_v47  ;;  %v1023_v57 = vpack.c.bf16 %v1015_v50, %v1015_v50 }
 0x2e7   : > { %v1030_v45 = vpop.permute.xlu1 %1029  ;;  %v1022_v62 = vpack.c.bf16 %v1014_v5, %v1014_v5  ;;  %v1025_v11 = vpack.c.bf16 %v1017_v8, %v1017_v8  ;;  %v1016_v34 = vcombine.high %v3647_v37, %v3636_v13  ;;  %v838_v35 = vcombine.high %v3653_v28, %v3656_v41 }
 0x2e8   : > { %v1067_v51 = vcombine.low %v1030_v45, %v1034_v15  ;;  %v1068_v16 = vcombine.high %v1030_v45, %v1034_v15  ;;  %v1199_v18 = vsel %vm469_vm0, %v1019_v44, 0  ;;  %v1291_v23 = vsel %vm469_vm0, %v1021_v21, 0 }
 0x2e9   : > { %2887 = vmatpush3.bf16.xpose.msra.mxu1 %v1199_v18  ;;  %2899 = vmatpush3.bf16.xpose.msra.mxu0 %v1291_v23  ;;  %v1245_v3 = vsel %vm469_vm0, %v1020_v56, 0  ;;  %v1383_v4 = vsel %vm469_vm0, %v1023_v57, 0  ;;  %v847_v15 = vpack.c.bf16 %v839_v10, %v839_v10  ;;  %v1337_v6 = vsel %vm469_vm0, %v1022_v62, 0 }
 0x2ea   : > { %v3674_v54 = vrot.slane %v1067_v51, %v3553_v7  ;;  %v3677_v55 = vrot.slane %v1068_v16, %v3553_v7  ;;  %2892 = vmatprep.subr.bf16.mxu1 %v3271_v30  ;;  %2910 = vmatprep.subr.bf16.mxu0 %v3271_v30  ;;  %v1475_v32 = vsel %vm469_vm0, %v1025_v11, 0  ;;  %v841_v36 = vcombine.low %v802_v31, %v834_v33 }
 0x2eb   : > { %v1024_v17 = vpack.c.bf16 %v1016_v34, %v1016_v34  ;;  %v846_v19 = vpack.c.bf16 %v838_v35, %v838_v35  ;;  %v1018_v37 = vcombine.high %v978_v60, %v1010_v39  ;;  %v848_v41 = vpack.c.bf16 %v840_v40, %v840_v40 }
 0x2ec   : > { %v1115_v48 = vcombine.low %v3666_v38, %v3674_v54  ;;  %v1116_v58 = vcombine.high %v3666_v38, %v3674_v54  ;;  %v1131_v59 = vcombine.low %v3671_v53, %v3677_v55  ;;  %v1132_v49 = vcombine.high %v3671_v53, %v3677_v55 }
 0x2ed   : > { %v849_v25 = vpack.c.bf16 %v841_v36, %v841_v36  ;;  %v1429_v13 = vsel %vm469_vm0, %v1024_v17, 0  ;;  %v1026_v28 = vpack.c.bf16 %v1018_v37, %v1018_v37  ;;  %v842_v43 = vcombine.high %v802_v31, %v834_v33 }
 0x2ef   : > { %v1521_v42 = vsel %vm469_vm0, %v1026_v28, 0  ;;  %v850_v44 = vpack.c.bf16 %v842_v43, %v842_v43 }
 0x2f0   : > { %2889 = vmatmul.mubr.msk.bf16.vlgmr.msra.gmra.mrb[4].mxu1 %vm469_vm0, %v843_v61  ;;  %2901 = vmatmul.mubr.msk.bf16.vlgmr.msra.gmra.mrb[4].mxu0 %vm469_vm0, %v845_v63 }
 0x2f1   : > { %2893 = vmatpush3.bf16.xpose.msra.mxu1 %v1245_v3  ;;  %2911 = vmatpush3.bf16.xpose.msra.mxu0 %v1383_v4 }
 0x2f2   : > { %2894 = vmatprep.mubr.msk.bf16.mxu1 %vm3272_vm1, %v3271_v30  ;;  %2912 = vmatprep.mubr.msk.bf16.mxu0 %vm3272_vm1, %v3271_v30 }
 0x2f3   : > { %2904 = vmatprep.subr.bf16.mxu1 %v3271_v30  ;;  %2922 = vmatprep.subr.bf16.mxu0 %v3271_v30 }
 0x2f8   : > { %2895 = vmatmul.mubr.msk.bf16.vlgmr.msra.gmra.mrb[8].mxu1 %vm469_vm0, %v844_v12  ;;  %2913 = vmatmul.mubr.msk.bf16.vlgmr.msra.gmra.mrb[8].mxu0 %vm469_vm0, %v847_v15 }
 0x2f9   : > { %2905 = vmatpush3.bf16.xpose.msra.mxu1 %v1337_v6  ;;  %2923 = vmatpush3.bf16.xpose.msra.mxu0 %v1475_v32 }
 0x2fa   : > { %2906 = vmatprep.mubr.msk.bf16.mxu1 %vm3272_vm1, %v3271_v30  ;;  %2924 = vmatprep.mubr.msk.bf16.mxu0 %vm3272_vm1, %v3271_v30 }
 0x2fb   : > { %2916 = vmatprep.subr.bf16.mxu1 %v3271_v30  ;;  %2934 = vmatprep.subr.bf16.mxu0 %v3271_v30 }
 0x300   : > { %2907 = vmatmul.mubr.msk.bf16.vlgmr.msra.gmra.mrb[12].mxu1 %vm469_vm0, %v846_v19  ;;  %2925 = vmatmul.mubr.msk.bf16.vlgmr.msra.gmra.mrb[12].mxu0 %vm469_vm0, %v849_v25 }
 0x301   : > { %2917 = vmatpush3.bf16.xpose.msra.mxu1 %v1429_v13  ;;  %2918 = vmatprep.mubr.msk.bf16.mxu1 %vm3272_vm1, %v3271_v30 }
 0x302   : > { %2928 = vmatprep.subr.bf16.mxu1 %v3271_v30  ;;  %2936 = vmatprep.mubr.msk.bf16.mxu0 %vm3272_vm1, %v3271_v30 }
 0x308   : > { %2919 = vmatmul.mubr.msk.bf16.vlgmr.msra.gmra.mrb[16].mxu1 %vm469_vm0, %v848_v41 }
 0x309   : > { %2929 = vmatpush3.bf16.xpose.msra.mxu1 %v1521_v42  ;;  %2930 = vmatprep.mubr.msk.bf16.mxu1 %vm3272_vm1, %v3271_v30 }
 0x30a   : > { %2940 = vmatprep.subr.bf16.mxu1 %v3271_v30 }
 0x310   : > { %2931 = vmatmul.mubr.msk.bf16.vlgmr.msra.gmra.mrb[20].mxu1 %vm469_vm0, %v850_v44 }
 0x311   : > { %2942 = vmatprep.mubr.msk.bf16.mxu1 %vm3272_vm1, %v3271_v30 }
 0x3c3   : > { %v1235_v21 = vpop.f32.mrb[4].mxu1  ;;  %v1327_v22 = vpop.f32.mrb[4].mxu0 }
 0x3c4   : > { %v2890_v45 = vpop.f32.mrb[5].mxu1  ;;  %v2902_v46 = vpop.f32.mrb[5].mxu0  ;;  %v1564_v47 = vsel %vm1563_vm2, %v1235_v21, -inf  ;;  %v1570_v23 = vsel %vm1563_vm2, %v1327_v22, -inf }
 0x3c5   : > { %v1330_v50 = vpop.f32.mrb[6].mxu0  ;;  %1565 = vmax.xlane.f32.xlu0 %v1564_v47  ;;  %v1238_v51 = vpop.f32.mrb[6].mxu1 }
 0x3c6   : > { %v2891_v16 = vpop.f32.mrb[7].mxu1  ;;  %v2903_v18 = vpop.f32.mrb[7].mxu0 }
 0x3c9   : > { %1571 = vmax.xlane.f32.xlu0 %v1570_v23 }
 0x3cb   : > { %v1281_v29 = vpop.f32.mrb[8].mxu1  ;;  %v3745_v52 = vpop.f32.mrb[8].mxu0 }
 0x3cc   : > { %v2896_v39 = vpop.f32.mrb[9].mxu1  ;;  %v2914_v56 = vpop.f32.mrb[9].mxu0  ;;  %v1576_v57 = vsel %vm1563_vm2, %v3745_v52, -inf  ;;  %v1567_v60 = vsel %vm1563_vm2, %v1281_v29, -inf }
 0x3cd   : > { %v1422_v61 = vpop.f32.mrb[10].mxu0  ;;  %1577 = vmax.xlane.f32.xlu0 %v1576_v57  ;;  %1568 = vmax.xlane.f32.xlu1 %v1567_v60  ;;  %v1284_v63 = vpop.f32.mrb[10].mxu1 }
 0x3ce   : > { %v2897_v1 = vpop.f32.mrb[11].mxu1  ;;  %v2915_v2 = vpop.f32.mrb[11].mxu0 }
 0x3d3   : > { %v1373_v3 = vpop.f32.mrb[12].mxu1  ;;  %v3750_v4 = vpop.f32.mrb[12].mxu0 }
 0x3d4   : > { %v2908_v5 = vpop.f32.mrb[13].mxu1  ;;  %v2926_v8 = vpop.f32.mrb[13].mxu0  ;;  %v1573_v9 = vsel %vm1563_vm2, %v1373_v3, -inf  ;;  %v1582_v12 = vsel %vm1563_vm2, %v3750_v4, -inf }
 0x3d5   : > { %v1514_v24 = vpop.f32.mrb[14].mxu0  ;;  %1574 = vmax.xlane.f32.xlu0 %v1573_v9  ;;  %v1376_v10 = vpop.f32.mrb[14].mxu1 }
 0x3d6   : > { %v2909_v62 = vpop.f32.mrb[15].mxu1  ;;  %v2927_v11 = vpop.f32.mrb[15].mxu0 }
 0x3d9   : > { %1583 = vmax.xlane.f32.xlu0 %v1582_v12 }
 0x3db   : > { %v1465_v15 = vpop.f32.mrb[16].mxu1 }
 0x3dc   : > { %v2920_v33 = vpop.f32.mrb[17].mxu1  ;;  %v1579_v6 = vsel %vm1563_vm2, %v1465_v15, -inf }
 0x3dd   : > { %1580 = vmax.xlane.f32.xlu1 %v1579_v6  ;;  %v1468_v32 = vpop.f32.mrb[18].mxu1 }
 0x3de   : > { %v2921_v31 = vpop.f32.mrb[19].mxu1 }
 0x3e3   : > { %v1557_v34 = vpop.f32.mrb[20].mxu1 }
 0x3e4   : > { %v2932_v35 = vpop.f32.mrb[21].mxu1  ;;  %v1585_v36 = vsel %vm1563_vm2, %v1557_v34, -inf }
 0x3e5   : > { %1586 = vmax.xlane.f32.xlu1 %v1585_v36  ;;  %v1560_v17 = vpop.f32.mrb[22].mxu1 }
 0x3e6   : > { %v2933_v19 = vpop.f32.mrb[23].mxu1 }
 0x3ef   : > { %1035 = vrot.lane.b32.xlu0 %v3556_v14, %s3270_s14 }
 0x3f6   : > { %1037 = vrot.lane.b32.xlu1 %v3584_v27, %s3270_s14 }
 0x452   : > { %v1566_v25 = vpop.xlane.xlu0 %1565 }
 0x453   : > { %v1588_v13 = vsub.f32 %v1235_v21, %v1566_v25 }
 0x455   : > { %v1596_v37 = vmul.f32 1.442695, %v1588_v13 }
 0x456   : > { %v1572_v40 = vpop.xlane.xlu0 %1571 }
 0x457   : > { %3110 = vpow2.f32 %v1596_v37  ;;  %v1590_v28 = vsub.f32 %v1327_v22, %v1572_v40 }
 0x459   : > { %v1600_v41 = vmul.f32 1.442695, %v1590_v28 }
 0x45a   : > { %v1569_v42 = vpop.xlane.xlu1 %1568  ;;  %v1578_v45 = vpop.xlane.xlu0 %1577 }
 0x45b   : > { %3112 = vpow2.f32 %v1600_v41  ;;  %v1589_v43 = vsub.f32 %v1281_v29, %v1569_v42  ;;  %v1592_v29 = vsub.f32 %v3745_v52, %v1578_v45  ;;  %v1123_v42 = vrot.slane %v1115_v48, %v3623_v0 }
 0x45d   : > { %v1598_v44 = vmul.f32 1.442695, %v1589_v43  ;;  %v1604_v57 = vmul.f32 1.442695, %v1592_v29  ;;  %v1130_v43 = vrot.slane %v1116_v58, %v3623_v0 }
 0x45f   : > { %3114 = vpow2.f32 %v1598_v44 }
 0x461   : > { %v3761_v46 = vpop.eup %3110 }
 0x462   : > { %v1575_v47 = vpop.xlane.xlu0 %1574  ;;  %v1612_v14 = vsel %vm1563_vm2, %v3761_v46, 0.0 }
 0x463   : > { %v1591_v27 = vsub.f32 %v1373_v3, %v1575_v47  ;;  %1613 = vadd.xlane.f32.xlu0 %v1612_v14 }
 0x465   : > { %v3765_v21 = vpop.eup %3112  ;;  %v1602_v50 = vmul.f32 1.442695, %v1591_v27 }
 0x466   : > { %v1618_v22 = vsel %vm1563_vm2, %v3765_v21, 0.0  ;;  %v1584_v39 = vpop.xlane.xlu0 %1583 }
 0x467   : > { %3116 = vpow2.f32 %v1602_v50  ;;  %1619 = vadd.xlane.f32.xlu0 %v1618_v22  ;;  %v1594_v60 = vsub.f32 %v3750_v4, %v1584_v39 }
 0x468   : > { %3118 = vpow2.f32 %v1604_v57 }
 0x469   : > { %v3769_v51 = vpop.eup %3114  ;;  %v1608_v63 = vmul.f32 1.442695, %v1594_v60 }
 0x46a   : > { %v1615_v16 = vsel %vm1563_vm2, %v3769_v51, 0.0  ;;  %v1581_v56 = vpop.xlane.xlu1 %1580  ;;  %v1036_v62 = vpop.permute.xlu0 %1035 }
 0x46b   : > { %1616 = vadd.xlane.f32.xlu1 %v1615_v16  ;;  %3120 = vpow2.f32 %v1608_v63  ;;  %v1593_v2 = vsub.f32 %v1465_v15, %v1581_v56 }
 0x46d   : > { %v1606_v5 = vmul.f32 1.442695, %v1593_v2 }
 0x471   : > { %v3773_v18 = vpop.eup %3116 }
 0x472   : > { %v1621_v23 = vsel %vm1563_vm2, %v3773_v18, 0.0  ;;  %v1587_v61 = vpop.xlane.xlu1 %1586 }
 0x473   : > { %1622 = vadd.xlane.f32.xlu1 %v1621_v23  ;;  %v1595_v1 = vsub.f32 %v1557_v34, %v1587_v61 }
 0x475   : > { %v1610_v3 = vmul.f32 1.442695, %v1595_v1 }
 0x476   : > { %v1038_v12 = vpop.permute.xlu1 %1037 }
 0x477   : > { %3122 = vpow2.f32 %v1610_v3 }
 0x478   : > { %3124 = vpow2.f32 %v1606_v5 }
 0x47d   : > { %1039 = vrot.lane.b32.xlu0 %v3581_v26, %s3270_s14  ;;  %v3783_v26 = vpop.eup %3118 }
 0x47e   : > { %v3787_v52 = vpop.eup %3120 }
 0x47f   : > { %v1630_v4 = vsel %vm1563_vm2, %v3787_v52, 0.0 }
 0x481   : > { %v3791_v8 = vpop.eup %3122 }
 0x482   : > { %v1633_v9 = vsel %vm1563_vm2, %v3791_v8, 0.0  ;;  %v3795_v24 = vpop.eup %3124 }
 0x483   : > { %v1627_v10 = vsel %vm1563_vm2, %v3795_v24, 0.0 }
 0x484   : > { %1041 = vrot.lane.b32.xlu1 %v3590_v20, %s3270_s14  ;;  %v1624_v20 = vsel %vm1563_vm2, %v3783_v26, 0.0 }
 0x49c   : > { %1625 = vadd.xlane.f32.xlu0 %v1624_v20 }
 0x4a0   : > { %1631 = vadd.xlane.f32.xlu0 %v1630_v4 }
 0x4a4   : > { %1634 = vadd.xlane.f32.xlu0 %v1633_v9 }
 0x4a8   : > { %1628 = vadd.xlane.f32.xlu1 %v1627_v10 }
 0x4f0   : > { %v1614_v11 = vpop.xlane.xlu0 %1613 }
 0x4f1   : > { %3126 = vrcp.f32 %v1614_v11 }
 0x4f4   : > { %v1620_v15 = vpop.xlane.xlu0 %1619 }
 0x4f8   : > { %v1617_v33 = vpop.xlane.xlu1 %1616  ;;  %v1040_v6 = vpop.permute.xlu0 %1039 }
 0x4f9   : > { %3128 = vrcp.f32 %v1617_v33  ;;  %v1083_v31 = vcombine.low %v1036_v62, %v1040_v6  ;;  %v1084_v17 = vcombine.high %v1036_v62, %v1040_v6  ;;  %v1146_v6 = vrot.slane %v1132_v49, %v3623_v0 }
 0x4fa   : > { %3130 = vrcp.f32 %v1620_v15 }
 0x4fb   : > { %v1091_v19 = vrot.slane %v1083_v31, %v3553_v7  ;;  %v3805_v28 = vrot.slane %v1084_v17, %v3553_v7  ;;  %v3127_v41 = vpop.eup %3126 }
 0x4fc   : > { %v1644_v48 = vmul.f32 %v3127_v41, %v3761_v46  ;;  %v1139_v46 = vrot.slane %v1131_v59, %v3623_v0 }
 0x4fe   : > { %v1652_v61 = vpack.c.bf16 %v1644_v48, %v1644_v48 }
 0x500   : > { %v1623_v32 = vpop.xlane.xlu1 %1622 }
 0x501   : > { %3132 = vrcp.f32 %v1623_v32 }
 0x503   : > { %v3129_v47 = vpop.eup %3128 }
 0x504   : > { %v1042_v34 = vpop.permute.xlu1 %1041  ;;  %v1645_v23 = vmul.f32 %v3129_v47, %v3769_v51  ;;  %v3131_v60 = vpop.eup %3130 }
 0x505   : > { %v1099_v35 = vcombine.low %v1038_v12, %v1042_v34  ;;  %v1100_v36 = vcombine.high %v1038_v12, %v1042_v34  ;;  %v1646_v59 = vmul.f32 %v3131_v60, %v3765_v21 }
 0x506   : > { %v1653_v51 = vpack.c.bf16 %v1645_v23, %v1645_v23 }
 0x507   : > { %v1107_v25 = vrot.slane %v1099_v35, %v3553_v7  ;;  %v3802_v13 = vrot.slane %v1100_v36, %v3553_v7  ;;  %v1654_v10 = vpack.c.bf16 %v1646_v59, %v1646_v59 }
 0x509   : > { %v1147_v37 = vcombine.low %v1091_v19, %v1107_v25  ;;  %v1148_v40 = vcombine.high %v1091_v19, %v1107_v25  ;;  %v1163_v14 = vcombine.low %v3805_v28, %v3802_v13  ;;  %v1164_v11 = vcombine.high %v3805_v28, %v3802_v13 }
 0x50b   : > { %v1155_v44 = vrot.slane %v1147_v37, %v3623_v0  ;;  %v1162_v45 = vrot.slane %v1148_v40, %v3623_v0  ;;  %v1171_v54 = vrot.slane %v1163_v14, %v3623_v0  ;;  %v3133_v63 = vpop.eup %3132  ;;  %v1178_v15 = vrot.slane %v1164_v11, %v3623_v0 }
 0x50c   : > { %v1647_v20 = vmul.f32 %v3133_v63, %v3773_v18 }
 0x50d   : > { %v1179_v27 = vcombine.low %v1123_v42, %v1155_v44  ;;  %v1180_v50 = vcombine.high %v1123_v42, %v1155_v44  ;;  %v1181_v22 = vcombine.low %v1130_v43, %v1162_v45  ;;  %v1182_v16 = vcombine.high %v1130_v43, %v1162_v45  ;;  %v3087_v44 = vld [vmem:[%s4141_s5 + $0x8] sm:$0xff]  }
 0x50e   : > { %v1183_v3 = vcombine.low %v1139_v46, %v1171_v54  ;;  %v1184_v5 = vcombine.high %v1139_v46, %v1171_v54  ;;  %v1655_v62 = vpack.c.bf16 %v1647_v20, %v1647_v20  ;;  %v1185_v32 = vcombine.low %v1146_v6, %v1178_v15 }
 0x50f   : > { %v1187_v29 = vpack.c.bf16 %v1179_v27, %v1179_v27  ;;  %v1188_v38 = vpack.c.bf16 %v1180_v50, %v1180_v50  ;;  %v1189_v56 = vpack.c.bf16 %v1181_v22, %v1181_v22  ;;  %v1190_v57 = vpack.c.bf16 %v1182_v16, %v1182_v16 }
 0x510   : > { %v1191_v4 = vpack.c.bf16 %v1183_v3, %v1183_v3  ;;  %v1192_v9 = vpack.c.bf16 %v1184_v5, %v1184_v5  ;;  %v1193_v36 = vpack.c.bf16 %v1185_v32, %v1185_v32  ;;  %v1186_v55 = vcombine.high %v1146_v6, %v1178_v15 }
 0x511   : > { %v1665_v58 = vsel %vm1663_vm3, %v1187_v29, 0  ;;  %v1711_v39 = vsel %vm1663_vm3, %v1188_v38, 0  ;;  %v1757_v1 = vsel %vm1663_vm3, %v1189_v56, 0  ;;  %v1803_v2 = vsel %vm1663_vm3, %v1190_v57, 0 }
 0x512   : > { %2935 = vmatpush3.bf16.msra.mxu0 %v1665_v58  ;;  %2941 = vmatpush3.bf16.msra.mxu1 %v1711_v39  ;;  %v1849_v21 = vsel %vm1663_vm3, %v1191_v4, 0  ;;  %v1895_v18 = vsel %vm1663_vm3, %v1192_v9, 0  ;;  %v1941_v13 = vsel %vm1663_vm3, %v1193_v36, 0  ;;  %v1194_v40 = vpack.c.bf16 %v1186_v55, %v1186_v55 }
 0x513   : > { %2946 = vmatprep.subr.bf16.mxu0 %v3271_v30  ;;  %2952 = vmatprep.subr.bf16.mxu1 %v3271_v30 }
 0x514   : > { %v1987_v42 = vsel %vm1663_vm3, %v1194_v40, 0 }
 0x515   : > { %2937 = vmatmul.mubr.msk.bf16.vlgmr.msra.gmra.mrb[16].mxu0 %vm1563_vm2, %v1652_v61  ;;  %2943 = vmatmul.mubr.msk.bf16.vlgmr.msra.gmra.mrb[24].mxu1 %vm1563_vm2, %v1653_v51 }
 0x516   : > { %2947 = vmatpush3.bf16.msra.mxu0 %v1757_v1  ;;  %2953 = vmatpush3.bf16.msra.mxu1 %v1803_v2 }
 0x517   : > { %2948 = vmatprep.mubr.msk.bf16.mxu0 %vm3272_vm1, %v3271_v30  ;;  %2954 = vmatprep.mubr.msk.bf16.mxu1 %vm3272_vm1, %v3271_v30 }
 0x518   : > { %2958 = vmatprep.subr.bf16.mxu0 %v3271_v30  ;;  %2964 = vmatprep.subr.bf16.mxu1 %v3271_v30 }
 0x51d   : > { %2949 = vmatmul.mubr.msk.bf16.vlgmr.msra.gmra.mrb[20].mxu0 %vm1563_vm2, %v1654_v10  ;;  %2955 = vmatmul.mubr.msk.bf16.vlgmr.msra.gmra.mrb[28].mxu1 %vm1563_vm2, %v1655_v62 }
 0x51e   : > { %2959 = vmatpush3.bf16.msra.mxu0 %v1849_v21  ;;  %2965 = vmatpush3.bf16.msra.mxu1 %v1895_v18 }
 0x51f   : > { %2960 = vmatprep.mubr.msk.bf16.mxu0 %vm3272_vm1, %v3271_v30  ;;  %2970 = vmatprep.subr.bf16.mxu0 %v3271_v30 }
 0x520   : > { %2966 = vmatprep.mubr.msk.bf16.mxu1 %vm3272_vm1, %v3271_v30  ;;  %2976 = vmatprep.subr.bf16.mxu1 %v3271_v30 }
 0x529   : > { %v1626_v12 = vpop.xlane.xlu0 %1625 }
 0x52a   : > { %3134 = vrcp.f32 %v1626_v12 }
 0x52d   : > { %v1632_v33 = vpop.xlane.xlu0 %1631 }
 0x52e   : > { %3136 = vrcp.f32 %v1632_v33 }
 0x531   : > { %v1635_v17 = vpop.xlane.xlu0 %1634 }
 0x534   : > { %v3135_v31 = vpop.eup %3134 }
 0x535   : > { %v1648_v34 = vmul.f32 %v3135_v31, %v3783_v26  ;;  %v1629_v35 = vpop.xlane.xlu1 %1628 }
 0x536   : > { %3138 = vrcp.f32 %v1629_v35 }
 0x537   : > { %v1656_v19 = vpack.c.bf16 %v1648_v34, %v1648_v34  ;;  %3140 = vrcp.f32 %v1635_v17 }
 0x538   : > { %v3137_v25 = vpop.eup %3136 }
 0x539   : > { %2961 = vmatmul.mubr.msk.bf16.vlgmr.msra.gmra.mrb[24].mxu0 %vm1563_vm2, %v1656_v19  ;;  %v1650_v53 = vmul.f32 %v3137_v25, %v3787_v52 }
 0x53a   : > { %2971 = vmatpush3.bf16.msra.mxu0 %v1941_v13  ;;  %2972 = vmatprep.mubr.msk.bf16.mxu0 %vm3272_vm1, %v3271_v30 }
 0x53b   : > { %v1658_v49 = vpack.c.bf16 %v1650_v53, %v1650_v53 }
 0x540   : > { %v3139_v26 = vpop.eup %3138 }
 0x541   : > { %v1649_v37 = vmul.f32 %v3139_v26, %v3795_v24  ;;  %2973 = vmatmul.mubr.msk.bf16.vlgmr.msra.gmra.mrb[28].mxu0 %vm1563_vm2, %v1658_v49  ;;  %v3141_v41 = vpop.eup %3140  ;;  %v3086_v24 = vld [vmem:[%s4141_s5] sm:$0xff]  }
 0x542   : > { %v1651_v52 = vmul.f32 %v3141_v41, %v3791_v8  ;;  %2982 = vmatprep.subr.bf16.mxu0 %v3086_v24 }
 0x543   : > { %v1657_v28 = vpack.c.bf16 %v1649_v37, %v1649_v37  ;;  %2983 = vmatpush3.bf16.msra.mxu0 %v3086_v24 }
 0x544   : > { %v1659_v43 = vpack.c.bf16 %v1651_v52, %v1651_v52  ;;  %2984 = vmatprep.subr.bf16.mxu0 %v3087_v44 }
 0x545   : > { %2967 = vmatmul.mubr.msk.bf16.vlgmr.msra.gmra.mrb[32].mxu1 %vm1563_vm2, %v1657_v28 }
 0x546   : > { %2977 = vmatpush3.bf16.msra.mxu1 %v1987_v42  ;;  %2978 = vmatprep.mubr.msk.bf16.mxu1 %vm3272_vm1, %v3271_v30 }
 0x547   : > { %2985 = vmatpush3.bf16.msra.mxu0 %v3087_v44 }
 0x54d   : > { %2979 = vmatmul.mubr.msk.bf16.vlgmr.msra.gmra.mrb[36].mxu1 %vm1563_vm2, %v1659_v43 }
 0x5e8   : > { %v1701_v45 = vpop.f32.mrb[16].mxu0  ;;  %v1747_v47 = vpop.f32.mrb[24].mxu1 }
 0x5e9   : > { %v2938_v30 = vpop.f32.mrb[17].mxu0  ;;  %v2944_v14 = vpop.f32.mrb[25].mxu1 }
 0x5ea   : > { %v1704_v8 = vpop.f32.mrb[18].mxu0  ;;  %v1750_v27 = vpop.f32.mrb[26].mxu1 }
 0x5eb   : > { %v2939_v50 = vpop.f32.mrb[19].mxu0  ;;  %v2945_v22 = vpop.f32.mrb[27].mxu1 }
 0x5f0   : > { %v1793_v16 = vpop.f32.mrb[20].mxu0  ;;  %v1839_v48 = vpop.f32.mrb[28].mxu1 }
 0x5f1   : > { %v2029_v23 = vcombine.low %v1701_v45, %v1793_v16  ;;  %v2030_v29 = vcombine.high %v1701_v45, %v1793_v16  ;;  %v2045_v38 = vcombine.low %v1747_v47, %v1839_v48  ;;  %v2046_v54 = vcombine.high %v1747_v47, %v1839_v48  ;;  %v2950_v58 = vpop.f32.mrb[21].mxu0  ;;  %v2956_v39 = vpop.f32.mrb[29].mxu1 }
 0x5f2   : > { %v1796_v56 = vpop.f32.mrb[22].mxu0  ;;  %v1842_v57 = vpop.f32.mrb[30].mxu1 }
 0x5f3   : > { %v2037_v60 = vrot.slane %v2029_v23, %v3553_v7  ;;  %v2044_v46 = vrot.slane %v2030_v29, %v3553_v7  ;;  %v2053_v61 = vrot.slane %v2045_v38, %v3553_v7  ;;  %v2060_v51 = vrot.slane %v2046_v54, %v3553_v7  ;;  %v2951_v63 = vpop.f32.mrb[23].mxu0  ;;  %v2957_v1 = vpop.f32.mrb[31].mxu1 }
 0x5f4   : > { %v3159_v1 = vld [vmem:[%s3460_s16 + $0x10] sm:$0xff] }
 0x5f5   : > { %v2093_v2 = vcombine.low %v2037_v60, %v2053_v61  ;;  %v2094_v3 = vcombine.high %v2037_v60, %v2053_v61  ;;  %v2109_v5 = vcombine.low %v2044_v46, %v2060_v51  ;;  %v2110_v59 = vcombine.high %v2044_v46, %v2060_v51  ;;  %v3158_v46 = vld [vmem:[%s3460_s16] sm:$0xff] }
 0x5f7   : > { %v2101_v41 = vrot.slane %v2093_v2, %v3623_v0  ;;  %v2108_v42 = vrot.slane %v2094_v3, %v3623_v0  ;;  %v2117_v45 = vrot.slane %v2109_v5, %v3623_v0  ;;  %v3160_v3 = vld [vmem:[%s3460_s16 + $0x8] sm:$0xff] }
 0x60c   : > { %v1885_v20 = vpop.f32.mrb[24].mxu0 }
 0x60d   : > { %v2962_v4 = vpop.f32.mrb[25].mxu0 }
 0x60e   : > { %v1888_v9 = vpop.f32.mrb[26].mxu0 }
 0x60f   : > { %v2963_v10 = vpop.f32.mrb[27].mxu0 }
 0x614   : > { %v1977_v62 = vpop.f32.mrb[28].mxu0 }
 0x615   : > { %v2061_v21 = vcombine.low %v1885_v20, %v1977_v62  ;;  %v2062_v18 = vcombine.high %v1885_v20, %v1977_v62  ;;  %v2974_v11 = vpop.f32.mrb[29].mxu0  ;;  %v3161_v20 = vld [vmem:[%s3460_s16 + $0x18] sm:$0xff] }
 0x616   : > { %v1980_v12 = vpop.f32.mrb[30].mxu0 }
 0x617   : > { %v2975_v15 = vpop.f32.mrb[31].mxu0  ;;  %v2069_v25 = vrot.slane %v2061_v21, %v3553_v7  ;;  %v2076_v13 = vrot.slane %v2062_v18, %v3553_v7 }
 0x618   : > { %v1931_v33 = vpop.f32.mrb[32].mxu1 }
 0x619   : > { %v2968_v6 = vpop.f32.mrb[33].mxu1 }
 0x61a   : > { %v1934_v32 = vpop.f32.mrb[34].mxu1 }
 0x61b   : > { %v2969_v31 = vpop.f32.mrb[35].mxu1 }
 0x620   : > { %v2023_v34 = vpop.f32.mrb[36].mxu1 }
 0x621   : > { %v2077_v35 = vcombine.low %v1931_v33, %v2023_v34  ;;  %v2078_v36 = vcombine.high %v1931_v33, %v2023_v34  ;;  %v2980_v17 = vpop.f32.mrb[37].mxu1  ;;  %v3162_v33 = vld [vmem:[%s3460_s16 + $0x20] sm:$0xff] }
 0x622   : > { %v2026_v19 = vpop.f32.mrb[38].mxu1  ;;  %v3164_v17 = vld [vmem:[%s3460_s16 + $0x28] sm:$0xff] }
 0x623   : > { %v2085_v53 = vrot.slane %v2077_v35, %v3553_v7  ;;  %v2092_v55 = vrot.slane %v2078_v36, %v3553_v7  ;;  %v2981_v49 = vpop.f32.mrb[39].mxu1  ;;  %v2124_v7 = vrot.slane %v2110_v59, %v3623_v0  ;;  %v3163_v35 = vld [vmem:[%s3460_s16 + $0x30] sm:$0xff] }
 0x625   : > { %v2125_v26 = vcombine.low %v2069_v25, %v2085_v53  ;;  %v2126_v37 = vcombine.high %v2069_v25, %v2085_v53  ;;  %v2141_v40 = vcombine.low %v2076_v13, %v2092_v55  ;;  %v2142_v28 = vcombine.high %v2076_v13, %v2092_v55  ;;  %v3165_v13 = vld [vmem:[%s3460_s16 + $0x38] sm:$0xff]  ;;  %s457_s16 = scalar_lea.vmem [#allocation5], %s2760_s18  ;;  %s2813_s18 = sshll.u32 %s3369_s29, 7 }
 0x626   : > { %s2681_s25 = sshll.u32 %s457_s16, 4  ;;  %s4089_s14 = scalar_lea.hbm %s4149_s13, %s2813_s18  ;;  %s4081_s25 = int_to_ptr.vmem [resolvable:$true] %s2681_s25 }
 0x627   : > { %v2133_v52 = vrot.slane %v2125_v26, %v3623_v0  ;;  %v2140_v43 = vrot.slane %v2126_v37, %v3623_v0  ;;  %v2149_v24 = vrot.slane %v2141_v40, %v3623_v0  ;;  %v2156_v44 = vrot.slane %v2142_v28, %v3623_v0  ;;  %v2787_v0 = vld [vmem:[%s4142_s6] ss:$0 sm:$0xff]  ;;  %s3196_s19 = scalar_lea.vmem %s4081_s25, 1024  ;;  %p3203_p4 = scmp.lt.s32.totalorder %s4081_s25, %s3201_s15 }
 0x628   : > { %p3197_p6 = scmp.ne.s32.totalorder %s4081_s25, %s3196_s19  ;;  %p3204_p10 = scmp.lt.s32.totalorder %s3202_s30, %s3196_s19 }
 0x629   : > { %v2159_v47 = vcombine.low %v2108_v42, %v2140_v43  ;;  %v2160_v30 = vcombine.high %v2108_v42, %v2140_v43  ;;  %v2157_v14 = vcombine.low %v2101_v41, %v2133_v52  ;;  %v2158_v8 = vcombine.high %v2101_v41, %v2133_v52 }
 0x62a   : > { %v2161_v27 = vcombine.low %v2117_v45, %v2149_v24  ;;  %v2162_v50 = vcombine.high %v2117_v45, %v2149_v24  ;;  %v2163_v22 = vcombine.low %v2124_v7, %v2156_v44  ;;  %v2164_v16 = vcombine.high %v2124_v7, %v2156_v44  ;;  %p3198_p12 = pnand %p3197_p6, %p4165_p11  ;;  %p3205_p1 = por %p3204_p10, %p3203_p4 }
 0x62b   : > { %v2166_v48 = vpack.c.bf16 %v2160_v30, %v2159_v47  ;;  %v2165_v23 = vpack.c.bf16 %v2158_v8, %v2157_v14 }
 0x62c   : > { %v2167_v29 = vpack.c.bf16 %v2162_v50, %v2161_v27  ;;  %v2168_v38 = vpack.c.bf16 %v2164_v16, %v2163_v22  ;;  %p3199_p13 = pneg %p3198_p12 }
 0x62d   : > { %2986 = vmatprep.mubr.msk.bf16.mxu0 %vm469_vm0, %v2165_v23 }
 0x62e   : > { %2987 = vmatmul.mubr.msk.bf16.vlgmr.msra.gmra.mrb[32].mxu0 %vm469_vm0, %v2166_v48  ;;  %p3206_p3 = pnand %p3205_p1, %p3199_p13 }
 0x62f   : > { %2990 = vmatprep.mubr.msk.bf16.mxu0 %vm469_vm0, %v2167_v29 }
 0x636   : > { %2991 = vmatmul.mubr.msk.bf16.gmra.mrb[36].mxu0 %vm469_vm0, %v2168_v38 }
 0x701   : > { %v2988_v54 = vpop.f32.mrb[32].mxu0 }
 0x702   : > { %v2238_v58 = vpop.f32.mrb[33].mxu0  ;;  %v2247_v39 = vadd.f32 %v2988_v54, %v2787_v0 }
 0x703   : > { %v2239_v56 = vadd.f32 %v2787_v0, %v2238_v58  ;;  %v2989_v57 = vpop.f32.mrb[34].mxu0 }
 0x704   : > { %v2241_v60 = vpop.f32.mrb[35].mxu0  ;;  %v2250_v51 = vadd.f32 %v2989_v57, %v2787_v0  ;;  %v3906_v2 = vadd.f32 %v3159_v1, %v2247_v39 }
 0x705   : > { %v3903_v61 = vadd.f32 %v3158_v46, %v2239_v56  ;;  %v2242_v63 = vadd.f32 %v2787_v0, %v2241_v60 }
 0x706   : > { %v3914_v4 = vadd.f32 %v3161_v20, %v2250_v51  ;;  %v2285_v12 = vsel %vm469_vm0, %v3906_v2, 0.0 }
 0x707   : > { %v3909_v5 = vadd.f32 %v3160_v3, %v2242_v63  ;;  %v2279_v59 = vsel %vm469_vm0, %v3903_v61, 0.0 }
 0x708   : > { %2280 = vadd.xlane.f32.xlu0 %v2279_v59  ;;  %v2288_v34 = vsel %vm469_vm0, %v3914_v4, 0.0 }
 0x709   : > { %v2992_v9 = vpop.f32.mrb[36].mxu0  ;;  %v2282_v10 = vsel %vm469_vm0, %v3909_v5, 0.0 }
 0x70a   : > { %v2254_v62 = vpop.f32.mrb[37].mxu0  ;;  %2283 = vadd.xlane.f32.xlu1 %v2282_v10  ;;  %v2263_v21 = vadd.f32 %v2992_v9, %v2787_v0 }
 0x70b   : > { %v2255_v18 = vadd.f32 %v2787_v0, %v2254_v62  ;;  %v2993_v11 = vpop.f32.mrb[38].mxu0 }
 0x70c   : > { %v2257_v15 = vpop.f32.mrb[39].mxu0  ;;  %2286 = vadd.xlane.f32.xlu0 %v2285_v12  ;;  %v2266_v32 = vadd.f32 %v2993_v11, %v2787_v0  ;;  %v3926_v36 = vadd.f32 %v3163_v35, %v2263_v21  ;;  %v3088_v21 = vld [vmem:[%s4145_s9] sm:$0xff]   ;;  %v3091_v12 = vld [vmem:[%s4147_s11 + $0x8] sm:$0xff]  }
 0x70d   : > { %v3921_v6 = vadd.f32 %v3162_v33, %v2255_v18  ;;  %v2258_v31 = vadd.f32 %v2787_v0, %v2257_v15  ;;  %2994 = vmatprep.subr.bf16.mxu1 %v3088_v21  ;;  %v3089_v18 = vld [vmem:[%s4145_s9 + $0x8] sm:$0xff]   ;;  %v3090_v11 = vld [vmem:[%s4147_s11] sm:$0xff]  }
 0x70e   : > { %2289 = vadd.xlane.f32.xlu1 %v2288_v34  ;;  %v3934_v53 = vadd.f32 %v3165_v13, %v2266_v32  ;;  %v2297_v49 = vsel %vm469_vm0, %v3926_v36, 0.0  ;;  %2995 = vmatpush3.bf16.msra.mxu1 %v3088_v21 }
 0x70f   : > { %v3929_v19 = vadd.f32 %v3164_v17, %v2258_v31  ;;  %v2291_v25 = vsel %vm469_vm0, %v3921_v6, 0.0  ;;  %2996 = vmatprep.subr.bf16.mxu1 %v3089_v18  ;;  %3006 = vmatprep.subr.bf16.mxu0 %v3090_v11 }
 0x710   : > { %2292 = vadd.xlane.f32.xlu0 %v2291_v25  ;;  %v2300_v26 = vsel %vm469_vm0, %v3934_v53, 0.0  ;;  %3007 = vmatpush3.bf16.msra.mxu0 %v3090_v11 }
 0x711   : > { %v2294_v55 = vsel %vm469_vm0, %v3929_v19, 0.0  ;;  %3008 = vmatprep.subr.bf16.mxu0 %v3091_v12 }
 0x712   : > { %2295 = vadd.xlane.f32.xlu1 %v2294_v55  ;;  %2997 = vmatpush3.bf16.msra.mxu1 %v3089_v18 }
 0x714   : > { %2298 = vadd.xlane.f32.xlu0 %v2297_v49  ;;  %3009 = vmatpush3.bf16.msra.mxu0 %v3091_v12 }
 0x716   : > { %2301 = vadd.xlane.f32.xlu1 %v2300_v26 }
 0x795   : > { %v2281_v37 = vpop.xlane.xlu0 %2280 }
 0x796   : > { %v2303_v40 = vmul.f32 0.03125, %v2281_v37 }
 0x797   : > { %v2284_v28 = vpop.xlane.xlu1 %2283 }
 0x798   : > { %v3943_v41 = vsub.f32 %v3903_v61, %v2303_v40  ;;  %v2304_v42 = vmul.f32 0.03125, %v2284_v28 }
 0x799   : > { %v2287_v52 = vpop.xlane.xlu0 %2286 }
 0x79a   : > { %v3946_v43 = vsub.f32 %v3909_v5, %v2304_v42  ;;  %v2305_v24 = vmul.f32 0.03125, %v2287_v52  ;;  %v2319_v44 = vmul.f32 %v3943_v41, %v3943_v41 }
 0x79b   : > { %v2290_v45 = vpop.xlane.xlu1 %2289 }
 0x79c   : > { %v3951_v7 = vsub.f32 %v3906_v2, %v2305_v24  ;;  %v2306_v47 = vmul.f32 0.03125, %v2290_v45  ;;  %v2327_v30 = vsel %vm469_vm0, %v2319_v44, 0.0  ;;  %v2320_v14 = vmul.f32 %v3946_v43, %v3946_v43 }
 0x79d   : > { %2328 = vadd.xlane.f32.xlu0 %v2327_v30  ;;  %v2293_v8 = vpop.xlane.xlu0 %2292 }
 0x79e   : > { %v3957_v27 = vsub.f32 %v3914_v4, %v2306_v47  ;;  %v2307_v50 = vmul.f32 0.03125, %v2293_v8  ;;  %v2330_v22 = vsel %vm469_vm0, %v2320_v14, 0.0  ;;  %v2321_v16 = vmul.f32 %v3951_v7, %v3951_v7  ;;  %v2794_v14 = vld [vmem:[%s4143_s7] ss:$0 sm:$0xff] }
 0x79f   : > { %2331 = vadd.xlane.f32.xlu1 %v2330_v22  ;;  %v2296_v48 = vpop.xlane.xlu1 %2295 }
 0x7a0   : > { %v3963_v23 = vsub.f32 %v3921_v6, %v2307_v50  ;;  %v2308_v29 = vmul.f32 0.03125, %v2296_v48  ;;  %v2333_v38 = vsel %vm469_vm0, %v2321_v16, 0.0  ;;  %v2322_v0 = vmul.f32 %v3957_v27, %v3957_v27 }
 0x7a1   : > { %2334 = vadd.xlane.f32.xlu0 %v2333_v38  ;;  %v2299_v54 = vpop.xlane.xlu0 %2298 }
 0x7a2   : > { %v3969_v58 = vsub.f32 %v3929_v19, %v2308_v29  ;;  %v2309_v39 = vmul.f32 0.03125, %v2299_v54  ;;  %v2336_v56 = vsel %vm469_vm0, %v2322_v0, 0.0  ;;  %v2323_v57 = vmul.f32 %v3963_v23, %v3963_v23  ;;  %v2795_v54 = vld [vmem:[%s4144_s8] ss:$0 sm:$0xff] }
 0x7a3   : > { %2337 = vadd.xlane.f32.xlu1 %v2336_v56  ;;  %v2302_v60 = vpop.xlane.xlu1 %2301 }
 0x7a4   : > { %v3975_v46 = vsub.f32 %v3926_v36, %v2309_v39  ;;  %v2310_v51 = vmul.f32 0.03125, %v2302_v60  ;;  %v2339_v63 = vsel %vm469_vm0, %v2323_v57, 0.0  ;;  %v2324_v1 = vmul.f32 %v3969_v58, %v3969_v58 }
 0x7a5   : > { %2340 = vadd.xlane.f32.xlu0 %v2339_v63 }
 0x7a6   : > { %v3981_v3 = vsub.f32 %v3934_v53, %v2310_v51  ;;  %v2342_v59 = vsel %vm469_vm0, %v2324_v1, 0.0  ;;  %v2325_v20 = vmul.f32 %v3975_v46, %v3975_v46 }
 0x7a7   : > { %2343 = vadd.xlane.f32.xlu1 %v2342_v59 }
 0x7a8   : > { %v2345_v9 = vsel %vm469_vm0, %v2325_v20, 0.0  ;;  %v2326_v10 = vmul.f32 %v3981_v3, %v3981_v3 }
 0x7a9   : > { %2346 = vadd.xlane.f32.xlu0 %v2345_v9 }
 0x7aa   : > { %v2348_v62 = vsel %vm469_vm0, %v2326_v10, 0.0 }
 0x7ab   : > { %2349 = vadd.xlane.f32.xlu1 %v2348_v62 }
 0x82a   : > { %v2329_v15 = vpop.xlane.xlu0 %2328 }
 0x82b   : > { %v2351_v33 = vmul.f32 0.03125, %v2329_v15 }
 0x82c   : > { %v2332_v32 = vpop.xlane.xlu1 %2331 }
 0x82d   : > { %v2359_v31 = vadd.f32 1e-05, %v2351_v33  ;;  %v2352_v34 = vmul.f32 0.03125, %v2332_v32 }
 0x82e   : > { %v2335_v35 = vpop.xlane.xlu0 %2334 }
 0x82f   : > { %3142 = vrsqrt.f32 %v2359_v31  ;;  %v2360_v17 = vadd.f32 1e-05, %v2352_v34  ;;  %v2353_v25 = vmul.f32 0.03125, %v2335_v35 }
 0x830   : > { %v2338_v13 = vpop.xlane.xlu1 %2337 }
 0x831   : > { %3144 = vrsqrt.f32 %v2360_v17  ;;  %v2361_v55 = vadd.f32 1e-05, %v2353_v25  ;;  %v2354_v49 = vmul.f32 0.03125, %v2338_v13  ;;  %v3092_v17 = vld [vmem:[%s4147_s11 + $0x10] sm:$0xff]   ;;  %v3093_v25 = vld [vmem:[%s4147_s11 + $0x18] sm:$0xff]  }
 0x832   : > { %v2341_v26 = vpop.xlane.xlu0 %2340  ;;  %3010 = vmatprep.subr.bf16.mxu0 %v3092_v17  ;;  %v2796_v13 = vld [vmem:[%s4146_s10] ss:$0 sm:$0xff] }
 0x833   : > { %3146 = vrsqrt.f32 %v2361_v55  ;;  %v2362_v37 = vadd.f32 1e-05, %v2354_v49  ;;  %v2355_v40 = vmul.f32 0.03125, %v2341_v26  ;;  %3011 = vmatpush3.bf16.msra.mxu0 %v3092_v17 }
 0x834   : > { %v2344_v28 = vpop.xlane.xlu1 %2343  ;;  %3012 = vmatprep.subr.bf16.mxu0 %v3093_v25 }
 0x835   : > { %3148 = vrsqrt.f32 %v2362_v37  ;;  %v2363_v42 = vadd.f32 1e-05, %v2355_v40  ;;  %v2356_v52 = vmul.f32 0.03125, %v2344_v28 }
 0x836   : > { %v2347_v24 = vpop.xlane.xlu0 %2346 }
 0x837   : > { %3150 = vrsqrt.f32 %v2363_v42  ;;  %v2364_v44 = vadd.f32 1e-05, %v2356_v52  ;;  %v2357_v45 = vmul.f32 0.03125, %v2347_v24  ;;  %3013 = vmatpush3.bf16.msra.mxu0 %v3093_v25 }
 0x838   : > { %v2350_v47 = vpop.xlane.xlu1 %2349 }
 0x839   : > { %v3143_v30 = vpop.eup %3142  ;;  %3152 = vrsqrt.f32 %v2364_v44  ;;  %v2365_v8 = vadd.f32 1e-05, %v2357_v45  ;;  %v2358_v50 = vmul.f32 0.03125, %v2350_v47 }
 0x83a   : > { %v2375_v22 = vmul.f32 %v3143_v30, %v3943_v41 }
 0x83b   : > { %v3145_v16 = vpop.eup %3144  ;;  %3154 = vrsqrt.f32 %v2365_v8  ;;  %v2366_v48 = vadd.f32 1e-05, %v2358_v50 }
 0x83c   : > { %v2376_v29 = vmul.f32 %v3145_v16, %v3946_v43  ;;  %v2389_v38 = vmul.f32 %v2794_v14, %v2375_v22 }
 0x83d   : > { %v3147_v0 = vpop.eup %3146  ;;  %3156 = vrsqrt.f32 %v2366_v48 }
 0x83e   : > { %v2377_v39 = vmul.f32 %v3147_v0, %v3951_v7  ;;  %v2390_v56 = vmul.f32 %v2794_v14, %v2376_v29  ;;  %v4012_v41 = vadd.f32 %v2795_v54, %v2389_v38 }
 0x83f   : > { %v3149_v57 = vpop.eup %3148 }
 0x840   : > { %v2391_v60 = vmul.f32 %v2794_v14, %v2377_v39  ;;  %v2378_v51 = vmul.f32 %v3149_v57, %v3957_v27  ;;  %v4014_v63 = vadd.f32 %v2795_v54, %v2390_v56 }
 0x841   : > { %v3151_v1 = vpop.eup %3150 }
 0x842   : > { %v2392_v43 = vmul.f32 %v2794_v14, %v2378_v51  ;;  %v2379_v59 = vmul.f32 %v3151_v1, %v3963_v23  ;;  %v2411_v20 = vpack.c.bf16 %v4014_v63, %v4012_v41  ;;  %v4021_v7 = vadd.f32 %v2795_v54, %v2391_v60  ;;  %v2803_v1 = vld [vmem:[%s4148_s12] ss:$0 sm:$0xff] }
 0x843   : > { %v3153_v9 = vpop.eup %3152 }
 0x844   : > { %v2380_v10 = vmul.f32 %v3153_v9, %v3969_v58  ;;  %2998 = vmatprep.mubr.msk.bf16.mxu1 %vm469_vm0, %v2411_v20  ;;  %v4023_v62 = vadd.f32 %v2795_v54, %v2392_v43  ;;  %v2393_v27 = vmul.f32 %v2794_v14, %v2379_v59  ;;  %v2646_v20 = vadd.f32 %v4021_v7, %v3906_v2 }
 0x845   : > { %v3155_v21 = vpop.eup %3154 }
 0x846   : > { %v2381_v18 = vmul.f32 %v3155_v21, %v3975_v46  ;;  %v2412_v11 = vpack.c.bf16 %v4023_v62, %v4021_v7  ;;  %v2394_v23 = vmul.f32 %v2794_v14, %v2380_v10  ;;  %v4030_v58 = vadd.f32 %v2795_v54, %v2393_v27 }
 0x847   : > { %v3157_v12 = vpop.eup %3156  ;;  %v2644_v27 = vadd.f32 %v4012_v41, %v3903_v61 }
 0x848   : > { %v2382_v15 = vmul.f32 %v3157_v12, %v3981_v3  ;;  %2999 = vmatmul.mubr.msk.bf16.vlgmr.msra.gmra.mrb[40].mxu1 %vm469_vm0, %v2412_v11  ;;  %v4032_v33 = vadd.f32 %v2795_v54, %v2394_v23  ;;  %v2395_v32 = vmul.f32 %v2794_v14, %v2381_v18  ;;  %v2647_v23 = vadd.f32 %v4023_v62, %v3914_v4 }
 0x849   : > { %v2648_v62 = vadd.f32 %v4030_v58, %v3921_v6 }
 0x84a   : > { %v2413_v31 = vpack.c.bf16 %v4032_v33, %v4030_v58  ;;  %v2396_v34 = vmul.f32 %v2794_v14, %v2382_v15  ;;  %v4037_v46 = vadd.f32 %v2795_v54, %v2395_v32 }
 0x84c   : > { %3002 = vmatprep.mubr.msk.bf16.mxu1 %vm469_vm0, %v2413_v31  ;;  %v4039_v35 = vadd.f32 %v2795_v54, %v2396_v34  ;;  %v2645_v31 = vadd.f32 %v4014_v63, %v3909_v5  ;;  %v2650_v7 = vadd.f32 %v4037_v46, %v3926_v36 }
 0x84e   : > { %v2414_v3 = vpack.c.bf16 %v4039_v35, %v4037_v46  ;;  %v2651_v25 = vadd.f32 %v4039_v35, %v3934_v53 }
 0x850   : > { %3003 = vmatmul.mubr.msk.bf16.gmra.mrb[44].mxu1 %vm469_vm0, %v2414_v3 }
 0x91b   : > { %v3000_v55 = vpop.f32.mrb[40].mxu1 }
 0x91c   : > { %v2493_v49 = vadd.f32 %v3000_v55, %v2796_v13  ;;  %v2484_v26 = vpop.f32.mrb[41].mxu1  ;;  %v2649_v55 = vadd.f32 %v4032_v33, %v3929_v19 }
 0x91d   : > { %v2485_v37 = vadd.f32 %v2796_v13, %v2484_v26  ;;  %v3001_v40 = vpop.f32.mrb[42].mxu1 }
 0x91e   : > { %v2496_v28 = vadd.f32 %v3001_v40, %v2796_v13  ;;  %v2487_v42 = vpop.f32.mrb[43].mxu1  ;;  %v2517_v24 = vmax.f32 %v2493_v49, 0.0 }
 0x91f   : > { %v2488_v52 = vadd.f32 %v2796_v13, %v2487_v42  ;;  %v2515_v45 = vmax.f32 %v2485_v37, 0.0 }
 0x920   : > { %v2518_v44 = vmax.f32 %v2496_v28, 0.0 }
 0x921   : > { %v2516_v47 = vmax.f32 %v2488_v52, 0.0 }
 0x922   : > { %v2524_v30 = vpack.c.bf16 %v2518_v44, %v2517_v24 }
 0x923   : > { %v2523_v14 = vpack.c.bf16 %v2516_v47, %v2515_v45  ;;  %v3004_v8 = vpop.f32.mrb[44].mxu1 }
 0x924   : > { %v2509_v50 = vadd.f32 %v3004_v8, %v2796_v13  ;;  %v2500_v22 = vpop.f32.mrb[45].mxu1 }
 0x925   : > { %v2501_v16 = vadd.f32 %v2796_v13, %v2500_v22  ;;  %v3005_v48 = vpop.f32.mrb[46].mxu1  ;;  %3014 = vmatprep.mubr.msk.bf16.mxu0 %vm2566_vm4, %v2523_v14 }
 0x926   : > { %v2512_v29 = vadd.f32 %v3005_v48, %v2796_v13  ;;  %v2503_v38 = vpop.f32.mrb[47].mxu1  ;;  %3015 = vmatmul.mubr.msk.bf16.vlgmr.msra.gmra.mrb[40].mxu0 %vm2566_vm4, %v2524_v30  ;;  %v2521_v54 = vmax.f32 %v2509_v50, 0.0 }
 0x927   : > { %v2504_v0 = vadd.f32 %v2796_v13, %v2503_v38  ;;  %v2519_v56 = vmax.f32 %v2501_v16, 0.0 }
 0x928   : > { %v2522_v39 = vmax.f32 %v2512_v29, 0.0 }
 0x929   : > { %v2520_v57 = vmax.f32 %v2504_v0, 0.0 }
 0x92a   : > { %v2526_v60 = vpack.c.bf16 %v2522_v39, %v2521_v54 }
 0x92b   : > { %v2525_v51 = vpack.c.bf16 %v2520_v57, %v2519_v56 }
 0x92d   : > { %3018 = vmatprep.mubr.msk.bf16.mxu0 %vm2566_vm4, %v2525_v51 }
 0x92e   : > { %3019 = vmatmul.mubr.msk.bf16.gmra.mrb[44].mxu0 %vm2566_vm4, %v2526_v60 }
 0x9f9   : > { %v3016_v43 = vpop.f32.mrb[40].mxu0 }
 0x9fa   : > { %v2622_v59 = vadd.f32 %v3016_v43, %v2803_v1  ;;  %v2613_v9 = vpop.f32.mrb[41].mxu0 }
 0x9fb   : > { %v2614_v10 = vadd.f32 %v2803_v1, %v2613_v9  ;;  %v3017_v21 = vpop.f32.mrb[42].mxu0 }
 0x9fc   : > { %v2654_v18 = vadd.f32 %v2646_v20, %v2622_v59  ;;  %v2625_v11 = vadd.f32 %v3017_v21, %v2803_v1  ;;  %v2616_v12 = vpop.f32.mrb[43].mxu0 }
 0x9fd   : > { %v2652_v15 = vadd.f32 %v2644_v27, %v2614_v10  ;;  %v2617_v32 = vadd.f32 %v2803_v1, %v2616_v12 }
 0x9fe   : > { %2662 = vst.msk [vmem:[%s457_s16 + $0x10] sm:$0xff] %vm469_vm0, %v2654_v18  ;;  %v2655_v2 = vadd.f32 %v2647_v23, %v2625_v11 }
 0x9ff   : > { %2660 = vst.msk [vmem:[%s457_s16] sm:$0xff] %vm469_vm0, %v2652_v15  ;;  %v2653_v61 = vadd.f32 %v2645_v31, %v2617_v32 }
 0xa00   : > { %2663 = vst.msk [vmem:[%s457_s16 + $0x18] sm:$0xff] %vm469_vm0, %v2655_v2 }
 0xa01   : > { %2661 = vst.msk [vmem:[%s457_s16 + $0x8] sm:$0xff] %vm469_vm0, %v2653_v61  ;;  %v3020_v4 = vpop.f32.mrb[44].mxu0 }
 0xa02   : > { %v2638_v41 = vadd.f32 %v3020_v4, %v2803_v1  ;;  %v2629_v5 = vpop.f32.mrb[45].mxu0 }
 0xa03   : > { %v2630_v63 = vadd.f32 %v2803_v1, %v2629_v5  ;;  %v3021_v34 = vpop.f32.mrb[46].mxu0 }
 0xa04   : > { %v2658_v3 = vadd.f32 %v2650_v7, %v2638_v41  ;;  %v2641_v17 = vadd.f32 %v3021_v34, %v2803_v1  ;;  %v2632_v13 = vpop.f32.mrb[47].mxu0 }
 0xa05   : > { %v2656_v36 = vadd.f32 %v2648_v62, %v2630_v63  ;;  %v2633_v46 = vadd.f32 %v2803_v1, %v2632_v13 }
 0xa06   : > { %2666 = vst.msk [vmem:[%s457_s16 + $0x30] sm:$0xff] %vm469_vm0, %v2658_v3  ;;  %v2659_v6 = vadd.f32 %v2651_v25, %v2641_v17 }
 0xa07   : > { %2664 = vst.msk [vmem:[%s457_s16 + $0x20] sm:$0xff] %vm469_vm0, %v2656_v36  ;;  %v2657_v53 = vadd.f32 %v2649_v55, %v2633_v46 }
 0xa08   : > { %2667 = vst.msk [vmem:[%s457_s16 + $0x38] sm:$0xff] %vm469_vm0, %v2659_v6 }
 0xa09   : > { %2665 = vst.msk [vmem:[%s457_s16 + $0x28] sm:$0xff] %vm469_vm0, %v2657_v53 }
 0xa0a   : > { %3209 = shalt.err (!%p3206_p3)
}
 0xa0b   : > { %s3210_s24 = scalar_lea.hbm %s4089_s14, 1024  ;;  %s3214_s29 = scalar_lea.hbm %s4149_s13, 2048 }
 0xa0c   : > { %p3211_p5 = scmp.ne.s32.totalorder %s4089_s14, %s3210_s24  ;;  %p3215_p9 = scmp.lt.u32.totalorder %s4089_s14, %s4149_s13 }
 0xa0d   : > { %p3216_p0 = scmp.lt.u32.totalorder %s3214_s29, %s3210_s24  ;;  %p3218_p6 = scmp.lt.u32.totalorder %s3210_s24, %s4089_s14 }
 0xa0e   : > { %p3212_p7 = pnand %p3211_p5, %p4165_p11 }
 0xa0f   : > { %p3217_p2 = por %p3216_p0, %p3215_p9 }
 0xa10   : > { %p3213_p8 = pneg %p3212_p7 }
 0xa11   : > { %p3219_p12 = por %p3218_p6, %p3217_p2 }
 0xa13   : > { %p3220_p13 = pnand %p3219_p12, %p3213_p8 }
 0xa15   : > { %3223 = shalt.err (!%p3220_p13)
}
 0xa16   : > { %s3275_s19 = smov 128   ;;  %s3276_s15 = smov 256  }
 0xa17   : > { %s3277_s30 = smov 8  }
 0xa18   : > { %3028 = dma.vmem_to_hbm [thread:$0]  (%p4165_p11), %s4081_s25, 1024, %s4089_s14, %s2669_s17, %s3275_s19, %s3276_s15, %s3277_s30  }
 0xa19 PF: > { %s4166_s16 = sld [smem:[#allocation8_spill]]  ;;  %p4167_p4 = scmp.ne.s32.totalorder %s4162_s21, 0 }
 0xa1a   : > { %p4168_p10 = scmp.ge.s32.totalorder %s3262_s28, 2 }
 0xa1c   : > { %p3035_p1 = pnand %p4168_p10, %p4167_p4 }
 0xa1f   : > { %s2696_s18 = sand.u32 1, %s4166_s16  }
 0xa20   : > { %s2697_s24 = scalar_lea.sflag [#allocation4], %s2696_s18 }
 0xa21   : > { %3245 = dma.done.wait (!%p3035_p1), %s2697_s24, 1024  }
 0xa22   : > { %3247 = vsyncadd (!%p3035_p1), %s2697_s24, 4294966272  ;;  %s4169_s28 = sld [smem:[#allocation10_spill]]  ;;  %s4170_s29 = sld [smem:[#allocation9_spill]] }
 0xa23   : > { %s4171_s27 = sld [smem:[#allocation11_spill]]  ;;  %s4172_s25 = smov %s3254_s26 }
 0xa28   : > { %p26_p3 = scmp.ge.s32.totalorder %s4169_s28, 4   ;;  %s4173_s26 = smov %s4170_s29 }
 0xa2a   :  { %28 = sbr.rel (!%p26_p3) target bundleno = 5 (0x5), region = 117 }
 0xa31   :  { %2702 = vsyncpa [#allocation3], 1 }
 0xa32   :  { %2704 = vsyncpa [#allocation3 + $0x1], 1 }
 0xa33   :  { %2705 = vsyncpa [#allocation4], 1 }
 0xa34   :  { %2707 = vsyncpa [#allocation4 + $0x1], 1 }

</bundles_post_ra>
